<compile_context>
chip_gen: v7x
topology: tpu7x:2x2x1
jax: 0.10.0
libtpu: 0.0.40
codegen_flags: <defaults>
</compile_context>

<pallas_src>
import numpy as np

import jax
import jax.numpy as jnp
from jax import lax
from jax.experimental import pallas as pl
from jax.experimental.pallas import tpu as pltpu


# ----------------------------------------------------------------------------
# Configuration (consistent with the module's constructor arguments)
# ----------------------------------------------------------------------------
B = 2                  # batch
C_IN = 2               # input_channels (k-space channels)
H = W = 32             # spatial size
PATCH_SIZE = 4
D_MODEL = 16           # d_model == UNet_base_num_features (required for patch_expand)
N_STAGES = 3
UNET_BASE = 16
UNET_MAX = 64
N_ITER = 2             # unrolled iterations (reference default is 6)
FEATURES = [min(UNET_BASE * 2 ** i, UNET_MAX) for i in range(N_STAGES)]   # [16, 32, 64]
STRIDES = [1, 2, 2]

# spatial sizes after: pe conv1, pe conv2, enc stage2 conv, enc stage3 conv
S1, S2, S3, S4 = H // 2, H // 4, H // 8, H // 16            # 16, 8, 4, 2


# ----------------------------------------------------------------------------
# Constant-matrix builders (init time, numpy).  Activation layout per sample is
# (H, W*C) with lane index = w*C + c, so stride / padding / channel handling is
# folded into these matrices and the kernel only runs plain matmuls.
# ----------------------------------------------------------------------------
def _conv_mats_packed(w, h_in, w_in, stride, pad):
    """w: (Cout, Cin, K, K) torch Conv2d weight.  Input (h_in, w_in*Cin).
    out = sum_ki R[ki] @ X @ V[ki]  in layout (Ho, Wo*Cout)."""
    cout, cin, k, _ = w.shape
    ho = (h_in + 2 * pad - k) // stride + 1
    wo = (w_in + 2 * pad - k) // stride + 1
    R = np.zeros((k, ho, h_in), np.float32)
    V = np.zeros((k, w_in * cin, wo * cout), np.float32)
    for ki in range(k):
        for r in range(ho):
            hh = r * stride + ki - pad
            if 0 <= hh < h_in:
                R[ki, r, hh] = 1.0
        for kj in range(k):
            for c in range(wo):
                ww = c * stride + kj - pad
                if 0 <= ww < w_in:
                    V[ki, ww * cin:(ww + 1) * cin, c * cout:(c + 1) * cout] = w[:, :, ki, kj].T
    return R, V


def _conv_mats_chanrows(w, h_in, w_in, stride, pad):
    """As above but the input is NCHW-flattened rows (Cin*h_in, w_in).
    Returns R (K, Ho, h_in), V (K, Cin, w_in, Wo*Cout)."""
    cout, cin, k, _ = w.shape
    ho = (h_in + 2 * pad - k) // stride + 1
    wo = (w_in + 2 * pad - k) // stride + 1
    R = np.zeros((k, ho, h_in), np.float32)
    V = np.zeros((k, cin, w_in, wo * cout), np.float32)
    for ki in range(k):
        for r in range(ho):
            hh = r * stride + ki - pad
            if 0 <= hh < h_in:
                R[ki, r, hh] = 1.0
        for kj in range(k):
            for c in range(wo):
                ww = c * stride + kj - pad
                if 0 <= ww < w_in:
                    V[ki, :, ww, c * cout:(c + 1) * cout] = w[:, :, ki, kj].T
    return R, V


def _tconv_mats_packed(w, h_in, w_in, s):
    """w: (Cin, Cout, s, s) torch ConvTranspose2d weight (kernel == stride).
    out = sum_i Q[i] @ X @ T[i]  in layout (h_in*s, w_in*s*Cout)."""
    cin, cout, _, _ = w.shape
    Q = np.zeros((s, h_in * s, h_in), np.float32)
    T = np.zeros((s, w_in * cin, w_in * s * cout), np.float32)
    for i in range(s):
        for hh in range(h_in):
            Q[i, hh * s + i, hh] = 1.0
        for ww in range(w_in):
            for j in range(s):
                c = ww * s + j
                T[i, ww * cin:(ww + 1) * cin, c * cout:(c + 1) * cout] = w[:, :, i, j]
    return Q, T


def _pexpand_mats(w, h_in, w_in, s):
    """Patch-expand tconv with per-output-channel row blocks (NCHW-compatible):
    out_rows[co] = sum_i Q[i] @ X @ T[i, co]  in layout (h_in*s, w_in*s)."""
    cin, cout, _, _ = w.shape
    Q = np.zeros((s, h_in * s, h_in), np.float32)
    T = np.zeros((s, cout, w_in * cin, w_in * s), np.float32)
    for i in range(s):
        for hh in range(h_in):
            Q[i, hh * s + i, hh] = 1.0
        for ww in range(w_in):
            for j in range(s):
                c = ww * s + j
                for co in range(cout):
                    T[i, co, ww * cin:(ww + 1) * cin, c] = w[:, co, i, j]
    return Q, T


def _ln_avg(w_n, c):
    """Channel-averaging matrix for LayerNorm on (·, w_n*c) packed lanes."""
    A = np.zeros((w_n * c, w_n * c), np.float32)
    for ww in range(w_n):
        A[ww * c:(ww + 1) * c, ww * c:(ww + 1) * c] = 1.0 / c
    return A


def _in_avg(w_n, c):
    """Lane-group averaging matrix for InstanceNorm: maps row-means to
    per-channel spatial means on (·, w_n*c) packed lanes."""
    G = np.zeros((w_n * c, w_n * c), np.float32)
    eye = np.eye(c, dtype=np.float32) / w_n
    for w1 in range(w_n):
        for w2 in range(w_n):
            G[w1 * c:(w1 + 1) * c, w2 * c:(w2 + 1) * c] = eye
    return G


def _trunc_normal_np(key, shape, std=0.01):
    return np.asarray(std * jax.random.truncated_normal(key, -2.0, 2.0, shape, jnp.float32))


# ----------------------------------------------------------------------------
# In-kernel helpers (pure jnp, traced inside the fused layer kernel)
# ----------------------------------------------------------------------------
def _erf_approx(z):
    # Abramowitz & Stegun 7.1.26, |err| < 1.5e-7 (exact-GELU fidelity without
    # relying on a lax.erf Mosaic lowering).
    a1, a2, a3, a4, a5 = 0.254829592, -0.284496736, 1.421413741, -1.453152027, 1.061405429
    pp = 0.3275911
    s = jnp.where(z >= 0.0, 1.0, -1.0)
    az = jnp.abs(z)
    t = 1.0 / (1.0 + pp * az)
    poly = ((((a5 * t + a4) * t + a3) * t + a2) * t + a1) * t
    return s * (1.0 - poly * jnp.exp(-az * az))


def _gelu(x):
    return 0.5 * x * (1.0 + _erf_approx(x * 0.7071067811865476))


def _conv_packed(a, r_ref, v_ref, b_ref):
    k, ho, _ = r_ref.shape
    lo = v_ref.shape[-1]
    acc = jnp.zeros((ho, lo), jnp.float32)
    for ki in range(k):
        rows = jnp.dot(r_ref[ki], a, preferred_element_type=jnp.float32)     # f32 row select
        acc = acc + jnp.dot(rows.astype(jnp.bfloat16), v_ref[ki],
                            preferred_element_type=jnp.float32)
    return acc + b_ref[...]


def _conv_packed2(a, b, r_ref, va_ref, vb_ref, bias_ref):
    # conv applied to channel-concat(a, b): concat folded into the weight split.
    k, ho, _ = r_ref.shape
    lo = va_ref.shape[-1]
    acc = jnp.zeros((ho, lo), jnp.float32)
    for ki in range(k):
        r = r_ref[ki]
        ra = jnp.dot(r, a, preferred_element_type=jnp.float32)
        rb = jnp.dot(r, b, preferred_element_type=jnp.float32)
        acc = acc + jnp.dot(ra.astype(jnp.bfloat16), va_ref[ki],
                            preferred_element_type=jnp.float32)
        acc = acc + jnp.dot(rb.astype(jnp.bfloat16), vb_ref[ki],
                            preferred_element_type=jnp.float32)
    return acc + bias_ref[...]


def _tconv_packed(a, q_ref, t_ref, b_ref):
    s, ho, _ = q_ref.shape
    lo = t_ref.shape[-1]
    acc = jnp.zeros((ho, lo), jnp.float32)
    ab = a.astype(jnp.bfloat16)
    for i in range(s):
        t = jnp.dot(ab, t_ref[i], preferred_element_type=jnp.float32)
        acc = acc + jnp.dot(q_ref[i], t, preferred_element_type=jnp.float32)
    return acc + b_ref[...]


def _layer_norm(a, amat_ref, g_ref, b_ref, eps=1e-5):
    A = amat_ref[...]                                            # f32
    mu = jnp.dot(a, A, preferred_element_type=jnp.float32)
    d = a - mu
    var = jnp.dot(d * d, A, preferred_element_type=jnp.float32)
    y = d * lax.rsqrt(var + eps)
    return y * g_ref[...] + b_ref[...]


def _inst_norm_lrelu(a, gmat_ref, gamma_ref, beta_ref, eps=1e-5, slope=0.01):
    G = gmat_ref[...]                                            # f32
    r = jnp.mean(a, axis=0, keepdims=True)
    mu = jnp.dot(r, G, preferred_element_type=jnp.float32)
    d = a - mu
    r2 = jnp.mean(d * d, axis=0, keepdims=True)
    var = jnp.dot(r2, G, preferred_element_type=jnp.float32)
    y = d * lax.rsqrt(var + eps)
    y = y * gamma_ref[...] + beta_ref[...]
    return jnp.where(y >= 0.0, y, slope * y)


# ----------------------------------------------------------------------------
# Fused whole-layer UNet kernel (one pallas_call per unrolled iteration)
# ----------------------------------------------------------------------------
_PKEYS = (
    'pe1_R', 'pe1_V', 'pe1_b', 'pe1_A', 'pe1_g', 'pe1_be',
    'pe2_R', 'pe2_V', 'pe2_b', 'pe2_A', 'pe2_g', 'pe2_be',
    'enc1_R', 'enc1_V', 'enc1_b',
    'enc2_R', 'enc2_V', 'enc2_b',
    'up0_Q', 'up0_T', 'up0_b',
    'dc0_R', 'dc0_Vu', 'dc0_Vs', 'dc0_b', 'dc0_G', 'dc0_g', 'dc0_be',
    'up1_Q', 'up1_T', 'up1_b',
    'dc1_R', 'dc1_Vu', 'dc1_Vs', 'dc1_b', 'dc1_G', 'dc1_g', 'dc1_be',
    'px_Q', 'px_T', 'px_b',
)


def _unet_layer_kernel(x_ref, *rest):
    g = dict(zip(_PKEYS, rest[:len(_PKEYS)]))
    o_ref = rest[len(_PKEYS)]

    x = x_ref[0].astype(jnp.float32)                             # (C_IN*H, W)

    # --- per-sample normalization (torch: mean over c*h*w, unbiased std, no eps) ---
    n = float(x.shape[0] * x.shape[1])
    mean = jnp.sum(jnp.sum(x, axis=1, keepdims=True), axis=0, keepdims=True) * (1.0 / n)
    d = x - mean
    var = jnp.sum(jnp.sum(d * d, axis=1, keepdims=True), axis=0, keepdims=True) * (1.0 / (n - 1.0))
    std = jnp.sqrt(var)
    xn = d * lax.rsqrt(var)                                      # f32, stays in VMEM

    # --- patch embed conv1 (C_IN -> f0/2, k3 s2 p1) + LN + GELU ---
    r_ref, v_ref = g['pe1_R'], g['pe1_V']
    acc = jnp.zeros((r_ref.shape[1], v_ref.shape[-1]), jnp.float32)
    for ci in range(C_IN):
        xc = xn[ci * H:(ci + 1) * H, :]
        for ki in range(3):
            rows = jnp.dot(r_ref[ki], xc, preferred_element_type=jnp.float32)
            acc = acc + jnp.dot(rows.astype(jnp.bfloat16), v_ref[ki, ci],
                                preferred_element_type=jnp.float32)
    acc = acc + g['pe1_b'][...]
    a1 = _gelu(_layer_norm(acc, g['pe1_A'], g['pe1_g'], g['pe1_be']))

    # --- patch embed conv2 (f0/2 -> f0, k3 s2 p1) + LN ---
    a2 = _layer_norm(_conv_packed(a1, g['pe2_R'], g['pe2_V'], g['pe2_b']),
                     g['pe2_A'], g['pe2_g'], g['pe2_be'])
    # TODO(synk): VSSBlock (2-D selective-scan SSM) not defined in the source; identity.

    # --- encoder downsampling convs (stages 2, 3) ---
    e1 = _conv_packed(a2, g['enc1_R'], g['enc1_V'], g['enc1_b'])
    e2 = _conv_packed(e1, g['enc2_R'], g['enc2_V'], g['enc2_b'])

    # --- decoder stage 0: tconv(64->32, k2 s2), cat skip, conv, IN+LReLU ---
    u0 = _tconv_packed(e2, g['up0_Q'], g['up0_T'], g['up0_b'])
    d0 = _conv_packed2(u0, e1, g['dc0_R'], g['dc0_Vu'], g['dc0_Vs'], g['dc0_b'])
    d0 = _inst_norm_lrelu(d0, g['dc0_G'], g['dc0_g'], g['dc0_be'])

    # --- decoder stage 1: tconv(32->16, k2 s2), cat skip, conv, IN+LReLU ---
    u1 = _tconv_packed(d0, g['up1_Q'], g['up1_T'], g['up1_b'])
    d1 = _conv_packed2(u1, a2, g['dc1_R'], g['dc1_Vu'], g['dc1_Vs'], g['dc1_b'])
    d1 = _inst_norm_lrelu(d1, g['dc1_G'], g['dc1_g'], g['dc1_be'])

    # --- patch expand (f0 -> C_IN, k4 s4) + per-sample unnorm, NCHW-row output ---
    qp, tp, bp = g['px_Q'], g['px_T'], g['px_b']
    d1b = d1.astype(jnp.bfloat16)
    for co in range(C_IN):
        acc = jnp.zeros((H, W), jnp.float32)
        for i in range(PATCH_SIZE):
            t = jnp.dot(d1b, tp[i, co], preferred_element_type=jnp.float32)
            acc = acc + jnp.dot(qp[i], t, preferred_element_type=jnp.float32)
        acc = acc + bp[co:co + 1, :]
        o_ref[0, co * H:(co + 1) * H, :] = acc * std + mean


def _const_index_map(ndim):
    return lambda b: (0,) * ndim


def fused_unet_layer(x_rows, params):
    """x_rows: (B, C_IN*H, W) f32 (NCHW-flattened rows). Returns same layout."""
    bn = x_rows.shape[0]
    in_specs = [pl.BlockSpec((1, C_IN * H, W), lambda b: (b, 0, 0))]
    args = [x_rows]
    for k in _PKEYS:
        a = params[k]
        in_specs.append(pl.BlockSpec(a.shape, _const_index_map(a.ndim)))
        args.append(a)
    return pl.pallas_call(
        _unet_layer_kernel,
        out_shape=jax.ShapeDtypeStruct((bn, C_IN * H, W), jnp.float32),
        grid=(bn,),
        in_specs=in_specs,
        out_specs=pl.BlockSpec((1, C_IN * H, W), lambda b: (b, 0, 0)),
        compiler_params=pltpu.CompilerParams(dimension_semantics=("arbitrary",)),
    )(*args)


# ----------------------------------------------------------------------------
# Soft data-consistency (DC_type='VN'):  DC(uk, mask, uk0) - Gk   (complex)
# Lane-dense: arrays flattened to (B, C, H*W); single invocation, no grid.
# ----------------------------------------------------------------------------
def _dc_vn_kernel(w_ref, m_ref, ukr_ref, uki_ref, u0r_ref, u0i_ref,
                  gkr_ref, gki_ref, or_ref, oi_ref):
    w = w_ref[0]                       # SMEM scalar
    m = m_ref[...]                     # (B, 1, HW) broadcasts over C
    keep = 1.0 - m * w                 # (1-m)*uk + m*uk*(1-w) == uk*(1 - m*w)
    inj = m * w
    or_ref[...] = ukr_ref[...] * keep + u0r_ref[...] * inj - gkr_ref[...]
    oi_ref[...] = uki_ref[...] * keep + u0i_ref[...] * inj - gki_ref[...]


def dc_vn(uk, uk0, gk, mask, dc_w):
    bn, c, hn, wn = uk.shape
    hw = hn * wn
    flat = lambda z: z.reshape(bn, c, hw)
    ukr, uki = flat(jnp.real(uk)), flat(jnp.imag(uk))
    u0r, u0i = flat(jnp.real(uk0)), flat(jnp.imag(uk0))
    gkr, gki = flat(jnp.real(gk)), flat(jnp.imag(gk))
    m = mask.astype(jnp.float32).reshape(bn, 1, hw)
    vmem = pl.BlockSpec(memory_space=pltpu.MemorySpace.VMEM)
    outr, outi = pl.pallas_call(
        _dc_vn_kernel,
        out_shape=(jax.ShapeDtypeStruct((bn, c, hw), jnp.float32),
                   jax.ShapeDtypeStruct((bn, c, hw), jnp.float32)),
        in_specs=[pl.BlockSpec(memory_space=pltpu.MemorySpace.SMEM)] + [vmem] * 7,
        out_specs=(vmem, vmem),
    )(dc_w, m, ukr, uki, u0r, u0i, gkr, gki)
    return lax.complex(outr, outi).reshape(bn, c, hn, wn)


# ----------------------------------------------------------------------------
# FFT helpers (XLA glue; fastmri-style centered orthonormal 2-D FFT assumed)
# ----------------------------------------------------------------------------
def fft2c(x):
    return jnp.fft.fftshift(
        jnp.fft.fft2(jnp.fft.ifftshift(x, axes=(-2, -1)), axes=(-2, -1), norm='ortho'),
        axes=(-2, -1))


def ifft2c(x):
    return jnp.fft.fftshift(
        jnp.fft.ifft2(jnp.fft.ifftshift(x, axes=(-2, -1)), axes=(-2, -1), norm='ortho'),
        axes=(-2, -1))


# ----------------------------------------------------------------------------
# Parameter / constant-matrix initialization (once, at init)
# ----------------------------------------------------------------------------
def init_layer_params(key):
    ks = jax.random.split(key, 9)
    f0, f1, f2 = FEATURES
    bf = jnp.bfloat16
    f32 = jnp.float32
    p = {}

    # patch_embed_v2: Conv(C_IN->f0/2,k3,s2,p1)->LN->GELU->Conv(f0/2->f0,k3,s2,p1)->LN
    w = _trunc_normal_np(ks[0], (f0 // 2, C_IN, 3, 3))
    R, V = _conv_mats_chanrows(w, H, W, 2, 1)
    L1 = S1 * (f0 // 2)                                             # 128
    p['pe1_R'], p['pe1_V'] = jnp.asarray(R, f32), jnp.asarray(V, bf)
    p['pe1_b'] = jnp.zeros((1, L1), f32)                            # conv bias (zero init)
    p['pe1_A'] = jnp.asarray(_ln_avg(S1, f0 // 2), f32)
    p['pe1_g'], p['pe1_be'] = jnp.ones((1, L1), f32), jnp.zeros((1, L1), f32)

    w = _trunc_normal_np(ks[1], (f0, f0 // 2, 3, 3))
    R, V = _conv_mats_packed(w, S1, S1, 2, 1)
    L2 = S2 * f0                                                    # 128
    p['pe2_R'], p['pe2_V'] = jnp.asarray(R, f32), jnp.asarray(V, bf)
    p['pe2_b'] = jnp.zeros((1, L2), f32)
    p['pe2_A'] = jnp.asarray(_ln_avg(S2, f0), f32)
    p['pe2_g'], p['pe2_be'] = jnp.ones((1, L2), f32), jnp.zeros((1, L2), f32)

    # encoder downsampling convs (k3 s2 p1); VSSBlocks are identity (see TODO)
    w = _trunc_normal_np(ks[2], (f1, f0, 3, 3))
    R, V = _conv_mats_packed(w, S2, S2, 2, 1)
    p['enc1_R'], p['enc1_V'] = jnp.asarray(R, f32), jnp.asarray(V, bf)
    p['enc1_b'] = jnp.zeros((1, S3 * f1), f32)

    w = _trunc_normal_np(ks[3], (f2, f1, 3, 3))
    R, V = _conv_mats_packed(w, S3, S3, 2, 1)
    p['enc2_R'], p['enc2_V'] = jnp.asarray(R, f32), jnp.asarray(V, bf)
    p['enc2_b'] = jnp.zeros((1, S4 * f2), f32)

    # decoder stage 0: ConvTranspose2d(f2->f1,k2,s2), conv(2*f1->f1,k3,p1), IN+LReLU
    w = _trunc_normal_np(ks[4], (f2, f1, 2, 2))
    Q, T = _tconv_mats_packed(w, S4, S4, 2)
    p['up0_Q'], p['up0_T'] = jnp.asarray(Q, f32), jnp.asarray(T, bf)
    p['up0_b'] = jnp.zeros((1, S3 * f1), f32)

    w = _trunc_normal_np(ks[5], (f1, 2 * f1, 3, 3))
    Ru, Vu = _conv_mats_packed(w[:, :f1], S3, S3, 1, 1)             # 'up' input half
    _, Vs = _conv_mats_packed(w[:, f1:], S3, S3, 1, 1)              # 'skip' input half
    p['dc0_R'], p['dc0_Vu'], p['dc0_Vs'] = jnp.asarray(Ru, f32), jnp.asarray(Vu, bf), jnp.asarray(Vs, bf)
    p['dc0_b'] = jnp.zeros((1, S3 * f1), f32)
    p['dc0_G'] = jnp.asarray(_in_avg(S3, f1), f32)
    p['dc0_g'], p['dc0_be'] = jnp.ones((1, S3 * f1), f32), jnp.zeros((1, S3 * f1), f32)

    # decoder stage 1: ConvTranspose2d(f1->f0,k2,s2), conv(2*f0->f0,k3,p1), IN+LReLU
    w = _trunc_normal_np(ks[6], (f1, f0, 2, 2))
    Q, T = _tconv_mats_packed(w, S3, S3, 2)
    p['up1_Q'], p['up1_T'] = jnp.asarray(Q, f32), jnp.asarray(T, bf)
    p['up1_b'] = jnp.zeros((1, S2 * f0), f32)

    w = _trunc_normal_np(ks[7], (f0, 2 * f0, 3, 3))
    Ru, Vu = _conv_mats_packed(w[:, :f0], S2, S2, 1, 1)
    _, Vs = _conv_mats_packed(w[:, f0:], S2, S2, 1, 1)
    p['dc1_R'], p['dc1_Vu'], p['dc1_Vs'] = jnp.asarray(Ru, f32), jnp.asarray(Vu, bf), jnp.asarray(Vs, bf)
    p['dc1_b'] = jnp.zeros((1, S2 * f0), f32)
    p['dc1_G'] = jnp.asarray(_in_avg(S2, f0), f32)
    p['dc1_g'], p['dc1_be'] = jnp.ones((1, S2 * f0), f32), jnp.zeros((1, S2 * f0), f32)

    # patch_expand: ConvTranspose2d(d_model -> C_IN, k=patch_size, s=patch_size)
    w = _trunc_normal_np(ks[8], (D_MODEL, C_IN, PATCH_SIZE, PATCH_SIZE))
    Q, T = _pexpand_mats(w, S2, S2, PATCH_SIZE)
    p['px_Q'], p['px_T'] = jnp.asarray(Q, f32), jnp.asarray(T, bf)
    p['px_b'] = jnp.zeros((C_IN, W), f32)                           # bias tiled over W (zero init)

    # soft DC weight (nn.Parameter initialised to 1.0) -- 1-D SMEM scalar
    p['dc_w'] = jnp.ones((1,), f32)
    return p


# ----------------------------------------------------------------------------
# VSSMUNet layer forward (apply_model + VN data consistency) and unrolled loop
# ----------------------------------------------------------------------------
def vssmunet_layer(p, uk, mask, uk0, out_put):
    # apply_model with sens=None, post=None, iz_rec=None path
    img = jnp.real(ifft2c(uk)).astype(jnp.float32)                  # (B, C, H, W)
    rec_rows = fused_unet_layer(img.reshape(img.shape[0], C_IN * H, W), p)
    rec = rec_rows.reshape(img.shape[0], C_IN, H, W)                # free reshape
    Gk = fft2c(rec.astype(jnp.complex64))
    k_out = dc_vn(uk, uk0, Gk, mask, p['dc_w'])                     # DC(uk,mask,uk0) - Gk
    if out_put:
        return jnp.real(ifft2c(k_out)).astype(jnp.float32)          # last layer returns [i_rec]
    return k_out


def vssmunet_unrolled_forward(layer_params, x, mask):
    # csm None -> sens None; posterior_sampler None -> posterior / iz_rec None
    uk0 = x
    out = x
    n = len(layer_params)
    for i, p in enumerate(layer_params):
        out = vssmunet_layer(p, out, mask, uk0, out_put=(i == n - 1))
    return out                                                      # == x[0] of the reference


# ----------------------------------------------------------------------------
if __name__ == "__main__":
    key = jax.random.PRNGKey(0)
    k_img, k_mask, k_par = jax.random.split(key, 3)

    img0 = jax.random.normal(k_img, (B, C_IN, H, W), jnp.float32)
    x = fft2c(img0.astype(jnp.complex64))                           # synthetic k-space input
    mask = jax.random.bernoulli(k_mask, 0.4, (B, 1, H, W)).astype(jnp.float32)
    layer_params = [init_layer_params(k) for k in jax.random.split(k_par, N_ITER)]

    fwd = jax.jit(vssmunet_unrolled_forward)
    out = fwd(layer_params, x, mask)
    jax.block_until_ready(out)
    assert out.shape == (B, C_IN, H, W) and out.dtype == jnp.float32
    print("KERNEL_OK")
</pallas_src>

<mosaic_0001>
module attributes {stable_mosaic.version = 11 : i64} {
  func.func @_unet_layer_kernel(%arg0: i32, %arg1: memref<1x64x32xf32, #tpu.memory_space<vmem>>, %arg2: memref<3x16x32xf32, #tpu.memory_space<vmem>>, %arg3: memref<3x2x32x128xbf16, #tpu.memory_space<vmem>>, %arg4: memref<1x128xf32, #tpu.memory_space<vmem>>, %arg5: memref<128x128xf32, #tpu.memory_space<vmem>>, %arg6: memref<1x128xf32, #tpu.memory_space<vmem>>, %arg7: memref<1x128xf32, #tpu.memory_space<vmem>>, %arg8: memref<3x8x16xf32, #tpu.memory_space<vmem>>, %arg9: memref<3x128x128xbf16, #tpu.memory_space<vmem>>, %arg10: memref<1x128xf32, #tpu.memory_space<vmem>>, %arg11: memref<128x128xf32, #tpu.memory_space<vmem>>, %arg12: memref<1x128xf32, #tpu.memory_space<vmem>>, %arg13: memref<1x128xf32, #tpu.memory_space<vmem>>, %arg14: memref<3x4x8xf32, #tpu.memory_space<vmem>>, %arg15: memref<3x128x128xbf16, #tpu.memory_space<vmem>>, %arg16: memref<1x128xf32, #tpu.memory_space<vmem>>, %arg17: memref<3x2x4xf32, #tpu.memory_space<vmem>>, %arg18: memref<3x128x128xbf16, #tpu.memory_space<vmem>>, %arg19: memref<1x128xf32, #tpu.memory_space<vmem>>, %arg20: memref<2x4x2xf32, #tpu.memory_space<vmem>>, %arg21: memref<2x128x128xbf16, #tpu.memory_space<vmem>>, %arg22: memref<1x128xf32, #tpu.memory_space<vmem>>, %arg23: memref<3x4x4xf32, #tpu.memory_space<vmem>>, %arg24: memref<3x128x128xbf16, #tpu.memory_space<vmem>>, %arg25: memref<3x128x128xbf16, #tpu.memory_space<vmem>>, %arg26: memref<1x128xf32, #tpu.memory_space<vmem>>, %arg27: memref<128x128xf32, #tpu.memory_space<vmem>>, %arg28: memref<1x128xf32, #tpu.memory_space<vmem>>, %arg29: memref<1x128xf32, #tpu.memory_space<vmem>>, %arg30: memref<2x8x4xf32, #tpu.memory_space<vmem>>, %arg31: memref<2x128x128xbf16, #tpu.memory_space<vmem>>, %arg32: memref<1x128xf32, #tpu.memory_space<vmem>>, %arg33: memref<3x8x8xf32, #tpu.memory_space<vmem>>, %arg34: memref<3x128x128xbf16, #tpu.memory_space<vmem>>, %arg35: memref<3x128x128xbf16, #tpu.memory_space<vmem>>, %arg36: memref<1x128xf32, #tpu.memory_space<vmem>>, %arg37: memref<128x128xf32, #tpu.memory_space<vmem>>, %arg38: memref<1x128xf32, #tpu.memory_space<vmem>>, %arg39: memref<1x128xf32, #tpu.memory_space<vmem>>, %arg40: memref<4x32x8xf32, #tpu.memory_space<vmem>>, %arg41: memref<4x2x128x32xbf16, #tpu.memory_space<vmem>>, %arg42: memref<2x32xf32, #tpu.memory_space<vmem>>, %arg43: memref<1x64x32xf32, #tpu.memory_space<vmem>>) attributes {dimension_semantics = [#tpu.dimension_semantics<arbitrary>], iteration_bounds = array<i64: 2>, scalar_prefetch = 0 : i64, scratch_operands = 0 : i64, tpu.core_type = #tpu.core_type<tc>, window_params = [{transform_indices = @transform_0, window_bounds = array<i64: 1, 64, 32>}, {pipeline_mode = #tpu.pipeline_mode<synchronous>, transform_indices = @transform_1, window_bounds = array<i64: 3, 16, 32>}, {pipeline_mode = #tpu.pipeline_mode<synchronous>, transform_indices = @transform_2, window_bounds = array<i64: 3, 2, 32, 128>}, {pipeline_mode = #tpu.pipeline_mode<synchronous>, transform_indices = @transform_3, window_bounds = array<i64: 1, 128>}, {pipeline_mode = #tpu.pipeline_mode<synchronous>, transform_indices = @transform_4, window_bounds = array<i64: 128, 128>}, {pipeline_mode = #tpu.pipeline_mode<synchronous>, transform_indices = @transform_5, window_bounds = array<i64: 1, 128>}, {pipeline_mode = #tpu.pipeline_mode<synchronous>, transform_indices = @transform_6, window_bounds = array<i64: 1, 128>}, {pipeline_mode = #tpu.pipeline_mode<synchronous>, transform_indices = @transform_7, window_bounds = array<i64: 3, 8, 16>}, {pipeline_mode = #tpu.pipeline_mode<synchronous>, transform_indices = @transform_8, window_bounds = array<i64: 3, 128, 128>}, {pipeline_mode = #tpu.pipeline_mode<synchronous>, transform_indices = @transform_9, window_bounds = array<i64: 1, 128>}, {pipeline_mode = #tpu.pipeline_mode<synchronous>, transform_indices = @transform_10, window_bounds = array<i64: 128, 128>}, {pipeline_mode = #tpu.pipeline_mode<synchronous>, transform_indices = @transform_11, window_bounds = array<i64: 1, 128>}, {pipeline_mode = #tpu.pipeline_mode<synchronous>, transform_indices = @transform_12, window_bounds = array<i64: 1, 128>}, {pipeline_mode = #tpu.pipeline_mode<synchronous>, transform_indices = @transform_13, window_bounds = array<i64: 3, 4, 8>}, {pipeline_mode = #tpu.pipeline_mode<synchronous>, transform_indices = @transform_14, window_bounds = array<i64: 3, 128, 128>}, {pipeline_mode = #tpu.pipeline_mode<synchronous>, transform_indices = @transform_15, window_bounds = array<i64: 1, 128>}, {pipeline_mode = #tpu.pipeline_mode<synchronous>, transform_indices = @transform_16, window_bounds = array<i64: 3, 2, 4>}, {pipeline_mode = #tpu.pipeline_mode<synchronous>, transform_indices = @transform_17, window_bounds = array<i64: 3, 128, 128>}, {pipeline_mode = #tpu.pipeline_mode<synchronous>, transform_indices = @transform_18, window_bounds = array<i64: 1, 128>}, {pipeline_mode = #tpu.pipeline_mode<synchronous>, transform_indices = @transform_19, window_bounds = array<i64: 2, 4, 2>}, {pipeline_mode = #tpu.pipeline_mode<synchronous>, transform_indices = @transform_20, window_bounds = array<i64: 2, 128, 128>}, {pipeline_mode = #tpu.pipeline_mode<synchronous>, transform_indices = @transform_21, window_bounds = array<i64: 1, 128>}, {pipeline_mode = #tpu.pipeline_mode<synchronous>, transform_indices = @transform_22, window_bounds = array<i64: 3, 4, 4>}, {pipeline_mode = #tpu.pipeline_mode<synchronous>, transform_indices = @transform_23, window_bounds = array<i64: 3, 128, 128>}, {pipeline_mode = #tpu.pipeline_mode<synchronous>, transform_indices = @transform_24, window_bounds = array<i64: 3, 128, 128>}, {pipeline_mode = #tpu.pipeline_mode<synchronous>, transform_indices = @transform_25, window_bounds = array<i64: 1, 128>}, {pipeline_mode = #tpu.pipeline_mode<synchronous>, transform_indices = @transform_26, window_bounds = array<i64: 128, 128>}, {pipeline_mode = #tpu.pipeline_mode<synchronous>, transform_indices = @transform_27, window_bounds = array<i64: 1, 128>}, {pipeline_mode = #tpu.pipeline_mode<synchronous>, transform_indices = @transform_28, window_bounds = array<i64: 1, 128>}, {pipeline_mode = #tpu.pipeline_mode<synchronous>, transform_indices = @transform_29, window_bounds = array<i64: 2, 8, 4>}, {pipeline_mode = #tpu.pipeline_mode<synchronous>, transform_indices = @transform_30, window_bounds = array<i64: 2, 128, 128>}, {pipeline_mode = #tpu.pipeline_mode<synchronous>, transform_indices = @transform_31, window_bounds = array<i64: 1, 128>}, {pipeline_mode = #tpu.pipeline_mode<synchronous>, transform_indices = @transform_32, window_bounds = array<i64: 3, 8, 8>}, {pipeline_mode = #tpu.pipeline_mode<synchronous>, transform_indices = @transform_33, window_bounds = array<i64: 3, 128, 128>}, {pipeline_mode = #tpu.pipeline_mode<synchronous>, transform_indices = @transform_34, window_bounds = array<i64: 3, 128, 128>}, {pipeline_mode = #tpu.pipeline_mode<synchronous>, transform_indices = @transform_35, window_bounds = array<i64: 1, 128>}, {pipeline_mode = #tpu.pipeline_mode<synchronous>, transform_indices = @transform_36, window_bounds = array<i64: 128, 128>}, {pipeline_mode = #tpu.pipeline_mode<synchronous>, transform_indices = @transform_37, window_bounds = array<i64: 1, 128>}, {pipeline_mode = #tpu.pipeline_mode<synchronous>, transform_indices = @transform_38, window_bounds = array<i64: 1, 128>}, {pipeline_mode = #tpu.pipeline_mode<synchronous>, transform_indices = @transform_39, window_bounds = array<i64: 4, 32, 8>}, {pipeline_mode = #tpu.pipeline_mode<synchronous>, transform_indices = @transform_40, window_bounds = array<i64: 4, 2, 128, 32>}, {pipeline_mode = #tpu.pipeline_mode<synchronous>, transform_indices = @transform_41, window_bounds = array<i64: 2, 32>}, {transform_indices = @transform_42, window_bounds = array<i64: 1, 64, 32>}]} {
    %c0 = arith.constant 0 : index
    %c0_0 = arith.constant 0 : index
    %c0_1 = arith.constant 0 : index
    %0 = vector.load %arg1[%c0, %c0_0, %c0_1] : memref<1x64x32xf32, #tpu.memory_space<vmem>>, vector<1x64x32xf32>
    %1 = vector.shape_cast %0 : vector<1x64x32xf32> to vector<64x32xf32>
    %cst = arith.constant dense<0.000000e+00> : vector<64xf32>
    %2 = vector.multi_reduction <add>, %1, %cst [1] : vector<64x32xf32> to vector<64xf32>
    %3 = vector.shape_cast %2 : vector<64xf32> to vector<64x1xf32>
    %cst_2 = arith.constant dense<0.000000e+00> : vector<1xf32>
    %4 = vector.multi_reduction <add>, %3, %cst_2 [0] : vector<64x1xf32> to vector<1xf32>
    %5 = vector.shape_cast %4 : vector<1xf32> to vector<1x1xf32>
    %cst_3 = arith.constant 4.8828125E-4 : f32
    %6 = vector.broadcast %cst_3 : f32 to vector<1x1xf32>
    %7 = arith.mulf %5, %6 : vector<1x1xf32>
    %8 = vector.broadcast %7 : vector<1x1xf32> to vector<64x32xf32>
    %9 = arith.subf %1, %8 : vector<64x32xf32>
    %10 = arith.mulf %9, %9 : vector<64x32xf32>
    %cst_4 = arith.constant dense<0.000000e+00> : vector<64xf32>
    %11 = vector.multi_reduction <add>, %10, %cst_4 [1] : vector<64x32xf32> to vector<64xf32>
    %12 = vector.shape_cast %11 : vector<64xf32> to vector<64x1xf32>
    %cst_5 = arith.constant dense<0.000000e+00> : vector<1xf32>
    %13 = vector.multi_reduction <add>, %12, %cst_5 [0] : vector<64x1xf32> to vector<1xf32>
    %14 = vector.shape_cast %13 : vector<1xf32> to vector<1x1xf32>
    %cst_6 = arith.constant 4.88519785E-4 : f32
    %15 = vector.broadcast %cst_6 : f32 to vector<1x1xf32>
    %16 = arith.mulf %14, %15 : vector<1x1xf32>
    %17 = math.sqrt %16 : vector<1x1xf32>
    %18 = math.rsqrt %16 : vector<1x1xf32>
    %19 = vector.broadcast %18 : vector<1x1xf32> to vector<64x32xf32>
    %20 = arith.mulf %9, %19 : vector<64x32xf32>
    %cst_7 = arith.constant 0.000000e+00 : f32
    %21 = vector.broadcast %cst_7 : f32 to vector<16x128xf32>
    %22 = vector.extract_strided_slice %20 {offsets = [0, 0], sizes = [32, 32], strides = [1, 1]} : vector<64x32xf32> to vector<32x32xf32>
    %c0_8 = arith.constant 0 : index
    %c0_9 = arith.constant 0 : index
    %c0_10 = arith.constant 0 : index
    %23 = vector.load %arg2[%c0_8, %c0_9, %c0_10] : memref<3x16x32xf32, #tpu.memory_space<vmem>>, vector<1x16x32xf32>
    %24 = vector.shape_cast %23 : vector<1x16x32xf32> to vector<16x32xf32>
    %cst_11 = arith.constant dense<0.000000e+00> : vector<16x32xf32>
    %25 = tpu.matmul %24, %22, %cst_11 {dimension_numbers = #tpu.dot_dimension_numbers<[1], [0], [0], [1], [0, 0, 1, 1], [], []>} : vector<16x32xf32>, vector<32x32xf32>, vector<16x32xf32> -> vector<16x32xf32>
    %26 = arith.truncf %25 : vector<16x32xf32> to vector<16x32xbf16>
    %c0_12 = arith.constant 0 : index
    %c0_13 = arith.constant 0 : index
    %c0_14 = arith.constant 0 : index
    %c0_15 = arith.constant 0 : index
    %27 = vector.load %arg3[%c0_12, %c0_13, %c0_14, %c0_15] : memref<3x2x32x128xbf16, #tpu.memory_space<vmem>>, vector<1x1x32x128xbf16>
    %28 = vector.shape_cast %27 : vector<1x1x32x128xbf16> to vector<32x128xbf16>
    %cst_16 = arith.constant dense<0.000000e+00> : vector<16x128xf32>
    %29 = tpu.matmul %26, %28, %cst_16 {dimension_numbers = #tpu.dot_dimension_numbers<[1], [0], [0], [1], [0, 0, 1, 1], [], []>} : vector<16x32xbf16>, vector<32x128xbf16>, vector<16x128xf32> -> vector<16x128xf32>
    %30 = arith.addf %21, %29 : vector<16x128xf32>
    %c1 = arith.constant 1 : index
    %c0_17 = arith.constant 0 : index
    %c0_18 = arith.constant 0 : index
    %31 = vector.load %arg2[%c1, %c0_17, %c0_18] : memref<3x16x32xf32, #tpu.memory_space<vmem>>, vector<1x16x32xf32>
    %32 = vector.shape_cast %31 : vector<1x16x32xf32> to vector<16x32xf32>
    %cst_19 = arith.constant dense<0.000000e+00> : vector<16x32xf32>
    %33 = tpu.matmul %32, %22, %cst_19 {dimension_numbers = #tpu.dot_dimension_numbers<[1], [0], [0], [1], [0, 0, 1, 1], [], []>} : vector<16x32xf32>, vector<32x32xf32>, vector<16x32xf32> -> vector<16x32xf32>
    %34 = arith.truncf %33 : vector<16x32xf32> to vector<16x32xbf16>
    %c1_20 = arith.constant 1 : index
    %c0_21 = arith.constant 0 : index
    %c0_22 = arith.constant 0 : index
    %c0_23 = arith.constant 0 : index
    %35 = vector.load %arg3[%c1_20, %c0_21, %c0_22, %c0_23] : memref<3x2x32x128xbf16, #tpu.memory_space<vmem>>, vector<1x1x32x128xbf16>
    %36 = vector.shape_cast %35 : vector<1x1x32x128xbf16> to vector<32x128xbf16>
    %cst_24 = arith.constant dense<0.000000e+00> : vector<16x128xf32>
    %37 = tpu.matmul %34, %36, %cst_24 {dimension_numbers = #tpu.dot_dimension_numbers<[1], [0], [0], [1], [0, 0, 1, 1], [], []>} : vector<16x32xbf16>, vector<32x128xbf16>, vector<16x128xf32> -> vector<16x128xf32>
    %38 = arith.addf %30, %37 : vector<16x128xf32>
    %c2 = arith.constant 2 : index
    %c0_25 = arith.constant 0 : index
    %c0_26 = arith.constant 0 : index
    %39 = vector.load %arg2[%c2, %c0_25, %c0_26] : memref<3x16x32xf32, #tpu.memory_space<vmem>>, vector<1x16x32xf32>
    %40 = vector.shape_cast %39 : vector<1x16x32xf32> to vector<16x32xf32>
    %cst_27 = arith.constant dense<0.000000e+00> : vector<16x32xf32>
    %41 = tpu.matmul %40, %22, %cst_27 {dimension_numbers = #tpu.dot_dimension_numbers<[1], [0], [0], [1], [0, 0, 1, 1], [], []>} : vector<16x32xf32>, vector<32x32xf32>, vector<16x32xf32> -> vector<16x32xf32>
    %42 = arith.truncf %41 : vector<16x32xf32> to vector<16x32xbf16>
    %c2_28 = arith.constant 2 : index
    %c0_29 = arith.constant 0 : index
    %c0_30 = arith.constant 0 : index
    %c0_31 = arith.constant 0 : index
    %43 = vector.load %arg3[%c2_28, %c0_29, %c0_30, %c0_31] : memref<3x2x32x128xbf16, #tpu.memory_space<vmem>>, vector<1x1x32x128xbf16>
    %44 = vector.shape_cast %43 : vector<1x1x32x128xbf16> to vector<32x128xbf16>
    %cst_32 = arith.constant dense<0.000000e+00> : vector<16x128xf32>
    %45 = tpu.matmul %42, %44, %cst_32 {dimension_numbers = #tpu.dot_dimension_numbers<[1], [0], [0], [1], [0, 0, 1, 1], [], []>} : vector<16x32xbf16>, vector<32x128xbf16>, vector<16x128xf32> -> vector<16x128xf32>
    %46 = arith.addf %38, %45 : vector<16x128xf32>
    %47 = vector.extract_strided_slice %20 {offsets = [32, 0], sizes = [32, 32], strides = [1, 1]} : vector<64x32xf32> to vector<32x32xf32>
    %c0_33 = arith.constant 0 : index
    %c0_34 = arith.constant 0 : index
    %c0_35 = arith.constant 0 : index
    %48 = vector.load %arg2[%c0_33, %c0_34, %c0_35] : memref<3x16x32xf32, #tpu.memory_space<vmem>>, vector<1x16x32xf32>
    %49 = vector.shape_cast %48 : vector<1x16x32xf32> to vector<16x32xf32>
    %cst_36 = arith.constant dense<0.000000e+00> : vector<16x32xf32>
    %50 = tpu.matmul %49, %47, %cst_36 {dimension_numbers = #tpu.dot_dimension_numbers<[1], [0], [0], [1], [0, 0, 1, 1], [], []>} : vector<16x32xf32>, vector<32x32xf32>, vector<16x32xf32> -> vector<16x32xf32>
    %51 = arith.truncf %50 : vector<16x32xf32> to vector<16x32xbf16>
    %c0_37 = arith.constant 0 : index
    %c1_38 = arith.constant 1 : index
    %c0_39 = arith.constant 0 : index
    %c0_40 = arith.constant 0 : index
    %52 = vector.load %arg3[%c0_37, %c1_38, %c0_39, %c0_40] : memref<3x2x32x128xbf16, #tpu.memory_space<vmem>>, vector<1x1x32x128xbf16>
    %53 = vector.shape_cast %52 : vector<1x1x32x128xbf16> to vector<32x128xbf16>
    %cst_41 = arith.constant dense<0.000000e+00> : vector<16x128xf32>
    %54 = tpu.matmul %51, %53, %cst_41 {dimension_numbers = #tpu.dot_dimension_numbers<[1], [0], [0], [1], [0, 0, 1, 1], [], []>} : vector<16x32xbf16>, vector<32x128xbf16>, vector<16x128xf32> -> vector<16x128xf32>
    %55 = arith.addf %46, %54 : vector<16x128xf32>
    %c1_42 = arith.constant 1 : index
    %c0_43 = arith.constant 0 : index
    %c0_44 = arith.constant 0 : index
    %56 = vector.load %arg2[%c1_42, %c0_43, %c0_44] : memref<3x16x32xf32, #tpu.memory_space<vmem>>, vector<1x16x32xf32>
    %57 = vector.shape_cast %56 : vector<1x16x32xf32> to vector<16x32xf32>
    %cst_45 = arith.constant dense<0.000000e+00> : vector<16x32xf32>
    %58 = tpu.matmul %57, %47, %cst_45 {dimension_numbers = #tpu.dot_dimension_numbers<[1], [0], [0], [1], [0, 0, 1, 1], [], []>} : vector<16x32xf32>, vector<32x32xf32>, vector<16x32xf32> -> vector<16x32xf32>
    %59 = arith.truncf %58 : vector<16x32xf32> to vector<16x32xbf16>
    %c1_46 = arith.constant 1 : index
    %c1_47 = arith.constant 1 : index
    %c0_48 = arith.constant 0 : index
    %c0_49 = arith.constant 0 : index
    %60 = vector.load %arg3[%c1_46, %c1_47, %c0_48, %c0_49] : memref<3x2x32x128xbf16, #tpu.memory_space<vmem>>, vector<1x1x32x128xbf16>
    %61 = vector.shape_cast %60 : vector<1x1x32x128xbf16> to vector<32x128xbf16>
    %cst_50 = arith.constant dense<0.000000e+00> : vector<16x128xf32>
    %62 = tpu.matmul %59, %61, %cst_50 {dimension_numbers = #tpu.dot_dimension_numbers<[1], [0], [0], [1], [0, 0, 1, 1], [], []>} : vector<16x32xbf16>, vector<32x128xbf16>, vector<16x128xf32> -> vector<16x128xf32>
    %63 = arith.addf %55, %62 : vector<16x128xf32>
    %c2_51 = arith.constant 2 : index
    %c0_52 = arith.constant 0 : index
    %c0_53 = arith.constant 0 : index
    %64 = vector.load %arg2[%c2_51, %c0_52, %c0_53] : memref<3x16x32xf32, #tpu.memory_space<vmem>>, vector<1x16x32xf32>
    %65 = vector.shape_cast %64 : vector<1x16x32xf32> to vector<16x32xf32>
    %cst_54 = arith.constant dense<0.000000e+00> : vector<16x32xf32>
    %66 = tpu.matmul %65, %47, %cst_54 {dimension_numbers = #tpu.dot_dimension_numbers<[1], [0], [0], [1], [0, 0, 1, 1], [], []>} : vector<16x32xf32>, vector<32x32xf32>, vector<16x32xf32> -> vector<16x32xf32>
    %67 = arith.truncf %66 : vector<16x32xf32> to vector<16x32xbf16>
    %c2_55 = arith.constant 2 : index
    %c1_56 = arith.constant 1 : index
    %c0_57 = arith.constant 0 : index
    %c0_58 = arith.constant 0 : index
    %68 = vector.load %arg3[%c2_55, %c1_56, %c0_57, %c0_58] : memref<3x2x32x128xbf16, #tpu.memory_space<vmem>>, vector<1x1x32x128xbf16>
    %69 = vector.shape_cast %68 : vector<1x1x32x128xbf16> to vector<32x128xbf16>
    %cst_59 = arith.constant dense<0.000000e+00> : vector<16x128xf32>
    %70 = tpu.matmul %67, %69, %cst_59 {dimension_numbers = #tpu.dot_dimension_numbers<[1], [0], [0], [1], [0, 0, 1, 1], [], []>} : vector<16x32xbf16>, vector<32x128xbf16>, vector<16x128xf32> -> vector<16x128xf32>
    %71 = arith.addf %63, %70 : vector<16x128xf32>
    %c0_60 = arith.constant 0 : index
    %c0_61 = arith.constant 0 : index
    %72 = vector.load %arg4[%c0_60, %c0_61] : memref<1x128xf32, #tpu.memory_space<vmem>>, vector<1x128xf32>
    %73 = vector.broadcast %72 : vector<1x128xf32> to vector<16x128xf32>
    %74 = arith.addf %71, %73 : vector<16x128xf32>
    %c0_62 = arith.constant 0 : index
    %c0_63 = arith.constant 0 : index
    %75 = vector.load %arg5[%c0_62, %c0_63] : memref<128x128xf32, #tpu.memory_space<vmem>>, vector<128x128xf32>
    %cst_64 = arith.constant dense<0.000000e+00> : vector<16x128xf32>
    %76 = tpu.matmul %74, %75, %cst_64 {dimension_numbers = #tpu.dot_dimension_numbers<[1], [0], [0], [1], [0, 0, 1, 1], [], []>} : vector<16x128xf32>, vector<128x128xf32>, vector<16x128xf32> -> vector<16x128xf32>
    %77 = arith.subf %74, %76 : vector<16x128xf32>
    %78 = arith.mulf %77, %77 : vector<16x128xf32>
    %cst_65 = arith.constant dense<0.000000e+00> : vector<16x128xf32>
    %79 = tpu.matmul %78, %75, %cst_65 {dimension_numbers = #tpu.dot_dimension_numbers<[1], [0], [0], [1], [0, 0, 1, 1], [], []>} : vector<16x128xf32>, vector<128x128xf32>, vector<16x128xf32> -> vector<16x128xf32>
    %cst_66 = arith.constant 9.99999974E-6 : f32
    %80 = vector.broadcast %cst_66 : f32 to vector<16x128xf32>
    %81 = arith.addf %79, %80 : vector<16x128xf32>
    %82 = math.rsqrt %81 : vector<16x128xf32>
    %83 = arith.mulf %77, %82 : vector<16x128xf32>
    %c0_67 = arith.constant 0 : index
    %c0_68 = arith.constant 0 : index
    %84 = vector.load %arg6[%c0_67, %c0_68] : memref<1x128xf32, #tpu.memory_space<vmem>>, vector<1x128xf32>
    %85 = vector.broadcast %84 : vector<1x128xf32> to vector<16x128xf32>
    %86 = arith.mulf %83, %85 : vector<16x128xf32>
    %c0_69 = arith.constant 0 : index
    %c0_70 = arith.constant 0 : index
    %87 = vector.load %arg7[%c0_69, %c0_70] : memref<1x128xf32, #tpu.memory_space<vmem>>, vector<1x128xf32>
    %88 = vector.broadcast %87 : vector<1x128xf32> to vector<16x128xf32>
    %89 = arith.addf %86, %88 : vector<16x128xf32>
    %cst_71 = arith.constant 5.000000e-01 : f32
    %90 = vector.broadcast %cst_71 : f32 to vector<16x128xf32>
    %91 = arith.mulf %90, %89 : vector<16x128xf32>
    %cst_72 = arith.constant 0.707106769 : f32
    %92 = vector.broadcast %cst_72 : f32 to vector<16x128xf32>
    %93 = arith.mulf %89, %92 : vector<16x128xf32>
    %cst_73 = arith.constant 0.000000e+00 : f32
    %94 = vector.broadcast %cst_73 : f32 to vector<16x128xf32>
    %95 = arith.cmpf oge, %93, %94 : vector<16x128xf32>
    %cst_74 = arith.constant 1.000000e+00 : f32
    %cst_75 = arith.constant -1.000000e+00 : f32
    %96 = vector.broadcast %cst_74 : f32 to vector<16x128xf32>
    %97 = vector.broadcast %cst_75 : f32 to vector<16x128xf32>
    %98 = arith.select %95, %96, %97 : vector<16x128xi1>, vector<16x128xf32>
    %99 = math.absf %93 : vector<16x128xf32>
    %cst_76 = arith.constant 0.327591091 : f32
    %100 = vector.broadcast %cst_76 : f32 to vector<16x128xf32>
    %101 = arith.mulf %100, %99 : vector<16x128xf32>
    %cst_77 = arith.constant 1.000000e+00 : f32
    %102 = vector.broadcast %cst_77 : f32 to vector<16x128xf32>
    %103 = arith.addf %102, %101 : vector<16x128xf32>
    %cst_78 = arith.constant 1.000000e+00 : f32
    %104 = vector.broadcast %cst_78 : f32 to vector<16x128xf32>
    %105 = arith.divf %104, %103 : vector<16x128xf32>
    %cst_79 = arith.constant 1.06140542 : f32
    %106 = vector.broadcast %cst_79 : f32 to vector<16x128xf32>
    %107 = arith.mulf %106, %105 : vector<16x128xf32>
    %cst_80 = arith.constant -1.45315206 : f32
    %108 = vector.broadcast %cst_80 : f32 to vector<16x128xf32>
    %109 = arith.addf %107, %108 : vector<16x128xf32>
    %110 = arith.mulf %109, %105 : vector<16x128xf32>
    %cst_81 = arith.constant 1.42141378 : f32
    %111 = vector.broadcast %cst_81 : f32 to vector<16x128xf32>
    %112 = arith.addf %110, %111 : vector<16x128xf32>
    %113 = arith.mulf %112, %105 : vector<16x128xf32>
    %cst_82 = arith.constant -0.284496725 : f32
    %114 = vector.broadcast %cst_82 : f32 to vector<16x128xf32>
    %115 = arith.addf %113, %114 : vector<16x128xf32>
    %116 = arith.mulf %115, %105 : vector<16x128xf32>
    %cst_83 = arith.constant 0.254829586 : f32
    %117 = vector.broadcast %cst_83 : f32 to vector<16x128xf32>
    %118 = arith.addf %116, %117 : vector<16x128xf32>
    %119 = arith.mulf %118, %105 : vector<16x128xf32>
    %cst_84 = arith.constant 0.000000e+00 : f32
    %120 = vector.broadcast %cst_84 : f32 to vector<16x128xf32>
    %121 = arith.subf %120, %99 : vector<16x128xf32>
    %122 = arith.mulf %121, %99 : vector<16x128xf32>
    %123 = math.exp %122 : vector<16x128xf32>
    %124 = arith.mulf %119, %123 : vector<16x128xf32>
    %cst_85 = arith.constant 1.000000e+00 : f32
    %125 = vector.broadcast %cst_85 : f32 to vector<16x128xf32>
    %126 = arith.subf %125, %124 : vector<16x128xf32>
    %127 = arith.mulf %98, %126 : vector<16x128xf32>
    %cst_86 = arith.constant 1.000000e+00 : f32
    %128 = vector.broadcast %cst_86 : f32 to vector<16x128xf32>
    %129 = arith.addf %128, %127 : vector<16x128xf32>
    %130 = arith.mulf %91, %129 : vector<16x128xf32>
    %cst_87 = arith.constant 0.000000e+00 : f32
    %131 = vector.broadcast %cst_87 : f32 to vector<8x128xf32>
    %c0_88 = arith.constant 0 : index
    %c0_89 = arith.constant 0 : index
    %c0_90 = arith.constant 0 : index
    %132 = vector.load %arg8[%c0_88, %c0_89, %c0_90] : memref<3x8x16xf32, #tpu.memory_space<vmem>>, vector<1x8x16xf32>
    %133 = vector.shape_cast %132 : vector<1x8x16xf32> to vector<8x16xf32>
    %cst_91 = arith.constant dense<0.000000e+00> : vector<8x128xf32>
    %134 = tpu.matmul %133, %130, %cst_91 {dimension_numbers = #tpu.dot_dimension_numbers<[1], [0], [0], [1], [0, 0, 1, 1], [], []>} : vector<8x16xf32>, vector<16x128xf32>, vector<8x128xf32> -> vector<8x128xf32>
    %135 = arith.truncf %134 : vector<8x128xf32> to vector<8x128xbf16>
    %c0_92 = arith.constant 0 : index
    %c0_93 = arith.constant 0 : index
    %c0_94 = arith.constant 0 : index
    %136 = vector.load %arg9[%c0_92, %c0_93, %c0_94] : memref<3x128x128xbf16, #tpu.memory_space<vmem>>, vector<1x128x128xbf16>
    %137 = vector.shape_cast %136 : vector<1x128x128xbf16> to vector<128x128xbf16>
    %cst_95 = arith.constant dense<0.000000e+00> : vector<8x128xf32>
    %138 = tpu.matmul %135, %137, %cst_95 {dimension_numbers = #tpu.dot_dimension_numbers<[1], [0], [0], [1], [0, 0, 1, 1], [], []>} : vector<8x128xbf16>, vector<128x128xbf16>, vector<8x128xf32> -> vector<8x128xf32>
    %139 = arith.addf %131, %138 : vector<8x128xf32>
    %c1_96 = arith.constant 1 : index
    %c0_97 = arith.constant 0 : index
    %c0_98 = arith.constant 0 : index
    %140 = vector.load %arg8[%c1_96, %c0_97, %c0_98] : memref<3x8x16xf32, #tpu.memory_space<vmem>>, vector<1x8x16xf32>
    %141 = vector.shape_cast %140 : vector<1x8x16xf32> to vector<8x16xf32>
    %cst_99 = arith.constant dense<0.000000e+00> : vector<8x128xf32>
    %142 = tpu.matmul %141, %130, %cst_99 {dimension_numbers = #tpu.dot_dimension_numbers<[1], [0], [0], [1], [0, 0, 1, 1], [], []>} : vector<8x16xf32>, vector<16x128xf32>, vector<8x128xf32> -> vector<8x128xf32>
    %143 = arith.truncf %142 : vector<8x128xf32> to vector<8x128xbf16>
    %c1_100 = arith.constant 1 : index
    %c0_101 = arith.constant 0 : index
    %c0_102 = arith.constant 0 : index
    %144 = vector.load %arg9[%c1_100, %c0_101, %c0_102] : memref<3x128x128xbf16, #tpu.memory_space<vmem>>, vector<1x128x128xbf16>
    %145 = vector.shape_cast %144 : vector<1x128x128xbf16> to vector<128x128xbf16>
    %cst_103 = arith.constant dense<0.000000e+00> : vector<8x128xf32>
    %146 = tpu.matmul %143, %145, %cst_103 {dimension_numbers = #tpu.dot_dimension_numbers<[1], [0], [0], [1], [0, 0, 1, 1], [], []>} : vector<8x128xbf16>, vector<128x128xbf16>, vector<8x128xf32> -> vector<8x128xf32>
    %147 = arith.addf %139, %146 : vector<8x128xf32>
    %c2_104 = arith.constant 2 : index
    %c0_105 = arith.constant 0 : index
    %c0_106 = arith.constant 0 : index
    %148 = vector.load %arg8[%c2_104, %c0_105, %c0_106] : memref<3x8x16xf32, #tpu.memory_space<vmem>>, vector<1x8x16xf32>
    %149 = vector.shape_cast %148 : vector<1x8x16xf32> to vector<8x16xf32>
    %cst_107 = arith.constant dense<0.000000e+00> : vector<8x128xf32>
    %150 = tpu.matmul %149, %130, %cst_107 {dimension_numbers = #tpu.dot_dimension_numbers<[1], [0], [0], [1], [0, 0, 1, 1], [], []>} : vector<8x16xf32>, vector<16x128xf32>, vector<8x128xf32> -> vector<8x128xf32>
    %151 = arith.truncf %150 : vector<8x128xf32> to vector<8x128xbf16>
    %c2_108 = arith.constant 2 : index
    %c0_109 = arith.constant 0 : index
    %c0_110 = arith.constant 0 : index
    %152 = vector.load %arg9[%c2_108, %c0_109, %c0_110] : memref<3x128x128xbf16, #tpu.memory_space<vmem>>, vector<1x128x128xbf16>
    %153 = vector.shape_cast %152 : vector<1x128x128xbf16> to vector<128x128xbf16>
    %cst_111 = arith.constant dense<0.000000e+00> : vector<8x128xf32>
    %154 = tpu.matmul %151, %153, %cst_111 {dimension_numbers = #tpu.dot_dimension_numbers<[1], [0], [0], [1], [0, 0, 1, 1], [], []>} : vector<8x128xbf16>, vector<128x128xbf16>, vector<8x128xf32> -> vector<8x128xf32>
    %155 = arith.addf %147, %154 : vector<8x128xf32>
    %c0_112 = arith.constant 0 : index
    %c0_113 = arith.constant 0 : index
    %156 = vector.load %arg10[%c0_112, %c0_113] : memref<1x128xf32, #tpu.memory_space<vmem>>, vector<1x128xf32>
    %157 = vector.broadcast %156 : vector<1x128xf32> to vector<8x128xf32>
    %158 = arith.addf %155, %157 : vector<8x128xf32>
    %c0_114 = arith.constant 0 : index
    %c0_115 = arith.constant 0 : index
    %159 = vector.load %arg11[%c0_114, %c0_115] : memref<128x128xf32, #tpu.memory_space<vmem>>, vector<128x128xf32>
    %cst_116 = arith.constant dense<0.000000e+00> : vector<8x128xf32>
    %160 = tpu.matmul %158, %159, %cst_116 {dimension_numbers = #tpu.dot_dimension_numbers<[1], [0], [0], [1], [0, 0, 1, 1], [], []>} : vector<8x128xf32>, vector<128x128xf32>, vector<8x128xf32> -> vector<8x128xf32>
    %161 = arith.subf %158, %160 : vector<8x128xf32>
    %162 = arith.mulf %161, %161 : vector<8x128xf32>
    %cst_117 = arith.constant dense<0.000000e+00> : vector<8x128xf32>
    %163 = tpu.matmul %162, %159, %cst_117 {dimension_numbers = #tpu.dot_dimension_numbers<[1], [0], [0], [1], [0, 0, 1, 1], [], []>} : vector<8x128xf32>, vector<128x128xf32>, vector<8x128xf32> -> vector<8x128xf32>
    %cst_118 = arith.constant 9.99999974E-6 : f32
    %164 = vector.broadcast %cst_118 : f32 to vector<8x128xf32>
    %165 = arith.addf %163, %164 : vector<8x128xf32>
    %166 = math.rsqrt %165 : vector<8x128xf32>
    %167 = arith.mulf %161, %166 : vector<8x128xf32>
    %c0_119 = arith.constant 0 : index
    %c0_120 = arith.constant 0 : index
    %168 = vector.load %arg12[%c0_119, %c0_120] : memref<1x128xf32, #tpu.memory_space<vmem>>, vector<1x128xf32>
    %169 = vector.broadcast %168 : vector<1x128xf32> to vector<8x128xf32>
    %170 = arith.mulf %167, %169 : vector<8x128xf32>
    %c0_121 = arith.constant 0 : index
    %c0_122 = arith.constant 0 : index
    %171 = vector.load %arg13[%c0_121, %c0_122] : memref<1x128xf32, #tpu.memory_space<vmem>>, vector<1x128xf32>
    %172 = vector.broadcast %171 : vector<1x128xf32> to vector<8x128xf32>
    %173 = arith.addf %170, %172 : vector<8x128xf32>
    %cst_123 = arith.constant 0.000000e+00 : f32
    %174 = vector.broadcast %cst_123 : f32 to vector<4x128xf32>
    %c0_124 = arith.constant 0 : index
    %c0_125 = arith.constant 0 : index
    %c0_126 = arith.constant 0 : index
    %175 = vector.load %arg14[%c0_124, %c0_125, %c0_126] : memref<3x4x8xf32, #tpu.memory_space<vmem>>, vector<1x4x8xf32>
    %176 = vector.shape_cast %175 : vector<1x4x8xf32> to vector<4x8xf32>
    %cst_127 = arith.constant dense<0.000000e+00> : vector<4x128xf32>
    %177 = tpu.matmul %176, %173, %cst_127 {dimension_numbers = #tpu.dot_dimension_numbers<[1], [0], [0], [1], [0, 0, 1, 1], [], []>} : vector<4x8xf32>, vector<8x128xf32>, vector<4x128xf32> -> vector<4x128xf32>
    %178 = arith.truncf %177 : vector<4x128xf32> to vector<4x128xbf16>
    %c0_128 = arith.constant 0 : index
    %c0_129 = arith.constant 0 : index
    %c0_130 = arith.constant 0 : index
    %179 = vector.load %arg15[%c0_128, %c0_129, %c0_130] : memref<3x128x128xbf16, #tpu.memory_space<vmem>>, vector<1x128x128xbf16>
    %180 = vector.shape_cast %179 : vector<1x128x128xbf16> to vector<128x128xbf16>
    %cst_131 = arith.constant dense<0.000000e+00> : vector<4x128xf32>
    %181 = tpu.matmul %178, %180, %cst_131 {dimension_numbers = #tpu.dot_dimension_numbers<[1], [0], [0], [1], [0, 0, 1, 1], [], []>} : vector<4x128xbf16>, vector<128x128xbf16>, vector<4x128xf32> -> vector<4x128xf32>
    %182 = arith.addf %174, %181 : vector<4x128xf32>
    %c1_132 = arith.constant 1 : index
    %c0_133 = arith.constant 0 : index
    %c0_134 = arith.constant 0 : index
    %183 = vector.load %arg14[%c1_132, %c0_133, %c0_134] : memref<3x4x8xf32, #tpu.memory_space<vmem>>, vector<1x4x8xf32>
    %184 = vector.shape_cast %183 : vector<1x4x8xf32> to vector<4x8xf32>
    %cst_135 = arith.constant dense<0.000000e+00> : vector<4x128xf32>
    %185 = tpu.matmul %184, %173, %cst_135 {dimension_numbers = #tpu.dot_dimension_numbers<[1], [0], [0], [1], [0, 0, 1, 1], [], []>} : vector<4x8xf32>, vector<8x128xf32>, vector<4x128xf32> -> vector<4x128xf32>
    %186 = arith.truncf %185 : vector<4x128xf32> to vector<4x128xbf16>
    %c1_136 = arith.constant 1 : index
    %c0_137 = arith.constant 0 : index
    %c0_138 = arith.constant 0 : index
    %187 = vector.load %arg15[%c1_136, %c0_137, %c0_138] : memref<3x128x128xbf16, #tpu.memory_space<vmem>>, vector<1x128x128xbf16>
    %188 = vector.shape_cast %187 : vector<1x128x128xbf16> to vector<128x128xbf16>
    %cst_139 = arith.constant dense<0.000000e+00> : vector<4x128xf32>
    %189 = tpu.matmul %186, %188, %cst_139 {dimension_numbers = #tpu.dot_dimension_numbers<[1], [0], [0], [1], [0, 0, 1, 1], [], []>} : vector<4x128xbf16>, vector<128x128xbf16>, vector<4x128xf32> -> vector<4x128xf32>
    %190 = arith.addf %182, %189 : vector<4x128xf32>
    %c2_140 = arith.constant 2 : index
    %c0_141 = arith.constant 0 : index
    %c0_142 = arith.constant 0 : index
    %191 = vector.load %arg14[%c2_140, %c0_141, %c0_142] : memref<3x4x8xf32, #tpu.memory_space<vmem>>, vector<1x4x8xf32>
    %192 = vector.shape_cast %191 : vector<1x4x8xf32> to vector<4x8xf32>
    %cst_143 = arith.constant dense<0.000000e+00> : vector<4x128xf32>
    %193 = tpu.matmul %192, %173, %cst_143 {dimension_numbers = #tpu.dot_dimension_numbers<[1], [0], [0], [1], [0, 0, 1, 1], [], []>} : vector<4x8xf32>, vector<8x128xf32>, vector<4x128xf32> -> vector<4x128xf32>
    %194 = arith.truncf %193 : vector<4x128xf32> to vector<4x128xbf16>
    %c2_144 = arith.constant 2 : index
    %c0_145 = arith.constant 0 : index
    %c0_146 = arith.constant 0 : index
    %195 = vector.load %arg15[%c2_144, %c0_145, %c0_146] : memref<3x128x128xbf16, #tpu.memory_space<vmem>>, vector<1x128x128xbf16>
    %196 = vector.shape_cast %195 : vector<1x128x128xbf16> to vector<128x128xbf16>
    %cst_147 = arith.constant dense<0.000000e+00> : vector<4x128xf32>
    %197 = tpu.matmul %194, %196, %cst_147 {dimension_numbers = #tpu.dot_dimension_numbers<[1], [0], [0], [1], [0, 0, 1, 1], [], []>} : vector<4x128xbf16>, vector<128x128xbf16>, vector<4x128xf32> -> vector<4x128xf32>
    %198 = arith.addf %190, %197 : vector<4x128xf32>
    %c0_148 = arith.constant 0 : index
    %c0_149 = arith.constant 0 : index
    %199 = vector.load %arg16[%c0_148, %c0_149] : memref<1x128xf32, #tpu.memory_space<vmem>>, vector<1x128xf32>
    %200 = vector.broadcast %199 : vector<1x128xf32> to vector<4x128xf32>
    %201 = arith.addf %198, %200 : vector<4x128xf32>
    %cst_150 = arith.constant 0.000000e+00 : f32
    %202 = vector.broadcast %cst_150 : f32 to vector<2x128xf32>
    %c0_151 = arith.constant 0 : index
    %c0_152 = arith.constant 0 : index
    %c0_153 = arith.constant 0 : index
    %203 = vector.load %arg17[%c0_151, %c0_152, %c0_153] : memref<3x2x4xf32, #tpu.memory_space<vmem>>, vector<1x2x4xf32>
    %204 = vector.shape_cast %203 : vector<1x2x4xf32> to vector<2x4xf32>
    %cst_154 = arith.constant dense<0.000000e+00> : vector<2x128xf32>
    %205 = tpu.matmul %204, %201, %cst_154 {dimension_numbers = #tpu.dot_dimension_numbers<[1], [0], [0], [1], [0, 0, 1, 1], [], []>} : vector<2x4xf32>, vector<4x128xf32>, vector<2x128xf32> -> vector<2x128xf32>
    %206 = arith.truncf %205 : vector<2x128xf32> to vector<2x128xbf16>
    %c0_155 = arith.constant 0 : index
    %c0_156 = arith.constant 0 : index
    %c0_157 = arith.constant 0 : index
    %207 = vector.load %arg18[%c0_155, %c0_156, %c0_157] : memref<3x128x128xbf16, #tpu.memory_space<vmem>>, vector<1x128x128xbf16>
    %208 = vector.shape_cast %207 : vector<1x128x128xbf16> to vector<128x128xbf16>
    %cst_158 = arith.constant dense<0.000000e+00> : vector<2x128xf32>
    %209 = tpu.matmul %206, %208, %cst_158 {dimension_numbers = #tpu.dot_dimension_numbers<[1], [0], [0], [1], [0, 0, 1, 1], [], []>} : vector<2x128xbf16>, vector<128x128xbf16>, vector<2x128xf32> -> vector<2x128xf32>
    %210 = arith.addf %202, %209 : vector<2x128xf32>
    %c1_159 = arith.constant 1 : index
    %c0_160 = arith.constant 0 : index
    %c0_161 = arith.constant 0 : index
    %211 = vector.load %arg17[%c1_159, %c0_160, %c0_161] : memref<3x2x4xf32, #tpu.memory_space<vmem>>, vector<1x2x4xf32>
    %212 = vector.shape_cast %211 : vector<1x2x4xf32> to vector<2x4xf32>
    %cst_162 = arith.constant dense<0.000000e+00> : vector<2x128xf32>
    %213 = tpu.matmul %212, %201, %cst_162 {dimension_numbers = #tpu.dot_dimension_numbers<[1], [0], [0], [1], [0, 0, 1, 1], [], []>} : vector<2x4xf32>, vector<4x128xf32>, vector<2x128xf32> -> vector<2x128xf32>
    %214 = arith.truncf %213 : vector<2x128xf32> to vector<2x128xbf16>
    %c1_163 = arith.constant 1 : index
    %c0_164 = arith.constant 0 : index
    %c0_165 = arith.constant 0 : index
    %215 = vector.load %arg18[%c1_163, %c0_164, %c0_165] : memref<3x128x128xbf16, #tpu.memory_space<vmem>>, vector<1x128x128xbf16>
    %216 = vector.shape_cast %215 : vector<1x128x128xbf16> to vector<128x128xbf16>
    %cst_166 = arith.constant dense<0.000000e+00> : vector<2x128xf32>
    %217 = tpu.matmul %214, %216, %cst_166 {dimension_numbers = #tpu.dot_dimension_numbers<[1], [0], [0], [1], [0, 0, 1, 1], [], []>} : vector<2x128xbf16>, vector<128x128xbf16>, vector<2x128xf32> -> vector<2x128xf32>
    %218 = arith.addf %210, %217 : vector<2x128xf32>
    %c2_167 = arith.constant 2 : index
    %c0_168 = arith.constant 0 : index
    %c0_169 = arith.constant 0 : index
    %219 = vector.load %arg17[%c2_167, %c0_168, %c0_169] : memref<3x2x4xf32, #tpu.memory_space<vmem>>, vector<1x2x4xf32>
    %220 = vector.shape_cast %219 : vector<1x2x4xf32> to vector<2x4xf32>
    %cst_170 = arith.constant dense<0.000000e+00> : vector<2x128xf32>
    %221 = tpu.matmul %220, %201, %cst_170 {dimension_numbers = #tpu.dot_dimension_numbers<[1], [0], [0], [1], [0, 0, 1, 1], [], []>} : vector<2x4xf32>, vector<4x128xf32>, vector<2x128xf32> -> vector<2x128xf32>
    %222 = arith.truncf %221 : vector<2x128xf32> to vector<2x128xbf16>
    %c2_171 = arith.constant 2 : index
    %c0_172 = arith.constant 0 : index
    %c0_173 = arith.constant 0 : index
    %223 = vector.load %arg18[%c2_171, %c0_172, %c0_173] : memref<3x128x128xbf16, #tpu.memory_space<vmem>>, vector<1x128x128xbf16>
    %224 = vector.shape_cast %223 : vector<1x128x128xbf16> to vector<128x128xbf16>
    %cst_174 = arith.constant dense<0.000000e+00> : vector<2x128xf32>
    %225 = tpu.matmul %222, %224, %cst_174 {dimension_numbers = #tpu.dot_dimension_numbers<[1], [0], [0], [1], [0, 0, 1, 1], [], []>} : vector<2x128xbf16>, vector<128x128xbf16>, vector<2x128xf32> -> vector<2x128xf32>
    %226 = arith.addf %218, %225 : vector<2x128xf32>
    %c0_175 = arith.constant 0 : index
    %c0_176 = arith.constant 0 : index
    %227 = vector.load %arg19[%c0_175, %c0_176] : memref<1x128xf32, #tpu.memory_space<vmem>>, vector<1x128xf32>
    %228 = vector.broadcast %227 : vector<1x128xf32> to vector<2x128xf32>
    %229 = arith.addf %226, %228 : vector<2x128xf32>
    %cst_177 = arith.constant 0.000000e+00 : f32
    %230 = vector.broadcast %cst_177 : f32 to vector<4x128xf32>
    %231 = arith.truncf %229 : vector<2x128xf32> to vector<2x128xbf16>
    %c0_178 = arith.constant 0 : index
    %c0_179 = arith.constant 0 : index
    %c0_180 = arith.constant 0 : index
    %232 = vector.load %arg21[%c0_178, %c0_179, %c0_180] : memref<2x128x128xbf16, #tpu.memory_space<vmem>>, vector<1x128x128xbf16>
    %233 = vector.shape_cast %232 : vector<1x128x128xbf16> to vector<128x128xbf16>
    %cst_181 = arith.constant dense<0.000000e+00> : vector<2x128xf32>
    %234 = tpu.matmul %231, %233, %cst_181 {dimension_numbers = #tpu.dot_dimension_numbers<[1], [0], [0], [1], [0, 0, 1, 1], [], []>} : vector<2x128xbf16>, vector<128x128xbf16>, vector<2x128xf32> -> vector<2x128xf32>
    %c0_182 = arith.constant 0 : index
    %c0_183 = arith.constant 0 : index
    %c0_184 = arith.constant 0 : index
    %235 = vector.load %arg20[%c0_182, %c0_183, %c0_184] : memref<2x4x2xf32, #tpu.memory_space<vmem>>, vector<1x4x2xf32>
    %236 = vector.shape_cast %235 : vector<1x4x2xf32> to vector<4x2xf32>
    %cst_185 = arith.constant dense<0.000000e+00> : vector<4x128xf32>
    %237 = tpu.matmul %236, %234, %cst_185 {dimension_numbers = #tpu.dot_dimension_numbers<[1], [0], [0], [1], [0, 0, 1, 1], [], []>} : vector<4x2xf32>, vector<2x128xf32>, vector<4x128xf32> -> vector<4x128xf32>
    %238 = arith.addf %230, %237 : vector<4x128xf32>
    %c1_186 = arith.constant 1 : index
    %c0_187 = arith.constant 0 : index
    %c0_188 = arith.constant 0 : index
    %239 = vector.load %arg21[%c1_186, %c0_187, %c0_188] : memref<2x128x128xbf16, #tpu.memory_space<vmem>>, vector<1x128x128xbf16>
    %240 = vector.shape_cast %239 : vector<1x128x128xbf16> to vector<128x128xbf16>
    %cst_189 = arith.constant dense<0.000000e+00> : vector<2x128xf32>
    %241 = tpu.matmul %231, %240, %cst_189 {dimension_numbers = #tpu.dot_dimension_numbers<[1], [0], [0], [1], [0, 0, 1, 1], [], []>} : vector<2x128xbf16>, vector<128x128xbf16>, vector<2x128xf32> -> vector<2x128xf32>
    %c1_190 = arith.constant 1 : index
    %c0_191 = arith.constant 0 : index
    %c0_192 = arith.constant 0 : index
    %242 = vector.load %arg20[%c1_190, %c0_191, %c0_192] : memref<2x4x2xf32, #tpu.memory_space<vmem>>, vector<1x4x2xf32>
    %243 = vector.shape_cast %242 : vector<1x4x2xf32> to vector<4x2xf32>
    %cst_193 = arith.constant dense<0.000000e+00> : vector<4x128xf32>
    %244 = tpu.matmul %243, %241, %cst_193 {dimension_numbers = #tpu.dot_dimension_numbers<[1], [0], [0], [1], [0, 0, 1, 1], [], []>} : vector<4x2xf32>, vector<2x128xf32>, vector<4x128xf32> -> vector<4x128xf32>
    %245 = arith.addf %238, %244 : vector<4x128xf32>
    %c0_194 = arith.constant 0 : index
    %c0_195 = arith.constant 0 : index
    %246 = vector.load %arg22[%c0_194, %c0_195] : memref<1x128xf32, #tpu.memory_space<vmem>>, vector<1x128xf32>
    %247 = vector.broadcast %246 : vector<1x128xf32> to vector<4x128xf32>
    %248 = arith.addf %245, %247 : vector<4x128xf32>
    %cst_196 = arith.constant 0.000000e+00 : f32
    %249 = vector.broadcast %cst_196 : f32 to vector<4x128xf32>
    %c0_197 = arith.constant 0 : index
    %c0_198 = arith.constant 0 : index
    %c0_199 = arith.constant 0 : index
    %250 = vector.load %arg23[%c0_197, %c0_198, %c0_199] : memref<3x4x4xf32, #tpu.memory_space<vmem>>, vector<1x4x4xf32>
    %251 = vector.shape_cast %250 : vector<1x4x4xf32> to vector<4x4xf32>
    %cst_200 = arith.constant dense<0.000000e+00> : vector<4x128xf32>
    %252 = tpu.matmul %251, %248, %cst_200 {dimension_numbers = #tpu.dot_dimension_numbers<[1], [0], [0], [1], [0, 0, 1, 1], [], []>} : vector<4x4xf32>, vector<4x128xf32>, vector<4x128xf32> -> vector<4x128xf32>
    %cst_201 = arith.constant dense<0.000000e+00> : vector<4x128xf32>
    %253 = tpu.matmul %251, %201, %cst_201 {dimension_numbers = #tpu.dot_dimension_numbers<[1], [0], [0], [1], [0, 0, 1, 1], [], []>} : vector<4x4xf32>, vector<4x128xf32>, vector<4x128xf32> -> vector<4x128xf32>
    %254 = arith.truncf %252 : vector<4x128xf32> to vector<4x128xbf16>
    %c0_202 = arith.constant 0 : index
    %c0_203 = arith.constant 0 : index
    %c0_204 = arith.constant 0 : index
    %255 = vector.load %arg24[%c0_202, %c0_203, %c0_204] : memref<3x128x128xbf16, #tpu.memory_space<vmem>>, vector<1x128x128xbf16>
    %256 = vector.shape_cast %255 : vector<1x128x128xbf16> to vector<128x128xbf16>
    %cst_205 = arith.constant dense<0.000000e+00> : vector<4x128xf32>
    %257 = tpu.matmul %254, %256, %cst_205 {dimension_numbers = #tpu.dot_dimension_numbers<[1], [0], [0], [1], [0, 0, 1, 1], [], []>} : vector<4x128xbf16>, vector<128x128xbf16>, vector<4x128xf32> -> vector<4x128xf32>
    %258 = arith.addf %249, %257 : vector<4x128xf32>
    %259 = arith.truncf %253 : vector<4x128xf32> to vector<4x128xbf16>
    %c0_206 = arith.constant 0 : index
    %c0_207 = arith.constant 0 : index
    %c0_208 = arith.constant 0 : index
    %260 = vector.load %arg25[%c0_206, %c0_207, %c0_208] : memref<3x128x128xbf16, #tpu.memory_space<vmem>>, vector<1x128x128xbf16>
    %261 = vector.shape_cast %260 : vector<1x128x128xbf16> to vector<128x128xbf16>
    %cst_209 = arith.constant dense<0.000000e+00> : vector<4x128xf32>
    %262 = tpu.matmul %259, %261, %cst_209 {dimension_numbers = #tpu.dot_dimension_numbers<[1], [0], [0], [1], [0, 0, 1, 1], [], []>} : vector<4x128xbf16>, vector<128x128xbf16>, vector<4x128xf32> -> vector<4x128xf32>
    %263 = arith.addf %258, %262 : vector<4x128xf32>
    %c1_210 = arith.constant 1 : index
    %c0_211 = arith.constant 0 : index
    %c0_212 = arith.constant 0 : index
    %264 = vector.load %arg23[%c1_210, %c0_211, %c0_212] : memref<3x4x4xf32, #tpu.memory_space<vmem>>, vector<1x4x4xf32>
    %265 = vector.shape_cast %264 : vector<1x4x4xf32> to vector<4x4xf32>
    %cst_213 = arith.constant dense<0.000000e+00> : vector<4x128xf32>
    %266 = tpu.matmul %265, %248, %cst_213 {dimension_numbers = #tpu.dot_dimension_numbers<[1], [0], [0], [1], [0, 0, 1, 1], [], []>} : vector<4x4xf32>, vector<4x128xf32>, vector<4x128xf32> -> vector<4x128xf32>
    %cst_214 = arith.constant dense<0.000000e+00> : vector<4x128xf32>
    %267 = tpu.matmul %265, %201, %cst_214 {dimension_numbers = #tpu.dot_dimension_numbers<[1], [0], [0], [1], [0, 0, 1, 1], [], []>} : vector<4x4xf32>, vector<4x128xf32>, vector<4x128xf32> -> vector<4x128xf32>
    %268 = arith.truncf %266 : vector<4x128xf32> to vector<4x128xbf16>
    %c1_215 = arith.constant 1 : index
    %c0_216 = arith.constant 0 : index
    %c0_217 = arith.constant 0 : index
    %269 = vector.load %arg24[%c1_215, %c0_216, %c0_217] : memref<3x128x128xbf16, #tpu.memory_space<vmem>>, vector<1x128x128xbf16>
    %270 = vector.shape_cast %269 : vector<1x128x128xbf16> to vector<128x128xbf16>
    %cst_218 = arith.constant dense<0.000000e+00> : vector<4x128xf32>
    %271 = tpu.matmul %268, %270, %cst_218 {dimension_numbers = #tpu.dot_dimension_numbers<[1], [0], [0], [1], [0, 0, 1, 1], [], []>} : vector<4x128xbf16>, vector<128x128xbf16>, vector<4x128xf32> -> vector<4x128xf32>
    %272 = arith.addf %263, %271 : vector<4x128xf32>
    %273 = arith.truncf %267 : vector<4x128xf32> to vector<4x128xbf16>
    %c1_219 = arith.constant 1 : index
    %c0_220 = arith.constant 0 : index
    %c0_221 = arith.constant 0 : index
    %274 = vector.load %arg25[%c1_219, %c0_220, %c0_221] : memref<3x128x128xbf16, #tpu.memory_space<vmem>>, vector<1x128x128xbf16>
    %275 = vector.shape_cast %274 : vector<1x128x128xbf16> to vector<128x128xbf16>
    %cst_222 = arith.constant dense<0.000000e+00> : vector<4x128xf32>
    %276 = tpu.matmul %273, %275, %cst_222 {dimension_numbers = #tpu.dot_dimension_numbers<[1], [0], [0], [1], [0, 0, 1, 1], [], []>} : vector<4x128xbf16>, vector<128x128xbf16>, vector<4x128xf32> -> vector<4x128xf32>
    %277 = arith.addf %272, %276 : vector<4x128xf32>
    %c2_223 = arith.constant 2 : index
    %c0_224 = arith.constant 0 : index
    %c0_225 = arith.constant 0 : index
    %278 = vector.load %arg23[%c2_223, %c0_224, %c0_225] : memref<3x4x4xf32, #tpu.memory_space<vmem>>, vector<1x4x4xf32>
    %279 = vector.shape_cast %278 : vector<1x4x4xf32> to vector<4x4xf32>
    %cst_226 = arith.constant dense<0.000000e+00> : vector<4x128xf32>
    %280 = tpu.matmul %279, %248, %cst_226 {dimension_numbers = #tpu.dot_dimension_numbers<[1], [0], [0], [1], [0, 0, 1, 1], [], []>} : vector<4x4xf32>, vector<4x128xf32>, vector<4x128xf32> -> vector<4x128xf32>
    %cst_227 = arith.constant dense<0.000000e+00> : vector<4x128xf32>
    %281 = tpu.matmul %279, %201, %cst_227 {dimension_numbers = #tpu.dot_dimension_numbers<[1], [0], [0], [1], [0, 0, 1, 1], [], []>} : vector<4x4xf32>, vector<4x128xf32>, vector<4x128xf32> -> vector<4x128xf32>
    %282 = arith.truncf %280 : vector<4x128xf32> to vector<4x128xbf16>
    %c2_228 = arith.constant 2 : index
    %c0_229 = arith.constant 0 : index
    %c0_230 = arith.constant 0 : index
    %283 = vector.load %arg24[%c2_228, %c0_229, %c0_230] : memref<3x128x128xbf16, #tpu.memory_space<vmem>>, vector<1x128x128xbf16>
    %284 = vector.shape_cast %283 : vector<1x128x128xbf16> to vector<128x128xbf16>
    %cst_231 = arith.constant dense<0.000000e+00> : vector<4x128xf32>
    %285 = tpu.matmul %282, %284, %cst_231 {dimension_numbers = #tpu.dot_dimension_numbers<[1], [0], [0], [1], [0, 0, 1, 1], [], []>} : vector<4x128xbf16>, vector<128x128xbf16>, vector<4x128xf32> -> vector<4x128xf32>
    %286 = arith.addf %277, %285 : vector<4x128xf32>
    %287 = arith.truncf %281 : vector<4x128xf32> to vector<4x128xbf16>
    %c2_232 = arith.constant 2 : index
    %c0_233 = arith.constant 0 : index
    %c0_234 = arith.constant 0 : index
    %288 = vector.load %arg25[%c2_232, %c0_233, %c0_234] : memref<3x128x128xbf16, #tpu.memory_space<vmem>>, vector<1x128x128xbf16>
    %289 = vector.shape_cast %288 : vector<1x128x128xbf16> to vector<128x128xbf16>
    %cst_235 = arith.constant dense<0.000000e+00> : vector<4x128xf32>
    %290 = tpu.matmul %287, %289, %cst_235 {dimension_numbers = #tpu.dot_dimension_numbers<[1], [0], [0], [1], [0, 0, 1, 1], [], []>} : vector<4x128xbf16>, vector<128x128xbf16>, vector<4x128xf32> -> vector<4x128xf32>
    %291 = arith.addf %286, %290 : vector<4x128xf32>
    %c0_236 = arith.constant 0 : index
    %c0_237 = arith.constant 0 : index
    %292 = vector.load %arg26[%c0_236, %c0_237] : memref<1x128xf32, #tpu.memory_space<vmem>>, vector<1x128xf32>
    %293 = vector.broadcast %292 : vector<1x128xf32> to vector<4x128xf32>
    %294 = arith.addf %291, %293 : vector<4x128xf32>
    %c0_238 = arith.constant 0 : index
    %c0_239 = arith.constant 0 : index
    %295 = vector.load %arg27[%c0_238, %c0_239] : memref<128x128xf32, #tpu.memory_space<vmem>>, vector<128x128xf32>
    %cst_240 = arith.constant dense<0.000000e+00> : vector<128xf32>
    %296 = vector.multi_reduction <add>, %294, %cst_240 [0] : vector<4x128xf32> to vector<128xf32>
    %297 = vector.shape_cast %296 : vector<128xf32> to vector<1x128xf32>
    %cst_241 = arith.constant 4.000000e+00 : f32
    %298 = vector.broadcast %cst_241 : f32 to vector<1x128xf32>
    %299 = arith.divf %297, %298 : vector<1x128xf32>
    %cst_242 = arith.constant dense<0.000000e+00> : vector<1x128xf32>
    %300 = tpu.matmul %299, %295, %cst_242 {dimension_numbers = #tpu.dot_dimension_numbers<[1], [0], [0], [1], [0, 0, 1, 1], [], []>} : vector<1x128xf32>, vector<128x128xf32>, vector<1x128xf32> -> vector<1x128xf32>
    %301 = vector.broadcast %300 : vector<1x128xf32> to vector<4x128xf32>
    %302 = arith.subf %294, %301 : vector<4x128xf32>
    %303 = arith.mulf %302, %302 : vector<4x128xf32>
    %cst_243 = arith.constant dense<0.000000e+00> : vector<128xf32>
    %304 = vector.multi_reduction <add>, %303, %cst_243 [0] : vector<4x128xf32> to vector<128xf32>
    %305 = vector.shape_cast %304 : vector<128xf32> to vector<1x128xf32>
    %cst_244 = arith.constant 4.000000e+00 : f32
    %306 = vector.broadcast %cst_244 : f32 to vector<1x128xf32>
    %307 = arith.divf %305, %306 : vector<1x128xf32>
    %cst_245 = arith.constant dense<0.000000e+00> : vector<1x128xf32>
    %308 = tpu.matmul %307, %295, %cst_245 {dimension_numbers = #tpu.dot_dimension_numbers<[1], [0], [0], [1], [0, 0, 1, 1], [], []>} : vector<1x128xf32>, vector<128x128xf32>, vector<1x128xf32> -> vector<1x128xf32>
    %cst_246 = arith.constant 9.99999974E-6 : f32
    %309 = vector.broadcast %cst_246 : f32 to vector<1x128xf32>
    %310 = arith.addf %308, %309 : vector<1x128xf32>
    %311 = math.rsqrt %310 : vector<1x128xf32>
    %312 = vector.broadcast %311 : vector<1x128xf32> to vector<4x128xf32>
    %313 = arith.mulf %302, %312 : vector<4x128xf32>
    %c0_247 = arith.constant 0 : index
    %c0_248 = arith.constant 0 : index
    %314 = vector.load %arg28[%c0_247, %c0_248] : memref<1x128xf32, #tpu.memory_space<vmem>>, vector<1x128xf32>
    %315 = vector.broadcast %314 : vector<1x128xf32> to vector<4x128xf32>
    %316 = arith.mulf %313, %315 : vector<4x128xf32>
    %c0_249 = arith.constant 0 : index
    %c0_250 = arith.constant 0 : index
    %317 = vector.load %arg29[%c0_249, %c0_250] : memref<1x128xf32, #tpu.memory_space<vmem>>, vector<1x128xf32>
    %318 = vector.broadcast %317 : vector<1x128xf32> to vector<4x128xf32>
    %319 = arith.addf %316, %318 : vector<4x128xf32>
    %cst_251 = arith.constant 0.000000e+00 : f32
    %320 = vector.broadcast %cst_251 : f32 to vector<4x128xf32>
    %321 = arith.cmpf oge, %319, %320 : vector<4x128xf32>
    %cst_252 = arith.constant 0.00999999977 : f32
    %322 = vector.broadcast %cst_252 : f32 to vector<4x128xf32>
    %323 = arith.mulf %322, %319 : vector<4x128xf32>
    %324 = arith.select %321, %319, %323 : vector<4x128xi1>, vector<4x128xf32>
    %cst_253 = arith.constant 0.000000e+00 : f32
    %325 = vector.broadcast %cst_253 : f32 to vector<8x128xf32>
    %326 = arith.truncf %324 : vector<4x128xf32> to vector<4x128xbf16>
    %c0_254 = arith.constant 0 : index
    %c0_255 = arith.constant 0 : index
    %c0_256 = arith.constant 0 : index
    %327 = vector.load %arg31[%c0_254, %c0_255, %c0_256] : memref<2x128x128xbf16, #tpu.memory_space<vmem>>, vector<1x128x128xbf16>
    %328 = vector.shape_cast %327 : vector<1x128x128xbf16> to vector<128x128xbf16>
    %cst_257 = arith.constant dense<0.000000e+00> : vector<4x128xf32>
    %329 = tpu.matmul %326, %328, %cst_257 {dimension_numbers = #tpu.dot_dimension_numbers<[1], [0], [0], [1], [0, 0, 1, 1], [], []>} : vector<4x128xbf16>, vector<128x128xbf16>, vector<4x128xf32> -> vector<4x128xf32>
    %c0_258 = arith.constant 0 : index
    %c0_259 = arith.constant 0 : index
    %c0_260 = arith.constant 0 : index
    %330 = vector.load %arg30[%c0_258, %c0_259, %c0_260] : memref<2x8x4xf32, #tpu.memory_space<vmem>>, vector<1x8x4xf32>
    %331 = vector.shape_cast %330 : vector<1x8x4xf32> to vector<8x4xf32>
    %cst_261 = arith.constant dense<0.000000e+00> : vector<8x128xf32>
    %332 = tpu.matmul %331, %329, %cst_261 {dimension_numbers = #tpu.dot_dimension_numbers<[1], [0], [0], [1], [0, 0, 1, 1], [], []>} : vector<8x4xf32>, vector<4x128xf32>, vector<8x128xf32> -> vector<8x128xf32>
    %333 = arith.addf %325, %332 : vector<8x128xf32>
    %c1_262 = arith.constant 1 : index
    %c0_263 = arith.constant 0 : index
    %c0_264 = arith.constant 0 : index
    %334 = vector.load %arg31[%c1_262, %c0_263, %c0_264] : memref<2x128x128xbf16, #tpu.memory_space<vmem>>, vector<1x128x128xbf16>
    %335 = vector.shape_cast %334 : vector<1x128x128xbf16> to vector<128x128xbf16>
    %cst_265 = arith.constant dense<0.000000e+00> : vector<4x128xf32>
    %336 = tpu.matmul %326, %335, %cst_265 {dimension_numbers = #tpu.dot_dimension_numbers<[1], [0], [0], [1], [0, 0, 1, 1], [], []>} : vector<4x128xbf16>, vector<128x128xbf16>, vector<4x128xf32> -> vector<4x128xf32>
    %c1_266 = arith.constant 1 : index
    %c0_267 = arith.constant 0 : index
    %c0_268 = arith.constant 0 : index
    %337 = vector.load %arg30[%c1_266, %c0_267, %c0_268] : memref<2x8x4xf32, #tpu.memory_space<vmem>>, vector<1x8x4xf32>
    %338 = vector.shape_cast %337 : vector<1x8x4xf32> to vector<8x4xf32>
    %cst_269 = arith.constant dense<0.000000e+00> : vector<8x128xf32>
    %339 = tpu.matmul %338, %336, %cst_269 {dimension_numbers = #tpu.dot_dimension_numbers<[1], [0], [0], [1], [0, 0, 1, 1], [], []>} : vector<8x4xf32>, vector<4x128xf32>, vector<8x128xf32> -> vector<8x128xf32>
    %340 = arith.addf %333, %339 : vector<8x128xf32>
    %c0_270 = arith.constant 0 : index
    %c0_271 = arith.constant 0 : index
    %341 = vector.load %arg32[%c0_270, %c0_271] : memref<1x128xf32, #tpu.memory_space<vmem>>, vector<1x128xf32>
    %342 = vector.broadcast %341 : vector<1x128xf32> to vector<8x128xf32>
    %343 = arith.addf %340, %342 : vector<8x128xf32>
    %cst_272 = arith.constant 0.000000e+00 : f32
    %344 = vector.broadcast %cst_272 : f32 to vector<8x128xf32>
    %c0_273 = arith.constant 0 : index
    %c0_274 = arith.constant 0 : index
    %c0_275 = arith.constant 0 : index
    %345 = vector.load %arg33[%c0_273, %c0_274, %c0_275] : memref<3x8x8xf32, #tpu.memory_space<vmem>>, vector<1x8x8xf32>
    %346 = vector.shape_cast %345 : vector<1x8x8xf32> to vector<8x8xf32>
    %cst_276 = arith.constant dense<0.000000e+00> : vector<8x128xf32>
    %347 = tpu.matmul %346, %343, %cst_276 {dimension_numbers = #tpu.dot_dimension_numbers<[1], [0], [0], [1], [0, 0, 1, 1], [], []>} : vector<8x8xf32>, vector<8x128xf32>, vector<8x128xf32> -> vector<8x128xf32>
    %cst_277 = arith.constant dense<0.000000e+00> : vector<8x128xf32>
    %348 = tpu.matmul %346, %173, %cst_277 {dimension_numbers = #tpu.dot_dimension_numbers<[1], [0], [0], [1], [0, 0, 1, 1], [], []>} : vector<8x8xf32>, vector<8x128xf32>, vector<8x128xf32> -> vector<8x128xf32>
    %349 = arith.truncf %347 : vector<8x128xf32> to vector<8x128xbf16>
    %c0_278 = arith.constant 0 : index
    %c0_279 = arith.constant 0 : index
    %c0_280 = arith.constant 0 : index
    %350 = vector.load %arg34[%c0_278, %c0_279, %c0_280] : memref<3x128x128xbf16, #tpu.memory_space<vmem>>, vector<1x128x128xbf16>
    %351 = vector.shape_cast %350 : vector<1x128x128xbf16> to vector<128x128xbf16>
    %cst_281 = arith.constant dense<0.000000e+00> : vector<8x128xf32>
    %352 = tpu.matmul %349, %351, %cst_281 {dimension_numbers = #tpu.dot_dimension_numbers<[1], [0], [0], [1], [0, 0, 1, 1], [], []>} : vector<8x128xbf16>, vector<128x128xbf16>, vector<8x128xf32> -> vector<8x128xf32>
    %353 = arith.addf %344, %352 : vector<8x128xf32>
    %354 = arith.truncf %348 : vector<8x128xf32> to vector<8x128xbf16>
    %c0_282 = arith.constant 0 : index
    %c0_283 = arith.constant 0 : index
    %c0_284 = arith.constant 0 : index
    %355 = vector.load %arg35[%c0_282, %c0_283, %c0_284] : memref<3x128x128xbf16, #tpu.memory_space<vmem>>, vector<1x128x128xbf16>
    %356 = vector.shape_cast %355 : vector<1x128x128xbf16> to vector<128x128xbf16>
    %cst_285 = arith.constant dense<0.000000e+00> : vector<8x128xf32>
    %357 = tpu.matmul %354, %356, %cst_285 {dimension_numbers = #tpu.dot_dimension_numbers<[1], [0], [0], [1], [0, 0, 1, 1], [], []>} : vector<8x128xbf16>, vector<128x128xbf16>, vector<8x128xf32> -> vector<8x128xf32>
    %358 = arith.addf %353, %357 : vector<8x128xf32>
    %c1_286 = arith.constant 1 : index
    %c0_287 = arith.constant 0 : index
    %c0_288 = arith.constant 0 : index
    %359 = vector.load %arg33[%c1_286, %c0_287, %c0_288] : memref<3x8x8xf32, #tpu.memory_space<vmem>>, vector<1x8x8xf32>
    %360 = vector.shape_cast %359 : vector<1x8x8xf32> to vector<8x8xf32>
    %cst_289 = arith.constant dense<0.000000e+00> : vector<8x128xf32>
    %361 = tpu.matmul %360, %343, %cst_289 {dimension_numbers = #tpu.dot_dimension_numbers<[1], [0], [0], [1], [0, 0, 1, 1], [], []>} : vector<8x8xf32>, vector<8x128xf32>, vector<8x128xf32> -> vector<8x128xf32>
    %cst_290 = arith.constant dense<0.000000e+00> : vector<8x128xf32>
    %362 = tpu.matmul %360, %173, %cst_290 {dimension_numbers = #tpu.dot_dimension_numbers<[1], [0], [0], [1], [0, 0, 1, 1], [], []>} : vector<8x8xf32>, vector<8x128xf32>, vector<8x128xf32> -> vector<8x128xf32>
    %363 = arith.truncf %361 : vector<8x128xf32> to vector<8x128xbf16>
    %c1_291 = arith.constant 1 : index
    %c0_292 = arith.constant 0 : index
    %c0_293 = arith.constant 0 : index
    %364 = vector.load %arg34[%c1_291, %c0_292, %c0_293] : memref<3x128x128xbf16, #tpu.memory_space<vmem>>, vector<1x128x128xbf16>
    %365 = vector.shape_cast %364 : vector<1x128x128xbf16> to vector<128x128xbf16>
    %cst_294 = arith.constant dense<0.000000e+00> : vector<8x128xf32>
    %366 = tpu.matmul %363, %365, %cst_294 {dimension_numbers = #tpu.dot_dimension_numbers<[1], [0], [0], [1], [0, 0, 1, 1], [], []>} : vector<8x128xbf16>, vector<128x128xbf16>, vector<8x128xf32> -> vector<8x128xf32>
    %367 = arith.addf %358, %366 : vector<8x128xf32>
    %368 = arith.truncf %362 : vector<8x128xf32> to vector<8x128xbf16>
    %c1_295 = arith.constant 1 : index
    %c0_296 = arith.constant 0 : index
    %c0_297 = arith.constant 0 : index
    %369 = vector.load %arg35[%c1_295, %c0_296, %c0_297] : memref<3x128x128xbf16, #tpu.memory_space<vmem>>, vector<1x128x128xbf16>
    %370 = vector.shape_cast %369 : vector<1x128x128xbf16> to vector<128x128xbf16>
    %cst_298 = arith.constant dense<0.000000e+00> : vector<8x128xf32>
    %371 = tpu.matmul %368, %370, %cst_298 {dimension_numbers = #tpu.dot_dimension_numbers<[1], [0], [0], [1], [0, 0, 1, 1], [], []>} : vector<8x128xbf16>, vector<128x128xbf16>, vector<8x128xf32> -> vector<8x128xf32>
    %372 = arith.addf %367, %371 : vector<8x128xf32>
    %c2_299 = arith.constant 2 : index
    %c0_300 = arith.constant 0 : index
    %c0_301 = arith.constant 0 : index
    %373 = vector.load %arg33[%c2_299, %c0_300, %c0_301] : memref<3x8x8xf32, #tpu.memory_space<vmem>>, vector<1x8x8xf32>
    %374 = vector.shape_cast %373 : vector<1x8x8xf32> to vector<8x8xf32>
    %cst_302 = arith.constant dense<0.000000e+00> : vector<8x128xf32>
    %375 = tpu.matmul %374, %343, %cst_302 {dimension_numbers = #tpu.dot_dimension_numbers<[1], [0], [0], [1], [0, 0, 1, 1], [], []>} : vector<8x8xf32>, vector<8x128xf32>, vector<8x128xf32> -> vector<8x128xf32>
    %cst_303 = arith.constant dense<0.000000e+00> : vector<8x128xf32>
    %376 = tpu.matmul %374, %173, %cst_303 {dimension_numbers = #tpu.dot_dimension_numbers<[1], [0], [0], [1], [0, 0, 1, 1], [], []>} : vector<8x8xf32>, vector<8x128xf32>, vector<8x128xf32> -> vector<8x128xf32>
    %377 = arith.truncf %375 : vector<8x128xf32> to vector<8x128xbf16>
    %c2_304 = arith.constant 2 : index
    %c0_305 = arith.constant 0 : index
    %c0_306 = arith.constant 0 : index
    %378 = vector.load %arg34[%c2_304, %c0_305, %c0_306] : memref<3x128x128xbf16, #tpu.memory_space<vmem>>, vector<1x128x128xbf16>
    %379 = vector.shape_cast %378 : vector<1x128x128xbf16> to vector<128x128xbf16>
    %cst_307 = arith.constant dense<0.000000e+00> : vector<8x128xf32>
    %380 = tpu.matmul %377, %379, %cst_307 {dimension_numbers = #tpu.dot_dimension_numbers<[1], [0], [0], [1], [0, 0, 1, 1], [], []>} : vector<8x128xbf16>, vector<128x128xbf16>, vector<8x128xf32> -> vector<8x128xf32>
    %381 = arith.addf %372, %380 : vector<8x128xf32>
    %382 = arith.truncf %376 : vector<8x128xf32> to vector<8x128xbf16>
    %c2_308 = arith.constant 2 : index
    %c0_309 = arith.constant 0 : index
    %c0_310 = arith.constant 0 : index
    %383 = vector.load %arg35[%c2_308, %c0_309, %c0_310] : memref<3x128x128xbf16, #tpu.memory_space<vmem>>, vector<1x128x128xbf16>
    %384 = vector.shape_cast %383 : vector<1x128x128xbf16> to vector<128x128xbf16>
    %cst_311 = arith.constant dense<0.000000e+00> : vector<8x128xf32>
    %385 = tpu.matmul %382, %384, %cst_311 {dimension_numbers = #tpu.dot_dimension_numbers<[1], [0], [0], [1], [0, 0, 1, 1], [], []>} : vector<8x128xbf16>, vector<128x128xbf16>, vector<8x128xf32> -> vector<8x128xf32>
    %386 = arith.addf %381, %385 : vector<8x128xf32>
    %c0_312 = arith.constant 0 : index
    %c0_313 = arith.constant 0 : index
    %387 = vector.load %arg36[%c0_312, %c0_313] : memref<1x128xf32, #tpu.memory_space<vmem>>, vector<1x128xf32>
    %388 = vector.broadcast %387 : vector<1x128xf32> to vector<8x128xf32>
    %389 = arith.addf %386, %388 : vector<8x128xf32>
    %c0_314 = arith.constant 0 : index
    %c0_315 = arith.constant 0 : index
    %390 = vector.load %arg37[%c0_314, %c0_315] : memref<128x128xf32, #tpu.memory_space<vmem>>, vector<128x128xf32>
    %cst_316 = arith.constant dense<0.000000e+00> : vector<128xf32>
    %391 = vector.multi_reduction <add>, %389, %cst_316 [0] : vector<8x128xf32> to vector<128xf32>
    %392 = vector.shape_cast %391 : vector<128xf32> to vector<1x128xf32>
    %cst_317 = arith.constant 8.000000e+00 : f32
    %393 = vector.broadcast %cst_317 : f32 to vector<1x128xf32>
    %394 = arith.divf %392, %393 : vector<1x128xf32>
    %cst_318 = arith.constant dense<0.000000e+00> : vector<1x128xf32>
    %395 = tpu.matmul %394, %390, %cst_318 {dimension_numbers = #tpu.dot_dimension_numbers<[1], [0], [0], [1], [0, 0, 1, 1], [], []>} : vector<1x128xf32>, vector<128x128xf32>, vector<1x128xf32> -> vector<1x128xf32>
    %396 = vector.broadcast %395 : vector<1x128xf32> to vector<8x128xf32>
    %397 = arith.subf %389, %396 : vector<8x128xf32>
    %398 = arith.mulf %397, %397 : vector<8x128xf32>
    %cst_319 = arith.constant dense<0.000000e+00> : vector<128xf32>
    %399 = vector.multi_reduction <add>, %398, %cst_319 [0] : vector<8x128xf32> to vector<128xf32>
    %400 = vector.shape_cast %399 : vector<128xf32> to vector<1x128xf32>
    %cst_320 = arith.constant 8.000000e+00 : f32
    %401 = vector.broadcast %cst_320 : f32 to vector<1x128xf32>
    %402 = arith.divf %400, %401 : vector<1x128xf32>
    %cst_321 = arith.constant dense<0.000000e+00> : vector<1x128xf32>
    %403 = tpu.matmul %402, %390, %cst_321 {dimension_numbers = #tpu.dot_dimension_numbers<[1], [0], [0], [1], [0, 0, 1, 1], [], []>} : vector<1x128xf32>, vector<128x128xf32>, vector<1x128xf32> -> vector<1x128xf32>
    %cst_322 = arith.constant 9.99999974E-6 : f32
    %404 = vector.broadcast %cst_322 : f32 to vector<1x128xf32>
    %405 = arith.addf %403, %404 : vector<1x128xf32>
    %406 = math.rsqrt %405 : vector<1x128xf32>
    %407 = vector.broadcast %406 : vector<1x128xf32> to vector<8x128xf32>
    %408 = arith.mulf %397, %407 : vector<8x128xf32>
    %c0_323 = arith.constant 0 : index
    %c0_324 = arith.constant 0 : index
    %409 = vector.load %arg38[%c0_323, %c0_324] : memref<1x128xf32, #tpu.memory_space<vmem>>, vector<1x128xf32>
    %410 = vector.broadcast %409 : vector<1x128xf32> to vector<8x128xf32>
    %411 = arith.mulf %408, %410 : vector<8x128xf32>
    %c0_325 = arith.constant 0 : index
    %c0_326 = arith.constant 0 : index
    %412 = vector.load %arg39[%c0_325, %c0_326] : memref<1x128xf32, #tpu.memory_space<vmem>>, vector<1x128xf32>
    %413 = vector.broadcast %412 : vector<1x128xf32> to vector<8x128xf32>
    %414 = arith.addf %411, %413 : vector<8x128xf32>
    %cst_327 = arith.constant 0.000000e+00 : f32
    %415 = vector.broadcast %cst_327 : f32 to vector<8x128xf32>
    %416 = arith.cmpf oge, %414, %415 : vector<8x128xf32>
    %cst_328 = arith.constant 0.00999999977 : f32
    %417 = vector.broadcast %cst_328 : f32 to vector<8x128xf32>
    %418 = arith.mulf %417, %414 : vector<8x128xf32>
    %419 = arith.select %416, %414, %418 : vector<8x128xi1>, vector<8x128xf32>
    %420 = arith.truncf %419 : vector<8x128xf32> to vector<8x128xbf16>
    %cst_329 = arith.constant 0.000000e+00 : f32
    %421 = vector.broadcast %cst_329 : f32 to vector<32x32xf32>
    %c0_330 = arith.constant 0 : index
    %c0_331 = arith.constant 0 : index
    %c0_332 = arith.constant 0 : index
    %c0_333 = arith.constant 0 : index
    %422 = vector.load %arg41[%c0_330, %c0_331, %c0_332, %c0_333] : memref<4x2x128x32xbf16, #tpu.memory_space<vmem>>, vector<1x1x128x32xbf16>
    %423 = vector.shape_cast %422 : vector<1x1x128x32xbf16> to vector<128x32xbf16>
    %cst_334 = arith.constant dense<0.000000e+00> : vector<8x32xf32>
    %424 = tpu.matmul %420, %423, %cst_334 {dimension_numbers = #tpu.dot_dimension_numbers<[1], [0], [0], [1], [0, 0, 1, 1], [], []>} : vector<8x128xbf16>, vector<128x32xbf16>, vector<8x32xf32> -> vector<8x32xf32>
    %c0_335 = arith.constant 0 : index
    %c0_336 = arith.constant 0 : index
    %c0_337 = arith.constant 0 : index
    %425 = vector.load %arg40[%c0_335, %c0_336, %c0_337] : memref<4x32x8xf32, #tpu.memory_space<vmem>>, vector<1x32x8xf32>
    %426 = vector.shape_cast %425 : vector<1x32x8xf32> to vector<32x8xf32>
    %cst_338 = arith.constant dense<0.000000e+00> : vector<32x32xf32>
    %427 = tpu.matmul %426, %424, %cst_338 {dimension_numbers = #tpu.dot_dimension_numbers<[1], [0], [0], [1], [0, 0, 1, 1], [], []>} : vector<32x8xf32>, vector<8x32xf32>, vector<32x32xf32> -> vector<32x32xf32>
    %428 = arith.addf %421, %427 : vector<32x32xf32>
    %c1_339 = arith.constant 1 : index
    %c0_340 = arith.constant 0 : index
    %c0_341 = arith.constant 0 : index
    %c0_342 = arith.constant 0 : index
    %429 = vector.load %arg41[%c1_339, %c0_340, %c0_341, %c0_342] : memref<4x2x128x32xbf16, #tpu.memory_space<vmem>>, vector<1x1x128x32xbf16>
    %430 = vector.shape_cast %429 : vector<1x1x128x32xbf16> to vector<128x32xbf16>
    %cst_343 = arith.constant dense<0.000000e+00> : vector<8x32xf32>
    %431 = tpu.matmul %420, %430, %cst_343 {dimension_numbers = #tpu.dot_dimension_numbers<[1], [0], [0], [1], [0, 0, 1, 1], [], []>} : vector<8x128xbf16>, vector<128x32xbf16>, vector<8x32xf32> -> vector<8x32xf32>
    %c1_344 = arith.constant 1 : index
    %c0_345 = arith.constant 0 : index
    %c0_346 = arith.constant 0 : index
    %432 = vector.load %arg40[%c1_344, %c0_345, %c0_346] : memref<4x32x8xf32, #tpu.memory_space<vmem>>, vector<1x32x8xf32>
    %433 = vector.shape_cast %432 : vector<1x32x8xf32> to vector<32x8xf32>
    %cst_347 = arith.constant dense<0.000000e+00> : vector<32x32xf32>
    %434 = tpu.matmul %433, %431, %cst_347 {dimension_numbers = #tpu.dot_dimension_numbers<[1], [0], [0], [1], [0, 0, 1, 1], [], []>} : vector<32x8xf32>, vector<8x32xf32>, vector<32x32xf32> -> vector<32x32xf32>
    %435 = arith.addf %428, %434 : vector<32x32xf32>
    %c2_348 = arith.constant 2 : index
    %c0_349 = arith.constant 0 : index
    %c0_350 = arith.constant 0 : index
    %c0_351 = arith.constant 0 : index
    %436 = vector.load %arg41[%c2_348, %c0_349, %c0_350, %c0_351] : memref<4x2x128x32xbf16, #tpu.memory_space<vmem>>, vector<1x1x128x32xbf16>
    %437 = vector.shape_cast %436 : vector<1x1x128x32xbf16> to vector<128x32xbf16>
    %cst_352 = arith.constant dense<0.000000e+00> : vector<8x32xf32>
    %438 = tpu.matmul %420, %437, %cst_352 {dimension_numbers = #tpu.dot_dimension_numbers<[1], [0], [0], [1], [0, 0, 1, 1], [], []>} : vector<8x128xbf16>, vector<128x32xbf16>, vector<8x32xf32> -> vector<8x32xf32>
    %c2_353 = arith.constant 2 : index
    %c0_354 = arith.constant 0 : index
    %c0_355 = arith.constant 0 : index
    %439 = vector.load %arg40[%c2_353, %c0_354, %c0_355] : memref<4x32x8xf32, #tpu.memory_space<vmem>>, vector<1x32x8xf32>
    %440 = vector.shape_cast %439 : vector<1x32x8xf32> to vector<32x8xf32>
    %cst_356 = arith.constant dense<0.000000e+00> : vector<32x32xf32>
    %441 = tpu.matmul %440, %438, %cst_356 {dimension_numbers = #tpu.dot_dimension_numbers<[1], [0], [0], [1], [0, 0, 1, 1], [], []>} : vector<32x8xf32>, vector<8x32xf32>, vector<32x32xf32> -> vector<32x32xf32>
    %442 = arith.addf %435, %441 : vector<32x32xf32>
    %c3 = arith.constant 3 : index
    %c0_357 = arith.constant 0 : index
    %c0_358 = arith.constant 0 : index
    %c0_359 = arith.constant 0 : index
    %443 = vector.load %arg41[%c3, %c0_357, %c0_358, %c0_359] : memref<4x2x128x32xbf16, #tpu.memory_space<vmem>>, vector<1x1x128x32xbf16>
    %444 = vector.shape_cast %443 : vector<1x1x128x32xbf16> to vector<128x32xbf16>
    %cst_360 = arith.constant dense<0.000000e+00> : vector<8x32xf32>
    %445 = tpu.matmul %420, %444, %cst_360 {dimension_numbers = #tpu.dot_dimension_numbers<[1], [0], [0], [1], [0, 0, 1, 1], [], []>} : vector<8x128xbf16>, vector<128x32xbf16>, vector<8x32xf32> -> vector<8x32xf32>
    %c3_361 = arith.constant 3 : index
    %c0_362 = arith.constant 0 : index
    %c0_363 = arith.constant 0 : index
    %446 = vector.load %arg40[%c3_361, %c0_362, %c0_363] : memref<4x32x8xf32, #tpu.memory_space<vmem>>, vector<1x32x8xf32>
    %447 = vector.shape_cast %446 : vector<1x32x8xf32> to vector<32x8xf32>
    %cst_364 = arith.constant dense<0.000000e+00> : vector<32x32xf32>
    %448 = tpu.matmul %447, %445, %cst_364 {dimension_numbers = #tpu.dot_dimension_numbers<[1], [0], [0], [1], [0, 0, 1, 1], [], []>} : vector<32x8xf32>, vector<8x32xf32>, vector<32x32xf32> -> vector<32x32xf32>
    %449 = arith.addf %442, %448 : vector<32x32xf32>
    %c0_365 = arith.constant 0 : index
    %c0_366 = arith.constant 0 : index
    %450 = vector.load %arg42[%c0_365, %c0_366] : memref<2x32xf32, #tpu.memory_space<vmem>>, vector<1x32xf32>
    %451 = vector.broadcast %450 : vector<1x32xf32> to vector<32x32xf32>
    %452 = arith.addf %449, %451 : vector<32x32xf32>
    %453 = vector.broadcast %17 : vector<1x1xf32> to vector<32x32xf32>
    %454 = arith.mulf %452, %453 : vector<32x32xf32>
    %455 = vector.broadcast %7 : vector<1x1xf32> to vector<32x32xf32>
    %456 = arith.addf %454, %455 : vector<32x32xf32>
    %c0_367 = arith.constant 0 : index
    %c0_368 = arith.constant 0 : index
    %c0_369 = arith.constant 0 : index
    %457 = vector.load %arg43[%c0_367, %c0_368, %c0_369] : memref<1x64x32xf32, #tpu.memory_space<vmem>>, vector<1x32x32xf32>
    %458 = vector.shape_cast %457 : vector<1x32x32xf32> to vector<32x32xf32>
    %459 = vector.shape_cast %456 : vector<32x32xf32> to vector<1x32x32xf32>
    tpu.vector_store %arg43[%c0_367, %c0_368, %c0_369], %459 {strides = array<i32>} : memref<1x64x32xf32, #tpu.memory_space<vmem>>, vector<1x32x32xf32>,
    %cst_370 = arith.constant 0.000000e+00 : f32
    %460 = vector.broadcast %cst_370 : f32 to vector<32x32xf32>
    %c0_371 = arith.constant 0 : index
    %c1_372 = arith.constant 1 : index
    %c0_373 = arith.constant 0 : index
    %c0_374 = arith.constant 0 : index
    %461 = vector.load %arg41[%c0_371, %c1_372, %c0_373, %c0_374] : memref<4x2x128x32xbf16, #tpu.memory_space<vmem>>, vector<1x1x128x32xbf16>
    %462 = vector.shape_cast %461 : vector<1x1x128x32xbf16> to vector<128x32xbf16>
    %cst_375 = arith.constant dense<0.000000e+00> : vector<8x32xf32>
    %463 = tpu.matmul %420, %462, %cst_375 {dimension_numbers = #tpu.dot_dimension_numbers<[1], [0], [0], [1], [0, 0, 1, 1], [], []>} : vector<8x128xbf16>, vector<128x32xbf16>, vector<8x32xf32> -> vector<8x32xf32>
    %c0_376 = arith.constant 0 : index
    %c0_377 = arith.constant 0 : index
    %c0_378 = arith.constant 0 : index
    %464 = vector.load %arg40[%c0_376, %c0_377, %c0_378] : memref<4x32x8xf32, #tpu.memory_space<vmem>>, vector<1x32x8xf32>
    %465 = vector.shape_cast %464 : vector<1x32x8xf32> to vector<32x8xf32>
    %cst_379 = arith.constant dense<0.000000e+00> : vector<32x32xf32>
    %466 = tpu.matmul %465, %463, %cst_379 {dimension_numbers = #tpu.dot_dimension_numbers<[1], [0], [0], [1], [0, 0, 1, 1], [], []>} : vector<32x8xf32>, vector<8x32xf32>, vector<32x32xf32> -> vector<32x32xf32>
    %467 = arith.addf %460, %466 : vector<32x32xf32>
    %c1_380 = arith.constant 1 : index
    %c1_381 = arith.constant 1 : index
    %c0_382 = arith.constant 0 : index
    %c0_383 = arith.constant 0 : index
    %468 = vector.load %arg41[%c1_380, %c1_381, %c0_382, %c0_383] : memref<4x2x128x32xbf16, #tpu.memory_space<vmem>>, vector<1x1x128x32xbf16>
    %469 = vector.shape_cast %468 : vector<1x1x128x32xbf16> to vector<128x32xbf16>
    %cst_384 = arith.constant dense<0.000000e+00> : vector<8x32xf32>
    %470 = tpu.matmul %420, %469, %cst_384 {dimension_numbers = #tpu.dot_dimension_numbers<[1], [0], [0], [1], [0, 0, 1, 1], [], []>} : vector<8x128xbf16>, vector<128x32xbf16>, vector<8x32xf32> -> vector<8x32xf32>
    %c1_385 = arith.constant 1 : index
    %c0_386 = arith.constant 0 : index
    %c0_387 = arith.constant 0 : index
    %471 = vector.load %arg40[%c1_385, %c0_386, %c0_387] : memref<4x32x8xf32, #tpu.memory_space<vmem>>, vector<1x32x8xf32>
    %472 = vector.shape_cast %471 : vector<1x32x8xf32> to vector<32x8xf32>
    %cst_388 = arith.constant dense<0.000000e+00> : vector<32x32xf32>
    %473 = tpu.matmul %472, %470, %cst_388 {dimension_numbers = #tpu.dot_dimension_numbers<[1], [0], [0], [1], [0, 0, 1, 1], [], []>} : vector<32x8xf32>, vector<8x32xf32>, vector<32x32xf32> -> vector<32x32xf32>
    %474 = arith.addf %467, %473 : vector<32x32xf32>
    %c2_389 = arith.constant 2 : index
    %c1_390 = arith.constant 1 : index
    %c0_391 = arith.constant 0 : index
    %c0_392 = arith.constant 0 : index
    %475 = vector.load %arg41[%c2_389, %c1_390, %c0_391, %c0_392] : memref<4x2x128x32xbf16, #tpu.memory_space<vmem>>, vector<1x1x128x32xbf16>
    %476 = vector.shape_cast %475 : vector<1x1x128x32xbf16> to vector<128x32xbf16>
    %cst_393 = arith.constant dense<0.000000e+00> : vector<8x32xf32>
    %477 = tpu.matmul %420, %476, %cst_393 {dimension_numbers = #tpu.dot_dimension_numbers<[1], [0], [0], [1], [0, 0, 1, 1], [], []>} : vector<8x128xbf16>, vector<128x32xbf16>, vector<8x32xf32> -> vector<8x32xf32>
    %c2_394 = arith.constant 2 : index
    %c0_395 = arith.constant 0 : index
    %c0_396 = arith.constant 0 : index
    %478 = vector.load %arg40[%c2_394, %c0_395, %c0_396] : memref<4x32x8xf32, #tpu.memory_space<vmem>>, vector<1x32x8xf32>
    %479 = vector.shape_cast %478 : vector<1x32x8xf32> to vector<32x8xf32>
    %cst_397 = arith.constant dense<0.000000e+00> : vector<32x32xf32>
    %480 = tpu.matmul %479, %477, %cst_397 {dimension_numbers = #tpu.dot_dimension_numbers<[1], [0], [0], [1], [0, 0, 1, 1], [], []>} : vector<32x8xf32>, vector<8x32xf32>, vector<32x32xf32> -> vector<32x32xf32>
    %481 = arith.addf %474, %480 : vector<32x32xf32>
    %c3_398 = arith.constant 3 : index
    %c1_399 = arith.constant 1 : index
    %c0_400 = arith.constant 0 : index
    %c0_401 = arith.constant 0 : index
    %482 = vector.load %arg41[%c3_398, %c1_399, %c0_400, %c0_401] : memref<4x2x128x32xbf16, #tpu.memory_space<vmem>>, vector<1x1x128x32xbf16>
    %483 = vector.shape_cast %482 : vector<1x1x128x32xbf16> to vector<128x32xbf16>
    %cst_402 = arith.constant dense<0.000000e+00> : vector<8x32xf32>
    %484 = tpu.matmul %420, %483, %cst_402 {dimension_numbers = #tpu.dot_dimension_numbers<[1], [0], [0], [1], [0, 0, 1, 1], [], []>} : vector<8x128xbf16>, vector<128x32xbf16>, vector<8x32xf32> -> vector<8x32xf32>
    %c3_403 = arith.constant 3 : index
    %c0_404 = arith.constant 0 : index
    %c0_405 = arith.constant 0 : index
    %485 = vector.load %arg40[%c3_403, %c0_404, %c0_405] : memref<4x32x8xf32, #tpu.memory_space<vmem>>, vector<1x32x8xf32>
    %486 = vector.shape_cast %485 : vector<1x32x8xf32> to vector<32x8xf32>
    %cst_406 = arith.constant dense<0.000000e+00> : vector<32x32xf32>
    %487 = tpu.matmul %486, %484, %cst_406 {dimension_numbers = #tpu.dot_dimension_numbers<[1], [0], [0], [1], [0, 0, 1, 1], [], []>} : vector<32x8xf32>, vector<8x32xf32>, vector<32x32xf32> -> vector<32x32xf32>
    %488 = arith.addf %481, %487 : vector<32x32xf32>
    %c1_407 = arith.constant 1 : index
    %c0_408 = arith.constant 0 : index
    %489 = vector.load %arg42[%c1_407, %c0_408] : memref<2x32xf32, #tpu.memory_space<vmem>>, vector<1x32xf32>
    %490 = vector.broadcast %489 : vector<1x32xf32> to vector<32x32xf32>
    %491 = arith.addf %488, %490 : vector<32x32xf32>
    %492 = vector.broadcast %17 : vector<1x1xf32> to vector<32x32xf32>
    %493 = arith.mulf %491, %492 : vector<32x32xf32>
    %494 = vector.broadcast %7 : vector<1x1xf32> to vector<32x32xf32>
    %495 = arith.addf %493, %494 : vector<32x32xf32>
    %c0_409 = arith.constant 0 : index
    %c32 = arith.constant 32 : index
    %c0_410 = arith.constant 0 : index
    %496 = vector.load %arg43[%c0_409, %c32, %c0_410] : memref<1x64x32xf32, #tpu.memory_space<vmem>>, vector<1x32x32xf32>
    %497 = vector.shape_cast %496 : vector<1x32x32xf32> to vector<32x32xf32>
    %498 = vector.shape_cast %495 : vector<32x32xf32> to vector<1x32x32xf32>
    tpu.vector_store %arg43[%c0_409, %c32, %c0_410], %498 {strides = array<i32>} : memref<1x64x32xf32, #tpu.memory_space<vmem>>, vector<1x32x32xf32>,
    return
  }
  func.func @transform_0(%arg0: i32) -> (i32, i32, i32) {
    %c0_i32 = arith.constant 0 : i32
    %c0_i32_0 = arith.constant 0 : i32
    %c0_i32_1 = arith.constant 0 : i32
    return %arg0, %c0_i32, %c0_i32_0 : i32, i32, i32
  }
  func.func @transform_1(%arg0: i32) -> (i32, i32, i32) {
    %c0_i32 = arith.constant 0 : i32
    %c0_i32_0 = arith.constant 0 : i32
    %c0_i32_1 = arith.constant 0 : i32
    %c0_i32_2 = arith.constant 0 : i32
    return %c0_i32, %c0_i32_0, %c0_i32_1 : i32, i32, i32
  }
  func.func @transform_2(%arg0: i32) -> (i32, i32, i32, i32) {
    %c0_i32 = arith.constant 0 : i32
    %c0_i32_0 = arith.constant 0 : i32
    %c0_i32_1 = arith.constant 0 : i32
    %c0_i32_2 = arith.constant 0 : i32
    %c0_i32_3 = arith.constant 0 : i32
    return %c0_i32, %c0_i32_0, %c0_i32_1, %c0_i32_2 : i32, i32, i32, i32
  }
  func.func @transform_3(%arg0: i32) -> (i32, i32) {
    %c0_i32 = arith.constant 0 : i32
    %c0_i32_0 = arith.constant 0 : i32
    %c0_i32_1 = arith.constant 0 : i32
    return %c0_i32, %c0_i32_0 : i32, i32
  }
  func.func @transform_4(%arg0: i32) -> (i32, i32) {
    %c0_i32 = arith.constant 0 : i32
    %c0_i32_0 = arith.constant 0 : i32
    %c0_i32_1 = arith.constant 0 : i32
    return %c0_i32, %c0_i32_0 : i32, i32
  }
  func.func @transform_5(%arg0: i32) -> (i32, i32) {
    %c0_i32 = arith.constant 0 : i32
    %c0_i32_0 = arith.constant 0 : i32
    %c0_i32_1 = arith.constant 0 : i32
    return %c0_i32, %c0_i32_0 : i32, i32
  }
  func.func @transform_6(%arg0: i32) -> (i32, i32) {
    %c0_i32 = arith.constant 0 : i32
    %c0_i32_0 = arith.constant 0 : i32
    %c0_i32_1 = arith.constant 0 : i32
    return %c0_i32, %c0_i32_0 : i32, i32
  }
  func.func @transform_7(%arg0: i32) -> (i32, i32, i32) {
    %c0_i32 = arith.constant 0 : i32
    %c0_i32_0 = arith.constant 0 : i32
    %c0_i32_1 = arith.constant 0 : i32
    %c0_i32_2 = arith.constant 0 : i32
    return %c0_i32, %c0_i32_0, %c0_i32_1 : i32, i32, i32
  }
  func.func @transform_8(%arg0: i32) -> (i32, i32, i32) {
    %c0_i32 = arith.constant 0 : i32
    %c0_i32_0 = arith.constant 0 : i32
    %c0_i32_1 = arith.constant 0 : i32
    %c0_i32_2 = arith.constant 0 : i32
    return %c0_i32, %c0_i32_0, %c0_i32_1 : i32, i32, i32
  }
  func.func @transform_9(%arg0: i32) -> (i32, i32) {
    %c0_i32 = arith.constant 0 : i32
    %c0_i32_0 = arith.constant 0 : i32
    %c0_i32_1 = arith.constant 0 : i32
    return %c0_i32, %c0_i32_0 : i32, i32
  }
  func.func @transform_10(%arg0: i32) -> (i32, i32) {
    %c0_i32 = arith.constant 0 : i32
    %c0_i32_0 = arith.constant 0 : i32
    %c0_i32_1 = arith.constant 0 : i32
    return %c0_i32, %c0_i32_0 : i32, i32
  }
  func.func @transform_11(%arg0: i32) -> (i32, i32) {
    %c0_i32 = arith.constant 0 : i32
    %c0_i32_0 = arith.constant 0 : i32
    %c0_i32_1 = arith.constant 0 : i32
    return %c0_i32, %c0_i32_0 : i32, i32
  }
  func.func @transform_12(%arg0: i32) -> (i32, i32) {
    %c0_i32 = arith.constant 0 : i32
    %c0_i32_0 = arith.constant 0 : i32
    %c0_i32_1 = arith.constant 0 : i32
    return %c0_i32, %c0_i32_0 : i32, i32
  }
  func.func @transform_13(%arg0: i32) -> (i32, i32, i32) {
    %c0_i32 = arith.constant 0 : i32
    %c0_i32_0 = arith.constant 0 : i32
    %c0_i32_1 = arith.constant 0 : i32
    %c0_i32_2 = arith.constant 0 : i32
    return %c0_i32, %c0_i32_0, %c0_i32_1 : i32, i32, i32
  }
  func.func @transform_14(%arg0: i32) -> (i32, i32, i32) {
    %c0_i32 = arith.constant 0 : i32
    %c0_i32_0 = arith.constant 0 : i32
    %c0_i32_1 = arith.constant 0 : i32
    %c0_i32_2 = arith.constant 0 : i32
    return %c0_i32, %c0_i32_0, %c0_i32_1 : i32, i32, i32
  }
  func.func @transform_15(%arg0: i32) -> (i32, i32) {
    %c0_i32 = arith.constant 0 : i32
    %c0_i32_0 = arith.constant 0 : i32
    %c0_i32_1 = arith.constant 0 : i32
    return %c0_i32, %c0_i32_0 : i32, i32
  }
  func.func @transform_16(%arg0: i32) -> (i32, i32, i32) {
    %c0_i32 = arith.constant 0 : i32
    %c0_i32_0 = arith.constant 0 : i32
    %c0_i32_1 = arith.constant 0 : i32
    %c0_i32_2 = arith.constant 0 : i32
    return %c0_i32, %c0_i32_0, %c0_i32_1 : i32, i32, i32
  }
  func.func @transform_17(%arg0: i32) -> (i32, i32, i32) {
    %c0_i32 = arith.constant 0 : i32
    %c0_i32_0 = arith.constant 0 : i32
    %c0_i32_1 = arith.constant 0 : i32
    %c0_i32_2 = arith.constant 0 : i32
    return %c0_i32, %c0_i32_0, %c0_i32_1 : i32, i32, i32
  }
  func.func @transform_18(%arg0: i32) -> (i32, i32) {
    %c0_i32 = arith.constant 0 : i32
    %c0_i32_0 = arith.constant 0 : i32
    %c0_i32_1 = arith.constant 0 : i32
    return %c0_i32, %c0_i32_0 : i32, i32
  }
  func.func @transform_19(%arg0: i32) -> (i32, i32, i32) {
    %c0_i32 = arith.constant 0 : i32
    %c0_i32_0 = arith.constant 0 : i32
    %c0_i32_1 = arith.constant 0 : i32
    %c0_i32_2 = arith.constant 0 : i32
    return %c0_i32, %c0_i32_0, %c0_i32_1 : i32, i32, i32
  }
  func.func @transform_20(%arg0: i32) -> (i32, i32, i32) {
    %c0_i32 = arith.constant 0 : i32
    %c0_i32_0 = arith.constant 0 : i32
    %c0_i32_1 = arith.constant 0 : i32
    %c0_i32_2 = arith.constant 0 : i32
    return %c0_i32, %c0_i32_0, %c0_i32_1 : i32, i32, i32
  }
  func.func @transform_21(%arg0: i32) -> (i32, i32) {
    %c0_i32 = arith.constant 0 : i32
    %c0_i32_0 = arith.constant 0 : i32
    %c0_i32_1 = arith.constant 0 : i32
    return %c0_i32, %c0_i32_0 : i32, i32
  }
  func.func @transform_22(%arg0: i32) -> (i32, i32, i32) {
    %c0_i32 = arith.constant 0 : i32
    %c0_i32_0 = arith.constant 0 : i32
    %c0_i32_1 = arith.constant 0 : i32
    %c0_i32_2 = arith.constant 0 : i32
    return %c0_i32, %c0_i32_0, %c0_i32_1 : i32, i32, i32
  }
  func.func @transform_23(%arg0: i32) -> (i32, i32, i32) {
    %c0_i32 = arith.constant 0 : i32
    %c0_i32_0 = arith.constant 0 : i32
    %c0_i32_1 = arith.constant 0 : i32
    %c0_i32_2 = arith.constant 0 : i32
    return %c0_i32, %c0_i32_0, %c0_i32_1 : i32, i32, i32
  }
  func.func @transform_24(%arg0: i32) -> (i32, i32, i32) {
    %c0_i32 = arith.constant 0 : i32
    %c0_i32_0 = arith.constant 0 : i32
    %c0_i32_1 = arith.constant 0 : i32
    %c0_i32_2 = arith.constant 0 : i32
    return %c0_i32, %c0_i32_0, %c0_i32_1 : i32, i32, i32
  }
  func.func @transform_25(%arg0: i32) -> (i32, i32) {
    %c0_i32 = arith.constant 0 : i32
    %c0_i32_0 = arith.constant 0 : i32
    %c0_i32_1 = arith.constant 0 : i32
    return %c0_i32, %c0_i32_0 : i32, i32
  }
  func.func @transform_26(%arg0: i32) -> (i32, i32) {
    %c0_i32 = arith.constant 0 : i32
    %c0_i32_0 = arith.constant 0 : i32
    %c0_i32_1 = arith.constant 0 : i32
    return %c0_i32, %c0_i32_0 : i32, i32
  }
  func.func @transform_27(%arg0: i32) -> (i32, i32) {
    %c0_i32 = arith.constant 0 : i32
    %c0_i32_0 = arith.constant 0 : i32
    %c0_i32_1 = arith.constant 0 : i32
    return %c0_i32, %c0_i32_0 : i32, i32
  }
  func.func @transform_28(%arg0: i32) -> (i32, i32) {
    %c0_i32 = arith.constant 0 : i32
    %c0_i32_0 = arith.constant 0 : i32
    %c0_i32_1 = arith.constant 0 : i32
    return %c0_i32, %c0_i32_0 : i32, i32
  }
  func.func @transform_29(%arg0: i32) -> (i32, i32, i32) {
    %c0_i32 = arith.constant 0 : i32
    %c0_i32_0 = arith.constant 0 : i32
    %c0_i32_1 = arith.constant 0 : i32
    %c0_i32_2 = arith.constant 0 : i32
    return %c0_i32, %c0_i32_0, %c0_i32_1 : i32, i32, i32
  }
  func.func @transform_30(%arg0: i32) -> (i32, i32, i32) {
    %c0_i32 = arith.constant 0 : i32
    %c0_i32_0 = arith.constant 0 : i32
    %c0_i32_1 = arith.constant 0 : i32
    %c0_i32_2 = arith.constant 0 : i32
    return %c0_i32, %c0_i32_0, %c0_i32_1 : i32, i32, i32
  }
  func.func @transform_31(%arg0: i32) -> (i32, i32) {
    %c0_i32 = arith.constant 0 : i32
    %c0_i32_0 = arith.constant 0 : i32
    %c0_i32_1 = arith.constant 0 : i32
    return %c0_i32, %c0_i32_0 : i32, i32
  }
  func.func @transform_32(%arg0: i32) -> (i32, i32, i32) {
    %c0_i32 = arith.constant 0 : i32
    %c0_i32_0 = arith.constant 0 : i32
    %c0_i32_1 = arith.constant 0 : i32
    %c0_i32_2 = arith.constant 0 : i32
    return %c0_i32, %c0_i32_0, %c0_i32_1 : i32, i32, i32
  }
  func.func @transform_33(%arg0: i32) -> (i32, i32, i32) {
    %c0_i32 = arith.constant 0 : i32
    %c0_i32_0 = arith.constant 0 : i32
    %c0_i32_1 = arith.constant 0 : i32
    %c0_i32_2 = arith.constant 0 : i32
    return %c0_i32, %c0_i32_0, %c0_i32_1 : i32, i32, i32
  }
  func.func @transform_34(%arg0: i32) -> (i32, i32, i32) {
    %c0_i32 = arith.constant 0 : i32
    %c0_i32_0 = arith.constant 0 : i32
    %c0_i32_1 = arith.constant 0 : i32
    %c0_i32_2 = arith.constant 0 : i32
    return %c0_i32, %c0_i32_0, %c0_i32_1 : i32, i32, i32
  }
  func.func @transform_35(%arg0: i32) -> (i32, i32) {
    %c0_i32 = arith.constant 0 : i32
    %c0_i32_0 = arith.constant 0 : i32
    %c0_i32_1 = arith.constant 0 : i32
    return %c0_i32, %c0_i32_0 : i32, i32
  }
  func.func @transform_36(%arg0: i32) -> (i32, i32) {
    %c0_i32 = arith.constant 0 : i32
    %c0_i32_0 = arith.constant 0 : i32
    %c0_i32_1 = arith.constant 0 : i32
    return %c0_i32, %c0_i32_0 : i32, i32
  }
  func.func @transform_37(%arg0: i32) -> (i32, i32) {
    %c0_i32 = arith.constant 0 : i32
    %c0_i32_0 = arith.constant 0 : i32
    %c0_i32_1 = arith.constant 0 : i32
    return %c0_i32, %c0_i32_0 : i32, i32
  }
  func.func @transform_38(%arg0: i32) -> (i32, i32) {
    %c0_i32 = arith.constant 0 : i32
    %c0_i32_0 = arith.constant 0 : i32
    %c0_i32_1 = arith.constant 0 : i32
    return %c0_i32, %c0_i32_0 : i32, i32
  }
  func.func @transform_39(%arg0: i32) -> (i32, i32, i32) {
    %c0_i32 = arith.constant 0 : i32
    %c0_i32_0 = arith.constant 0 : i32
    %c0_i32_1 = arith.constant 0 : i32
    %c0_i32_2 = arith.constant 0 : i32
    return %c0_i32, %c0_i32_0, %c0_i32_1 : i32, i32, i32
  }
  func.func @transform_40(%arg0: i32) -> (i32, i32, i32, i32) {
    %c0_i32 = arith.constant 0 : i32
    %c0_i32_0 = arith.constant 0 : i32
    %c0_i32_1 = arith.constant 0 : i32
    %c0_i32_2 = arith.constant 0 : i32
    %c0_i32_3 = arith.constant 0 : i32
    return %c0_i32, %c0_i32_0, %c0_i32_1, %c0_i32_2 : i32, i32, i32, i32
  }
  func.func @transform_41(%arg0: i32) -> (i32, i32) {
    %c0_i32 = arith.constant 0 : i32
    %c0_i32_0 = arith.constant 0 : i32
    %c0_i32_1 = arith.constant 0 : i32
    return %c0_i32, %c0_i32_0 : i32, i32
  }
  func.func @transform_42(%arg0: i32) -> (i32, i32, i32) {
    %c0_i32 = arith.constant 0 : i32
    %c0_i32_0 = arith.constant 0 : i32
    %c0_i32_1 = arith.constant 0 : i32
    return %arg0, %c0_i32, %c0_i32_0 : i32, i32, i32
  }
}

module attributes {stable_mosaic.version = 11 : i64} {
  func.func @_dc_vn_kernel(%arg0: memref<1xf32, #tpu.memory_space<smem>>, %arg1: memref<2x1x1024xf32, #tpu.memory_space<vmem>>, %arg2: memref<2x2x1024xf32, #tpu.memory_space<vmem>>, %arg3: memref<2x2x1024xf32, #tpu.memory_space<vmem>>, %arg4: memref<2x2x1024xf32, #tpu.memory_space<vmem>>, %arg5: memref<2x2x1024xf32, #tpu.memory_space<vmem>>, %arg6: memref<2x2x1024xf32, #tpu.memory_space<vmem>>, %arg7: memref<2x2x1024xf32, #tpu.memory_space<vmem>>, %arg8: memref<2x2x1024xf32, #tpu.memory_space<vmem>>, %arg9: memref<2x2x1024xf32, #tpu.memory_space<vmem>>) attributes {dimension_semantics = [], scalar_prefetch = 0 : i64, scratch_operands = 0 : i64, tpu.core_type = #tpu.core_type<tc>} {
    %c0 = arith.constant 0 : index
    %0 = memref.load %arg0[%c0] : memref<1xf32, #tpu.memory_space<smem>>
    %c0_0 = arith.constant 0 : index
    %c0_1 = arith.constant 0 : index
    %c0_2 = arith.constant 0 : index
    %1 = vector.load %arg1[%c0_0, %c0_1, %c0_2] : memref<2x1x1024xf32, #tpu.memory_space<vmem>>, vector<2x1x1024xf32>
    %2 = vector.broadcast %0 : f32 to vector<2x1x1024xf32>
    %3 = arith.mulf %1, %2 : vector<2x1x1024xf32>
    %cst = arith.constant 1.000000e+00 : f32
    %4 = vector.broadcast %cst : f32 to vector<2x1x1024xf32>
    %5 = arith.subf %4, %3 : vector<2x1x1024xf32>
    %6 = vector.broadcast %0 : f32 to vector<2x1x1024xf32>
    %7 = arith.mulf %1, %6 : vector<2x1x1024xf32>
    %c0_3 = arith.constant 0 : index
    %c0_4 = arith.constant 0 : index
    %c0_5 = arith.constant 0 : index
    %8 = vector.load %arg2[%c0_3, %c0_4, %c0_5] : memref<2x2x1024xf32, #tpu.memory_space<vmem>>, vector<2x2x1024xf32>
    %9 = vector.broadcast %5 : vector<2x1x1024xf32> to vector<2x2x1024xf32>
    %10 = arith.mulf %8, %9 : vector<2x2x1024xf32>
    %c0_6 = arith.constant 0 : index
    %c0_7 = arith.constant 0 : index
    %c0_8 = arith.constant 0 : index
    %11 = vector.load %arg4[%c0_6, %c0_7, %c0_8] : memref<2x2x1024xf32, #tpu.memory_space<vmem>>, vector<2x2x1024xf32>
    %12 = vector.broadcast %7 : vector<2x1x1024xf32> to vector<2x2x1024xf32>
    %13 = arith.mulf %11, %12 : vector<2x2x1024xf32>
    %14 = arith.addf %10, %13 : vector<2x2x1024xf32>
    %c0_9 = arith.constant 0 : index
    %c0_10 = arith.constant 0 : index
    %c0_11 = arith.constant 0 : index
    %15 = vector.load %arg6[%c0_9, %c0_10, %c0_11] : memref<2x2x1024xf32, #tpu.memory_space<vmem>>, vector<2x2x1024xf32>
    %16 = arith.subf %14, %15 : vector<2x2x1024xf32>
    %c0_12 = arith.constant 0 : index
    %c0_13 = arith.constant 0 : index
    %c0_14 = arith.constant 0 : index
    %17 = vector.load %arg8[%c0_12, %c0_13, %c0_14] : memref<2x2x1024xf32, #tpu.memory_space<vmem>>, vector<2x2x1024xf32>
    tpu.vector_store %arg8[%c0_12, %c0_13, %c0_14], %16 {strides = array<i32>} : memref<2x2x1024xf32, #tpu.memory_space<vmem>>, vector<2x2x1024xf32>,
    %c0_15 = arith.constant 0 : index
    %c0_16 = arith.constant 0 : index
    %c0_17 = arith.constant 0 : index
    %18 = vector.load %arg3[%c0_15, %c0_16, %c0_17] : memref<2x2x1024xf32, #tpu.memory_space<vmem>>, vector<2x2x1024xf32>
    %19 = vector.broadcast %5 : vector<2x1x1024xf32> to vector<2x2x1024xf32>
    %20 = arith.mulf %18, %19 : vector<2x2x1024xf32>
    %c0_18 = arith.constant 0 : index
    %c0_19 = arith.constant 0 : index
    %c0_20 = arith.constant 0 : index
    %21 = vector.load %arg5[%c0_18, %c0_19, %c0_20] : memref<2x2x1024xf32, #tpu.memory_space<vmem>>, vector<2x2x1024xf32>
    %22 = vector.broadcast %7 : vector<2x1x1024xf32> to vector<2x2x1024xf32>
    %23 = arith.mulf %21, %22 : vector<2x2x1024xf32>
    %24 = arith.addf %20, %23 : vector<2x2x1024xf32>
    %c0_21 = arith.constant 0 : index
    %c0_22 = arith.constant 0 : index
    %c0_23 = arith.constant 0 : index
    %25 = vector.load %arg7[%c0_21, %c0_22, %c0_23] : memref<2x2x1024xf32, #tpu.memory_space<vmem>>, vector<2x2x1024xf32>
    %26 = arith.subf %24, %25 : vector<2x2x1024xf32>
    %c0_24 = arith.constant 0 : index
    %c0_25 = arith.constant 0 : index
    %c0_26 = arith.constant 0 : index
    %27 = vector.load %arg9[%c0_24, %c0_25, %c0_26] : memref<2x2x1024xf32, #tpu.memory_space<vmem>>, vector<2x2x1024xf32>
    tpu.vector_store %arg9[%c0_24, %c0_25, %c0_26], %26 {strides = array<i32>} : memref<2x2x1024xf32, #tpu.memory_space<vmem>>, vector<2x2x1024xf32>,
    return
  }
}

</mosaic_0001>

<bundles_post_ra>
// kernel: custom-call
= control target key start
LH: loop header
LB: loop body
LE: loop exit
PB: predicated region body
PF: predicated region fallthrough
CT: control target
= control target key end

     0   :  { %2 = vsyncpa [#allocation0], 0  ;;  %s61_s0 = inlined_call_operand.hbm [shape: c64[2,2,32,32], index: 0, kind: input, shape index: {}]   ;;  %s62_s1 = inlined_call_operand.vmem [shape: f32[2,2,32,32], index: 1, kind: output, shape index: {}]  }
   0x1   :  { %s3_s8 = sshll.u32 %s62_s1, 4  ;;  %s9_s11 = scalar_lea.hbm %s61_s0, 2048  ;;  %s4_s8 = int_to_ptr.vmem [resolvable:$true] %s3_s8 }
   0x2   :  { %p10_p0 = scmp.ne.s32.totalorder %s61_s0, %s9_s11  ;;  %s11_s16 = scalar_lea.hbm %s61_s0, 4096 }
   0x3   :  { %p12_p1 = scmp.lt.u32.totalorder %s11_s16, %s9_s11  ;;  %p13_p2 = scmp.lt.u32.totalorder %s9_s11, %s61_s0 }
   0x5   :  { %p14_p3 = por %p13_p2, %p12_p1 }
   0x7   :  { %p15_p4 = pnand %p14_p3, %p10_p0 }
   0x9   :  { %18 = shalt.err (!%p15_p4)  }
   0xa   :  { %s19_s1 = scalar_lea.vmem %s4_s8, 2048  ;;  %p24_p6 = scmp.lt.s32.totalorder %s4_s8, %s4_s8 }
   0xb   :  { %p20_p5 = scmp.ne.s32.totalorder %s4_s8, %s19_s1  ;;  %p25_p7 = scmp.lt.s32.totalorder %s19_s1, %s19_s1 }
   0xd   :  { %p26_p8 = por %p25_p7, %p24_p6 }
   0xf   :  { %p27_p9 = pnand %p26_p8, %p20_p5 }
  0x11   :  { %30 = shalt.err (!%p27_p9)  }
  0x12   :  { %6 = dma.hbm_to_vmem [thread:$0]  %s61_s0, 2048, %s4_s8, [#allocation0] }
  0x13   :  { %31 = dma.done.wait [#allocation0], 2048  }
  0x14   :  { %32 = vsyncadd [#allocation0], 4294965248 }
  0x15   :  { %8 = vsyncpa [#allocation0], 1 }

// kernel: custom-call.1
= control target key start
LH: loop header
LB: loop body
LE: loop exit
PB: predicated region body
PF: predicated region fallthrough
CT: control target
= control target key end

     0   :  { %s59_s0 = inlined_call_operand.hbm [shape: c64[2,2,32,32], index: 0, kind: input, shape index: {}]   ;;  %s60_s1 = inlined_call_operand.vmem [shape: f32[2,2,32,32], index: 1, kind: output, shape index: {}]  }
   0x1   :  { %s2_s8 = scalar_lea.hbm %s59_s0, 2048 }
   0x2   :  { %3 = vsyncpa [#allocation0], 0  ;;  %s4_s11 = sshll.u32 %s60_s1, 4  ;;  %s34_s14 = scalar_lea.hbm %s59_s0, 4096  ;;  %s5_s11 = int_to_ptr.vmem [resolvable:$true] %s4_s11 }
   0x3   :  { %p11_p0 = scmp.ne.s32.totalorder %s2_s8, %s34_s14  ;;  %p13_p1 = scmp.lt.u32.totalorder %s2_s8, %s59_s0 }
   0x4   :  { %p14_p2 = scmp.lt.u32.totalorder %s34_s14, %s34_s14  ;;  %p16_p4 = scmp.lt.u32.totalorder %s34_s14, %s2_s8 }
   0x6   :  { %p15_p3 = por %p14_p2, %p13_p1 }
   0x8   :  { %p17_p5 = por %p16_p4, %p15_p3 }
   0xa   :  { %p18_p6 = pnand %p17_p5, %p11_p0 }
   0xc   :  { %21 = shalt.err (!%p18_p6)  }
   0xd   :  { %s22_s17 = scalar_lea.vmem %s5_s11, 2048  ;;  %p27_p8 = scmp.lt.s32.totalorder %s5_s11, %s5_s11 }
   0xe   :  { %p23_p7 = scmp.ne.s32.totalorder %s5_s11, %s22_s17  ;;  %p28_p9 = scmp.lt.s32.totalorder %s22_s17, %s22_s17 }
  0x10   :  { %p29_p10 = por %p28_p9, %p27_p8 }
  0x12   :  { %p30_p11 = pnand %p29_p10, %p23_p7 }
  0x14   :  { %33 = shalt.err (!%p30_p11)  }
  0x15   :  { %7 = dma.hbm_to_vmem [thread:$0]  %s2_s8, 2048, %s5_s11, [#allocation0] }
  0x16   :  { %35 = dma.done.wait [#allocation0], 2048  }
  0x17   :  { %36 = vsyncadd [#allocation0], 4294965248 }
  0x18   :  { %9 = vsyncpa [#allocation0], 1 }

// kernel: vssmunet_unrolled_forward.5
= control target key start
LH: loop header
LB: loop body
LE: loop exit
PB: predicated region body
PF: predicated region fallthrough
CT: control target
= control target key end

     0   :  { %v46_v0 = vlaneseq  ;;  %v389_v3 = vmov 1983009808   ;;  %s630_s0 = inlined_call_operand.<no memory space> [shape: f32[1], index: 0, kind: input, shape index: {}]   ;;  %s631_s1 = inlined_call_operand.vmem [shape: f32[2,1,1024], index: 1, kind: input, shape index: {}]   ;;  %s632_s2 = inlined_call_operand.vmem [shape: f32[2,2,1024], index: 2, kind: input, shape index: {}, may-alias: {2,4}]   ;;  %s633_s4 = inlined_call_operand.vmem [shape: f32[2,2,1024], index: 4, kind: input, shape index: {}, may-alias: {2,4}]   ;;  %s634_s6 = inlined_call_operand.vmem [shape: f32[2,2,1024], index: 6, kind: input, shape index: {}]   ;;  %s635_s8 = inlined_call_operand.vmem [shape: f32[2,2,1024], index: 8, kind: output, shape index: {0}]   ;;  %s636_s3 = inlined_call_operand.vmem [shape: f32[2,2,1024], index: 3, kind: input, shape index: {}, may-alias: {3,5}]   ;;  %s637_s5 = inlined_call_operand.vmem [shape: f32[2,2,1024], index: 5, kind: input, shape index: {}, may-alias: {3,5}]   ;;  %s638_s7 = inlined_call_operand.vmem [shape: f32[2,2,1024], index: 7, kind: input, shape index: {}]   ;;  %s639_s9 = inlined_call_operand.vmem [shape: f32[2,2,1024], index: 9, kind: output, shape index: {1}]  }
   0x1   :  { %v33_v1 = vld [vmem:[%s631_s1] sm:$0xff]  ;;  %v35_v2 = vstv %s630_s0  ;;  %v113_v4 = vunpack.c.l.s4 %v389_v3  ;;  %v34_v36 = vld [vmem:[%s631_s1 + $0x8] sm:$0xff] }
   0x2   :  { %v36_v5 = vmul.f32 %v35_v2, %v33_v1  ;;  %v47_v6 = vshrl.u32 %v46_v0, 7  ;;  %v40_v41 = vld [vmem:[%s632_s2] sm:$0xff]  ;;  %v498_v50 = vmul.f32 %v35_v2, %v34_v36  ;;  %v41_v58 = vld [vmem:[%s632_s2 + $0x8] sm:$0xff] }
   0x3   :  { %v114_v7 = vunpack.c.0.s8 %v113_v4  ;;  %v186_v42 = vld [vmem:[%s633_s4] sm:$0xff]  ;;  %v187_v1 = vld [vmem:[%s633_s4 + $0x8] sm:$0xff] }
   0x4   :  { %v38_v8 = vsub.f32 1.0, %v36_v5  ;;  %v446_v9 = vsub.s32 0, %v47_v6  ;;  %v448_v10 = vsub.s32 1, %v47_v6  ;;  %v450_v11 = vsub.s32 2, %v47_v6  ;;  %v336_v57 = vld [vmem:[%s634_s6] sm:$0xff] }
   0x5   :  { %v452_v12 = vsub.s32 3, %v47_v6  ;;  %v454_v13 = vsub.s32 %v114_v7, %v47_v6  ;;  %v456_v14 = vsub.s32 4, %v47_v6  ;;  %v458_v15 = vsub.s32 5, %v47_v6  ;;  %v356_v36 = vld [vmem:[%s637_s5] sm:$0xff] }
   0x6   :  { %v49_v16 = vrot.slane %v38_v8, %v446_v9  ;;  %v53_v17 = vrot.slane %v38_v8, %v448_v10  ;;  %v57_v18 = vrot.slane %v38_v8, %v450_v11  ;;  %v195_v19 = vrot.slane %v36_v5, %v446_v9 }
   0x7   :  { %v61_v20 = vrot.slane %v38_v8, %v452_v12  ;;  %v199_v21 = vrot.slane %v36_v5, %v448_v10  ;;  %v203_v22 = vrot.slane %v36_v5, %v450_v11  ;;  %v207_v23 = vrot.slane %v36_v5, %v452_v12 }
   0x8   :  { %v110_v24 = vcombine.low %v49_v16, %v53_v17  ;;  %v65_v25 = vrot.slane %v38_v8, %v456_v14  ;;  %v69_v26 = vrot.slane %v38_v8, %v458_v15  ;;  %v470_v27 = vsub.s32 6, %v47_v6 }
   0x9   :  { %v111_v28 = vcombine.low %v57_v18, %v61_v20  ;;  %v256_v29 = vcombine.low %v195_v19, %v199_v21  ;;  %v257_v30 = vcombine.low %v203_v22, %v207_v23  ;;  %v472_v31 = vsub.s32 7, %v47_v6 }
   0xa   :  { %v118_v32 = vrot.slane %v110_v24, %v454_v13  ;;  %v73_v33 = vrot.slane %v38_v8, %v470_v27  ;;  %v127_v34 = vcombine.low %v65_v25, %v69_v26  ;;  %v211_v35 = vrot.slane %v36_v5, %v456_v14 }
   0xb   :  { %v125_v37 = vrot.slane %v111_v28, %v454_v13  ;;  %v264_v38 = vrot.slane %v256_v29, %v454_v13  ;;  %v271_v39 = vrot.slane %v257_v30, %v454_v13  ;;  %v77_v40 = vrot.slane %v38_v8, %v472_v31  ;;  %v42_v29 = vld [vmem:[%s632_s2 + $0x10] sm:$0xff] }
   0xc   :  { %v135_v43 = vrot.slane %v127_v34, %v454_v13  ;;  %v215_v44 = vrot.slane %v36_v5, %v458_v15  ;;  %v219_v45 = vrot.slane %v36_v5, %v470_v27  ;;  %v223_v46 = vrot.slane %v36_v5, %v472_v31 }
   0xd   :  { %v494_v47 = vcombine.low %v118_v32, %v125_v37  ;;  %v496_v48 = vcombine.low %v264_v38, %v271_v39  ;;  %v128_v49 = vcombine.low %v73_v33, %v77_v40  ;;  %v39_v56 = vsub.f32 1.0, %v498_v50  ;;  %v188_v39 = vld [vmem:[%s633_s4 + $0x10] sm:$0xff] }
   0xe   :  { %v273_v51 = vcombine.low %v211_v35, %v215_v44  ;;  %v274_v52 = vcombine.low %v219_v45, %v223_v46  ;;  %v227_v61 = vrot.slane %v498_v50, %v446_v9  ;;  %v231_v62 = vrot.slane %v498_v50, %v448_v10  ;;  %v348_v35 = vld [vmem:[%s636_s3] sm:$0xff]  ;;  %v357_v45 = vld [vmem:[%s637_s5 + $0x8] sm:$0xff]  ;;  %v350_v46 = vld [vmem:[%s636_s3 + $0x10] sm:$0xff] }
   0xf   :  { %v182_v53 = vmul.f32 %v494_v47, %v40_v41  ;;  %v328_v54 = vmul.f32 %v496_v48, %v186_v42  ;;  %v142_v55 = vrot.slane %v128_v49, %v454_v13  ;;  %v81_v2 = vrot.slane %v39_v56, %v446_v9 }
  0x10   :  { %v281_v59 = vrot.slane %v273_v51, %v454_v13  ;;  %v288_v60 = vrot.slane %v274_v52, %v454_v13  ;;  %v85_v3 = vrot.slane %v39_v56, %v448_v10  ;;  %v89_v5 = vrot.slane %v39_v56, %v450_v11  ;;  %v337_v10 = vld [vmem:[%s634_s6 + $0x8] sm:$0xff] }
  0x11   :  { %v332_v63 = vadd.f32 %v328_v54, %v182_v53  ;;  %v143_v0 = vcombine.low %v135_v43, %v142_v55  ;;  %v93_v6 = vrot.slane %v39_v56, %v452_v12  ;;  %v235_v7 = vrot.slane %v498_v50, %v450_v11  ;;  %v43_v53 = vld [vmem:[%s632_s2 + $0x18] sm:$0xff] }
  0x12   :  { %v289_v4 = vcombine.low %v281_v59, %v288_v60  ;;  %v144_v17 = vcombine.low %v81_v2, %v85_v3  ;;  %v239_v18 = vrot.slane %v498_v50, %v452_v12  ;;  %v290_v21 = vcombine.low %v227_v61, %v231_v62  ;;  %v351_v61 = vld [vmem:[%s636_s3 + $0x18] sm:$0xff] }
  0x13   :  { %v340_v8 = vsub.f32 %v332_v63, %v336_v57  ;;  %v183_v16 = vmul.f32 %v143_v0, %v41_v58  ;;  %v145_v20 = vcombine.low %v89_v5, %v93_v6  ;;  %v97_v9 = vrot.slane %v39_v56, %v456_v14  ;;  %v189_v3 = vld [vmem:[%s633_s4 + $0x18] sm:$0xff]  ;;  %v370_v6 = vld [vmem:[%s638_s7 + $0x10] sm:$0xff] }
  0x14   :  { %v329_v19 = vmul.f32 %v289_v4, %v187_v1  ;;  %v152_v11 = vrot.slane %v144_v17, %v454_v13  ;;  %v291_v22 = vcombine.low %v235_v7, %v239_v18  ;;  %v101_v23 = vrot.slane %v39_v56, %v458_v15  ;;  %v369_v1 = vld [vmem:[%s638_s7 + $0x8] sm:$0xff] }
  0x15   :  { %344 = vst [vmem:[%s635_s8] sm:$0xff] %v340_v8  ;;  %v105_v12 = vrot.slane %v39_v56, %v470_v27  ;;  %v159_v25 = vrot.slane %v145_v20, %v454_v13  ;;  %v298_v26 = vrot.slane %v290_v21, %v454_v13  ;;  %v109_v28 = vrot.slane %v39_v56, %v472_v31  ;;  %v368_v56 = vld [vmem:[%s638_s7] sm:$0xff] }
  0x16   :  { %v333_v24 = vadd.f32 %v329_v19, %v183_v16  ;;  %v305_v30 = vrot.slane %v291_v22, %v454_v13  ;;  %v161_v32 = vcombine.low %v97_v9, %v101_v23  ;;  %v243_v33 = vrot.slane %v498_v50, %v456_v14  ;;  %v339_v9 = vld [vmem:[%s634_s6 + $0x18] sm:$0xff] }
  0x17   :  { %v247_v34 = vrot.slane %v498_v50, %v458_v15  ;;  %v160_v38 = vcombine.low %v152_v11, %v159_v25  ;;  %v162_v40 = vcombine.low %v105_v12, %v109_v28  ;;  %v251_v14 = vrot.slane %v498_v50, %v470_v27  ;;  %v349_v15 = vld [vmem:[%s636_s3 + $0x8] sm:$0xff] }
  0x18   :  { %v341_v37 = vsub.f32 %v333_v24, %v337_v10  ;;  %v306_v41 = vcombine.low %v298_v26, %v305_v30  ;;  %v169_v42 = vrot.slane %v161_v32, %v454_v13  ;;  %v255_v43 = vrot.slane %v498_v50, %v472_v31  ;;  %v358_v50 = vld [vmem:[%s637_s5 + $0x10] sm:$0xff]  ;;  %v371_v10 = vld [vmem:[%s638_s7 + $0x18] sm:$0xff] }
  0x19   :  { %v307_v44 = vcombine.low %v243_v33, %v247_v34  ;;  %v184_v27 = vmul.f32 %v160_v38, %v42_v29  ;;  %v176_v49 = vrot.slane %v162_v40, %v454_v13  ;;  %v352_v51 = vmul.f32 %v348_v35, %v494_v47  ;;  %v338_v47 = vld [vmem:[%s634_s6 + $0x10] sm:$0xff] }
  0x1a   :  { %345 = vst [vmem:[%s635_s8 + $0x8] sm:$0xff] %v341_v37  ;;  %v360_v31 = vmul.f32 %v356_v36, %v496_v48  ;;  %v330_v52 = vmul.f32 %v306_v41, %v188_v39  ;;  %v308_v54 = vcombine.low %v251_v14, %v255_v43  ;;  %v353_v57 = vmul.f32 %v349_v15, %v143_v0 }
  0x1b   :  { %v315_v55 = vrot.slane %v307_v44, %v454_v13  ;;  %v177_v48 = vcombine.low %v169_v42, %v176_v49  ;;  %v361_v59 = vmul.f32 %v357_v45, %v289_v4  ;;  %v354_v60 = vmul.f32 %v350_v46, %v160_v38 }
  0x1c   :  { %v364_v58 = vadd.f32 %v360_v31, %v352_v51  ;;  %v334_v62 = vadd.f32 %v330_v52, %v184_v27  ;;  %v322_v63 = vrot.slane %v308_v54, %v454_v13  ;;  %v362_v0 = vmul.f32 %v358_v50, %v306_v41  ;;  %v359_v13 = vld [vmem:[%s637_s5 + $0x18] sm:$0xff] }
  0x1d   :  { %v185_v2 = vmul.f32 %v177_v48, %v43_v53  ;;  %v365_v4 = vadd.f32 %v361_v59, %v353_v57  ;;  %v355_v17 = vmul.f32 %v351_v61, %v177_v48 }
  0x1e   :  { %v372_v5 = vsub.f32 %v364_v58, %v368_v56  ;;  %v342_v7 = vsub.f32 %v334_v62, %v338_v47  ;;  %v323_v8 = vcombine.low %v315_v55, %v322_v63  ;;  %v366_v16 = vadd.f32 %v362_v0, %v354_v60 }
  0x1f   :  { %v373_v18 = vsub.f32 %v365_v4, %v369_v1 }
  0x20   :  { %376 = vst [vmem:[%s639_s9] sm:$0xff] %v372_v5  ;;  %346 = vst [vmem:[%s635_s8 + $0x10] sm:$0xff] %v342_v7  ;;  %v331_v19 = vmul.f32 %v323_v8, %v189_v3  ;;  %v374_v20 = vsub.f32 %v366_v16, %v370_v6  ;;  %v363_v21 = vmul.f32 %v359_v13, %v323_v8 }
  0x21   :  { %377 = vst [vmem:[%s639_s9 + $0x8] sm:$0xff] %v373_v18 }
  0x22   :  { %v335_v11 = vadd.f32 %v331_v19, %v185_v2  ;;  %378 = vst [vmem:[%s639_s9 + $0x10] sm:$0xff] %v374_v20  ;;  %v367_v22 = vadd.f32 %v363_v21, %v355_v17 }
  0x24   :  { %v343_v23 = vsub.f32 %v335_v11, %v339_v9  ;;  %v375_v12 = vsub.f32 %v367_v22, %v371_v10 }
  0x26   :  { %347 = vst [vmem:[%s635_s8 + $0x18] sm:$0xff] %v343_v23  ;;  %379 = vst [vmem:[%s639_s9 + $0x18] sm:$0xff] %v375_v12 }

// kernel: vssmunet_unrolled_forward.4
= control target key start
LH: loop header
LB: loop body
LE: loop exit
PB: predicated region body
PF: predicated region fallthrough
CT: control target
= control target key end

     0   :  { %s12830_s6 = smov 1   ;;  %s12831_s10 = smov 2   ;;  %s14379_s0 = inlined_call_operand.smem [shape: u32[43], index: -1, kind: input, shape index: {}] }
   0x1   :  { %s12885_s5 = sld [smem:[%s14379_s0]]   ;;  %s12832_s14 = smov 3  }
   0x2   :  { %s12890_s9 = sld [smem:[%s14379_s0 + %s12830_s6]]   ;;  %s12833_s18 = smov 4  }
   0x3   :  { %s12895_s13 = sld [smem:[%s14379_s0 + %s12831_s10]]   ;;  %s12834_s22 = smov 5  }
   0x4   :  { %s12900_s17 = sld [smem:[%s14379_s0 + %s12832_s14]]   ;;  %s12835_s26 = smov 6  }
   0x5   :  { %s12905_s21 = sld [smem:[%s14379_s0 + %s12833_s18]]   ;;  %s12836_s30 = smov 7  }
   0x6   :  { %s12910_s25 = sld [smem:[%s14379_s0 + %s12834_s22]]   ;;  %s12837_s4 = smov 8  }
   0x7   :  { %s12915_s29 = sld [smem:[%s14379_s0 + %s12835_s26]]   ;;  %s12838_s10 = smov 9  }
   0x8   :  { %s12920_s3 = sld [smem:[%s14379_s0 + %s12836_s30]]   ;;  %s12839_s15 = smov 10  }
   0x9   :  { %s12925_s8 = sld [smem:[%s14379_s0 + %s12837_s4]]   ;;  %s12840_s20 = smov 11  }
   0xa   :  { %s12930_s14 = sld [smem:[%s14379_s0 + %s12838_s10]]   ;;  %s12841_s26 = smov 12  }
   0xb   :  { %s12935_s19 = sld [smem:[%s14379_s0 + %s12839_s15]]   ;;  %s12842_s1 = smov 13  }
   0xc   :  { %s12940_s24 = sld [smem:[%s14379_s0 + %s12840_s20]]   ;;  %s12843_s7 = smov 14  }
   0xd   :  { %s12945_s30 = sld [smem:[%s14379_s0 + %s12841_s26]]   ;;  %s12844_s15 = smov 15  }
   0xe   :  { %s12950_s6 = sld [smem:[%s14379_s0 + %s12842_s1]]   ;;  %s12845_s22 = smov 16  }
   0xf   :  { %s12955_s12 = sld [smem:[%s14379_s0 + %s12843_s7]]   ;;  %s12846_s28 = smov 17  }
  0x10   :  { %s12960_s20 = sld [smem:[%s14379_s0 + %s12844_s15]]   ;;  %s12847_s7 = smov 18  }
  0x11   :  { %s12965_s27 = sld [smem:[%s14379_s0 + %s12845_s22]]   ;;  %s12848_s15 = smov 19  }
  0x12   :  { %s12970_s4 = sld [smem:[%s14379_s0 + %s12846_s28]]   ;;  %s12849_s22 = smov 20  }
  0x13   :  { %14404 = sst [smem:[#allocation5_spill]] %s12945_s30  ;;  %s12850_s28 = smov 21  }
  0x14   :  { %14405 = sst [smem:[#allocation6_spill]] %s12950_s6 }
  0x15   :  { %s12975_s6 = sld [smem:[%s14379_s0 + %s12847_s7]]   ;;  %s12851_s7 = smov 22  }
  0x16   :  { %14406 = sst [smem:[#allocation7_spill]] %s12960_s20 }
  0x17   :  { %14407 = sst [smem:[#allocation8_spill]] %s12965_s27 }
  0x18   :  { %14408 = sst [smem:[#allocation9_spill]] %s12970_s4 }
  0x19   :  { %s12980_s20 = sld [smem:[%s14379_s0 + %s12848_s15]]   ;;  %s12852_s15 = smov 23  }
  0x1a   :  { %s12985_s27 = sld [smem:[%s14379_s0 + %s12849_s22]]   ;;  %s12853_s22 = smov 24  }
  0x1b   :  { %14409 = sst [smem:[#allocation10_spill]] %s12975_s6 }
  0x1c   :  { %s12990_s4 = sld [smem:[%s14379_s0 + %s12850_s28]]   ;;  %s12854_s28 = smov 25  }
  0x1d   :  { %s12995_s6 = sld [smem:[%s14379_s0 + %s12851_s7]]   ;;  %s12855_s7 = smov 26  }
  0x1f   :  { %14410 = sst [smem:[#allocation11_spill]] %s12980_s20 }
  0x20   :  { %14411 = sst [smem:[#allocation12_spill]] %s12985_s27 }
  0x21   :  { %s13000_s20 = sld [smem:[%s14379_s0 + %s12852_s15]]   ;;  %s12856_s15 = smov 27  }
  0x22   :  { %14412 = sst [smem:[#allocation13_spill]] %s12990_s4 }
  0x23   :  { %14413 = sst [smem:[#allocation14_spill]] %s12995_s6 }
  0x24   :  { %s13005_s27 = sld [smem:[%s14379_s0 + %s12853_s22]]   ;;  %s12857_s22 = smov 28  }
  0x25   :  { %s13010_s4 = sld [smem:[%s14379_s0 + %s12854_s28]]   ;;  %s12858_s28 = smov 29  }
  0x26   :  { %s13015_s6 = sld [smem:[%s14379_s0 + %s12855_s7]]   ;;  %s12859_s7 = smov 30  }
  0x27   :  { %14414 = sst [smem:[#allocation15_spill]] %s13000_s20 }
  0x28   :  { %s13020_s20 = sld [smem:[%s14379_s0 + %s12856_s15]]   ;;  %s12860_s15 = smov 31  }
  0x2a   :  { %14415 = sst [smem:[#allocation16_spill]] %s13005_s27 }
  0x2b   :  { %14416 = sst [smem:[#allocation17_spill]] %s13010_s4 }
  0x2c   :  { %14417 = sst [smem:[#allocation18_spill]] %s13015_s6 }
  0x2d   :  { %s13025_s27 = sld [smem:[%s14379_s0 + %s12857_s22]]   ;;  %s12861_s22 = smov 32  }
  0x2e   :  { %14418 = sst [smem:[#allocation19_spill]] %s13020_s20 }
  0x2f   :  { %s13030_s4 = sld [smem:[%s14379_s0 + %s12858_s28]]   ;;  %s12862_s28 = smov 33  }
  0x30   :  { %s13035_s6 = sld [smem:[%s14379_s0 + %s12859_s7]]   ;;  %s12863_s7 = smov 34  }
  0x31   :  { %s13040_s20 = sld [smem:[%s14379_s0 + %s12860_s15]]   ;;  %s12864_s15 = smov 35  }
  0x33   :  { %14419 = sst [smem:[#allocation20_spill]] %s13025_s27 }
  0x34   :  { %s13045_s27 = sld [smem:[%s14379_s0 + %s12861_s22]]   ;;  %s12865_s22 = smov 36  }
  0x35   :  { %14420 = sst [smem:[#allocation21_spill]] %s13030_s4 }
  0x36   :  { %14421 = sst [smem:[#allocation22_spill]] %s13035_s6 }
  0x37   :  { %14422 = sst [smem:[#allocation23_spill]] %s13040_s20 }
  0x38   :  { %s13050_s4 = sld [smem:[%s14379_s0 + %s12862_s28]]   ;;  %s12866_s28 = smov 37  }
  0x39   :  { %s13055_s6 = sld [smem:[%s14379_s0 + %s12863_s7]]   ;;  %s12867_s7 = smov 38  }
  0x3a   :  { %14423 = sst [smem:[#allocation24_spill]] %s13045_s27 }
  0x3b   :  { %s13060_s20 = sld [smem:[%s14379_s0 + %s12864_s15]]   ;;  %s12868_s15 = smov 39  }
  0x3c   :  { %s13065_s27 = sld [smem:[%s14379_s0 + %s12865_s22]]   ;;  %s12869_s22 = smov 40  }
  0x3e   :  { %14424 = sst [smem:[#allocation25_spill]] %s13050_s4 }
  0x3f   :  { %14425 = sst [smem:[#allocation26_spill]] %s13055_s6 }
  0x40   :  { %s13070_s4 = sld [smem:[%s14379_s0 + %s12866_s28]]   ;;  %s12870_s28 = smov 41  }
  0x41   :  { %14426 = sst [smem:[#allocation27_spill]] %s13060_s20 }
  0x42   :  { %14427 = sst [smem:[#allocation28_spill]] %s13065_s27 }
  0x43   :  { %s13075_s6 = sld [smem:[%s14379_s0 + %s12867_s7]]   ;;  %s12871_s7 = smov 42  }
  0x44   :  { %s13080_s20 = sld [smem:[%s14379_s0 + %s12868_s15]]  }
  0x45   :  { %s13085_s27 = sld [smem:[%s14379_s0 + %s12869_s22]]  }
  0x46   :  { %14428 = sst [smem:[#allocation29_spill]] %s13070_s4 }
  0x47   :  { %s13090_s4 = sld [smem:[%s14379_s0 + %s12870_s28]]  }
  0x48   :  { %s13095_s30 = sld [smem:[%s14379_s0 + %s12871_s7]]  }
  0x49   :  { %90 = vsyncpa [#allocation3], 0  ;;  %s13097_s15 = smov 0  }
  0x4a LB: > { %s13103_s16 = sadd.s32 4294967295, %s12828_s15   ;;  %p9478_p0 = scmp.ge.s32.totalorder %s12828_s15, 1  ;;  %s12828_s15 = sphi %s13097_s15, %s96_s15  }
  0x4b   : > { %p1014_p1 = scmp.lt.s32.totalorder %s12828_s15, 3  ;;  %p14395_p3 = scmp.eq.s32.totalorder %s13103_s16, 0 }
  0x4c   : > { %s12872_s18 = smov [#allocation2]   ;;  %s12790_s26 = scalar_lea.hbm %s13075_s6, 16 }
  0x4d   : > { %p13107_p2 = pnand %p9478_p0, %p1014_p1  ;;  %s1138_s22 = sshll.u32 %s12872_s18, 4  ;;  %s1139_s22 = int_to_ptr.vmem [resolvable:$true] %s1138_s22 }
  0x4e   : > { %p12791_p6 = scmp.ne.s32.totalorder %s13075_s6, %s12790_s26  ;;  %p12797_p10 = scmp.lt.u32.totalorder %s12790_s26, %s13075_s6 }
  0x4f   : > { %s14429_s0 = scalar_select %p13107_p2, 1, 0 }
  0x50   : > { %p12425_p4 = pneg %p13107_p2 }
  0x52   : > { %p13116_p5 = pnand %p14395_p3, %p12425_p4 }
  0x54   : > { %p12792_p7 = pneg %p13116_p5 }
  0x56   : > { %p12793_p8 = pnand %p12792_p7, %p12791_p6 }
  0x58   : > { %p12794_p9 = pneg %p12793_p8 }
  0x5a   : > { %p12799_p11 = pnand %p12797_p10, %p12794_p9 }
  0x5c   : > { %12802 = shalt.err (!%p12799_p11)
}
  0x5d   : > { %s12803_s28 = scalar_lea.vmem %s1139_s22, 16  ;;  %s12810_s1 = scalar_lea.vmem %s1139_s22, 32 }
  0x5e   : > { %p12804_p12 = scmp.ne.s32.totalorder %s1139_s22, %s12803_s28  ;;  %p12811_p1 = scmp.lt.s32.totalorder %s1139_s22, %s1139_s22 }
  0x5f   : > { %p12812_p4 = scmp.lt.s32.totalorder %s12810_s1, %s12803_s28 }
  0x60   : > { %p12806_p13 = pnand %p12804_p12, %p12792_p7 }
  0x61   : > { %p12813_p3 = por %p12812_p4, %p12811_p1 }
  0x62   : > { %p12807_p0 = pneg %p12806_p13 }
  0x64   : > { %p12814_p2 = pnand %p12813_p3, %p12807_p0 }
  0x66   : > { %12817 = shalt.err (!%p12814_p2)
}
  0x67   : > { %12428 = dma.hbm_to_vmem [thread:$0]  (!%p13116_p5), %s13075_s6, 16, %s1139_s22, [#allocation3]  }
  0x68   : > { %p14431_p6 = scmp.ne.s32.totalorder %s14429_s0, 0 }
  0x69   : > { %p14432_p8 = scmp.eq.s32.totalorder (!%p14431_p6), %s13103_s16, 0 }
  0x6a   : > { %1168 = sbr.rel (%p14431_p6) target bundleno = 8906 (0x22ca), region = 188 }
  0x71   : > { %12823 = dma.done.wait (%p14432_p8), [#allocation3], 16   ;;  %p14433_p9 = pmov %p14432_p8 }
  0x72   : > { %p1270_p7 = scmp.lt.s32.totalorder %s13103_s16, 1  ;;  %vm1289_vm0 = vcmask 261120   ;;  %vm12874_vm3 = vmmov 0   ;;  %vm2509_vm6 = vcmask 130048   ;;  %s14434_s10 = sld [smem:[#allocation5_spill]]  ;;  %vm3236_vm7 = vcmask 64512  }
  0x73   : > { %12825 = vsyncadd (%p14433_p9), [#allocation3], 4294967280  ;;  %s14435_s11 = sld [smem:[#allocation6_spill]]  ;;  %s14436_s0 = sld [smem:[#allocation9_spill]]  ;;  %vm3791_vm8 = vcmask 1043456   ;;  %vm3787_vm9 = vcmask 31744  }
  0x74   : > { %s14461_s16 = smov (!%p1270_p7, %s13103_s16), 1  ;;  %s14437_s18 = sld [smem:[#allocation7_spill]]  ;;  %vm4558_vm10 = vcmask 1041408   ;;  %vm4554_vm11 = vcmask 15360  }
  0x75   : > { %s14397_s2 = sshll.u32 %s14461_s16, 6  ;;  %s14438_s22 = sld [smem:[#allocation8_spill]] }
  0x76   : > { %s13142_s7 = scalar_lea.vmem %s12885_s5, %s14397_s2  ;;  %s14439_s23 = sld [smem:[#allocation12_spill]] }
  0x77   : > { %v1281_v0 = vld [vmem:[%s13142_s7] sm:$0xff]  ;;  %v1283_v1 = vld [vmem:[%s13142_s7 + $0x10] sm:$0xff]  ;;  %v1282_v2 = vld [vmem:[%s13142_s7 + $0x8] sm:$0xff]  ;;  %s14440_s26 = sld [smem:[#allocation10_spill]]  ;;  %s14441_s28 = sld [smem:[#allocation11_spill]] }
  0x78   : > { %v1290_v3 = vsel %vm1289_vm0, %v1281_v0, 0.0  ;;  %v1296_v4 = vsel %vm1289_vm0, %v1283_v1, 0.0  ;;  %v1284_v5 = vld [vmem:[%s13142_s7 + $0x18] sm:$0xff]  ;;  %v1285_v6 = vld [vmem:[%s13142_s7 + $0x20] sm:$0xff]  ;;  %v1286_v7 = vld [vmem:[%s13142_s7 + $0x28] sm:$0xff]  ;;  %v1293_v8 = vsel %vm1289_vm0, %v1282_v2, 0.0 }
  0x79   : > { %1291 = vadd.xlane.f32.xlu0 %v1290_v3  ;;  %1297 = vadd.xlane.f32.xlu1 %v1296_v4  ;;  %v1299_v9 = vsel %vm1289_vm0, %v1284_v5, 0.0  ;;  %v1302_v10 = vsel %vm1289_vm0, %v1285_v6, 0.0  ;;  %v1305_v11 = vsel %vm1289_vm0, %v1286_v7, 0.0  ;;  %v1287_v12 = vld [vmem:[%s13142_s7 + $0x30] sm:$0xff]  ;;  %v1288_v13 = vld [vmem:[%s13142_s7 + $0x38] sm:$0xff]  ;;  %v12782_v38 = vld [vmem:[%s13142_s7 + $0x8] sm:$0xff] }
  0x7a   : > { %v1308_v14 = vsel %vm1289_vm0, %v1287_v12, 0.0  ;;  %v1311_v15 = vsel %vm1289_vm0, %v1288_v13, 0.0  ;;  %v12783_v40 = vld [vmem:[%s13142_s7] sm:$0xff]  ;;  %v12784_v42 = vld [vmem:[%s13142_s7 + $0x18] sm:$0xff]  ;;  %v12785_v44 = vld [vmem:[%s13142_s7 + $0x10] sm:$0xff]  ;;  %s14442_s1 = sld [smem:[#allocation15_spill]] }
  0x7b   : > { %v12786_v46 = vld [vmem:[%s13142_s7 + $0x28] sm:$0xff]  ;;  %v12787_v48 = vld [vmem:[%s13142_s7 + $0x20] sm:$0xff]  ;;  %v12788_v62 = vld [vmem:[%s13142_s7 + $0x38] sm:$0xff]  ;;  %s14448_s2 = sld [smem:[#allocation22_spill]] }
  0x7c   : > { %v12789_v0 = vld [vmem:[%s13142_s7 + $0x30] sm:$0xff]  ;;  %v13219_v6 = vld [vmem:[%s12890_s9] sm:$0xff]  ;;  %s14443_s7 = sld [smem:[#allocation13_spill]] }
  0x7d   : > { %1294 = vadd.xlane.f32.xlu0 %v1293_v8  ;;  %1300 = vadd.xlane.f32.xlu1 %v1299_v9  ;;  %v13222_v7 = vld [vmem:[%s12890_s9 + $0x10] sm:$0xff] }
  0x7e   : > { %10891 = vmatprep.mubr.msk.f32.mxu0 %vm1289_vm0, %v13219_v6  ;;  %10902 = vmatprep.mubr.msk.f32.mxu1 %vm1289_vm0, %v13222_v7 }
  0x81   : > { %1303 = vadd.xlane.f32.xlu0 %v1302_v10  ;;  %1306 = vadd.xlane.f32.xlu1 %v1305_v11 }
  0x85   : > { %1309 = vadd.xlane.f32.xlu0 %v1308_v14  ;;  %1312 = vadd.xlane.f32.xlu1 %v1311_v15 }
 0x106   : > { %v1292_v16 = vpop.xlane.xlu0 %1291  ;;  %v1298_v17 = vpop.xlane.xlu1 %1297 }
 0x10a   : > { %v1295_v18 = vpop.xlane.xlu0 %1294  ;;  %v1301_v19 = vpop.xlane.xlu1 %1300 }
 0x10b   : > { %v1314_v20 = vadd.f32 %v1295_v18, %v1292_v16 }
 0x10d   : > { %v1315_v21 = vadd.f32 %v1314_v20, %v1298_v17 }
 0x10e   : > { %v1304_v22 = vpop.xlane.xlu0 %1303  ;;  %v1307_v23 = vpop.xlane.xlu1 %1306 }
 0x10f   : > { %v1316_v24 = vadd.f32 %v1315_v21, %v1301_v19 }
 0x111   : > { %v1317_v25 = vadd.f32 %v1316_v24, %v1304_v22 }
 0x112   : > { %v1310_v26 = vpop.xlane.xlu0 %1309  ;;  %v1313_v28 = vpop.xlane.xlu1 %1312 }
 0x113   : > { %v1318_v27 = vadd.f32 %v1317_v25, %v1307_v23 }
 0x115   : > { %v1319_v29 = vadd.f32 %v1318_v27, %v1310_v26 }
 0x117   : > { %v1320_v30 = vadd.f32 %v1319_v29, %v1313_v28 }
 0x119   : > { %v1321_v31 = vrot.slane %v1320_v30, 4 }
 0x11b   : > { %v1322_v32 = vadd.f32 %v1321_v31, %v1320_v30 }
 0x11d   : > { %v1323_v33 = vrot.slane %v1322_v32, 2 }
 0x11f   : > { %v1324_v34 = vadd.f32 %v1323_v33, %v1322_v32 }
 0x121   : > { %v1325_v35 = vrot.slane %v1324_v34, 1 }
 0x123   : > { %v1326_v36 = vadd.f32 %v1325_v35, %v1324_v34 }
 0x125   : > { %v13160_v37 = vmul.f32 0.00048828125, %v1326_v36 }
 0x127   : > { %v13164_v39 = vsub.f32 %v12782_v38, %v13160_v37  ;;  %v13168_v41 = vsub.f32 %v12783_v40, %v13160_v37  ;;  %v13172_v43 = vsub.f32 %v12784_v42, %v13160_v37  ;;  %v13176_v45 = vsub.f32 %v12785_v44, %v13160_v37  ;;  %v12486_v44 = vld [vmem:[%s12895_s13 + $0x20] sm:$0xff]  }
 0x128   : > { %v13180_v47 = vsub.f32 %v12786_v46, %v13160_v37  ;;  %v13184_v49 = vsub.f32 %v12787_v48, %v13160_v37  ;;  %v13206_v63 = vsub.f32 %v12788_v62, %v13160_v37  ;;  %v13210_v1 = vsub.f32 %v12789_v0, %v13160_v37  ;;  %v12487_v48 = vld [vmem:[%s12895_s13 + $0x28] sm:$0xff]  }
 0x129   : > { %v1337_v50 = vmul.f32 %v13164_v39, %v13164_v39  ;;  %v1336_v51 = vmul.f32 %v13168_v41, %v13168_v41  ;;  %v1339_v52 = vmul.f32 %v13172_v43, %v13172_v43  ;;  %v1338_v53 = vmul.f32 %v13176_v45, %v13176_v45  ;;  %v9504_v0 = vld [vmem:[%s12890_s9 + $0x28] sm:$0xff] }
 0x12a   : > { %v1341_v54 = vmul.f32 %v13180_v47, %v13180_v47  ;;  %v1340_v55 = vmul.f32 %v13184_v49, %v13184_v49  ;;  %v1343_v2 = vmul.f32 %v13206_v63, %v13206_v63  ;;  %v1342_v3 = vmul.f32 %v13210_v1, %v13210_v1 }
 0x12b   : > { %v1347_v56 = vsel %vm1289_vm0, %v1337_v50, 0.0  ;;  %v1344_v57 = vsel %vm1289_vm0, %v1336_v51, 0.0  ;;  %v1353_v58 = vsel %vm1289_vm0, %v1339_v52, 0.0  ;;  %v1350_v59 = vsel %vm1289_vm0, %v1338_v53, 0.0  ;;  %v12489_v50 = vld [vmem:[%s12895_s13 + $0x8] sm:$0xff]  }
 0x12c   : > { %1348 = vadd.xlane.f32.xlu1 %v1347_v56  ;;  %1345 = vadd.xlane.f32.xlu0 %v1344_v57  ;;  %v1359_v60 = vsel %vm1289_vm0, %v1341_v54, 0.0  ;;  %v1356_v61 = vsel %vm1289_vm0, %v1340_v55, 0.0  ;;  %v1365_v4 = vsel %vm1289_vm0, %v1343_v2, 0.0  ;;  %v1362_v5 = vsel %vm1289_vm0, %v1342_v3, 0.0  ;;  %v9503_v57 = vld [vmem:[%s12890_s9 + $0x20] sm:$0xff]  ;;  %v2263_v2 = vld [vmem:[%s12905_s21 + $0x8] sm:$0xff] }
 0x12d   : > { %v12873_v46 = vmov 0.0  }
 0x130   : > { %1354 = vadd.xlane.f32.xlu1 %v1353_v58  ;;  %1351 = vadd.xlane.f32.xlu0 %v1350_v59 }
 0x134   : > { %1360 = vadd.xlane.f32.xlu1 %v1359_v60  ;;  %1357 = vadd.xlane.f32.xlu0 %v1356_v61 }
 0x138   : > { %1366 = vadd.xlane.f32.xlu1 %v1365_v4  ;;  %1363 = vadd.xlane.f32.xlu0 %v1362_v5 }
 0x1b9   : > { %v1349_v8 = vpop.xlane.xlu1 %1348  ;;  %v1346_v9 = vpop.xlane.xlu0 %1345 }
 0x1ba   : > { %v1368_v10 = vadd.f32 %v1349_v8, %v1346_v9 }
 0x1bd   : > { %v1355_v11 = vpop.xlane.xlu1 %1354  ;;  %v1352_v12 = vpop.xlane.xlu0 %1351 }
 0x1be   : > { %v1369_v13 = vadd.f32 %v1368_v10, %v1352_v12 }
 0x1c0   : > { %v1370_v14 = vadd.f32 %v1369_v13, %v1355_v11 }
 0x1c1   : > { %v1361_v15 = vpop.xlane.xlu1 %1360  ;;  %v1358_v16 = vpop.xlane.xlu0 %1357 }
 0x1c2   : > { %v1371_v17 = vadd.f32 %v1370_v14, %v1358_v16  ;;  %v12492_v16 = vld [vmem:[%s12895_s13 + $0x10] sm:$0xff]  }
 0x1c4   : > { %v1372_v18 = vadd.f32 %v1371_v17, %v1361_v15 }
 0x1c5   : > { %v1364_v19 = vpop.xlane.xlu0 %1363  ;;  %v1367_v21 = vpop.xlane.xlu1 %1366 }
 0x1c6   : > { %v1373_v20 = vadd.f32 %v1372_v18, %v1364_v19  ;;  %v12493_v18 = vld [vmem:[%s12895_s13 + $0x18] sm:$0xff]  }
 0x1c8   : > { %v1374_v22 = vadd.f32 %v1373_v20, %v1367_v21  ;;  %v12494_v21 = vld [vmem:[%s12895_s13 + $0x30] sm:$0xff]  }
 0x1ca   : > { %v1375_v23 = vrot.slane %v1374_v22, 4 }
 0x1cc   : > { %v1376_v24 = vadd.f32 %v1375_v23, %v1374_v22  ;;  %v12495_v23 = vld [vmem:[%s12895_s13 + $0x38] sm:$0xff]  }
 0x1ce   : > { %v1377_v25 = vrot.slane %v1376_v24, 2 }
 0x1d0   : > { %v1378_v26 = vadd.f32 %v1377_v25, %v1376_v24 }
 0x1d2   : > { %v1379_v27 = vrot.slane %v1378_v26, 1 }
 0x1d4   : > { %v1380_v28 = vadd.f32 %v1379_v27, %v1378_v26  ;;  %v12496_v26 = vld [vmem:[%s12895_s13 + $0x50] sm:$0xff]  }
 0x1d6   : > { %v1381_v29 = vmul.f32 0.0004885198, %v1380_v28  ;;  %v12497_v28 = vld [vmem:[%s12895_s13 + $0x58] sm:$0xff]  }
 0x1d8   : > { %12762 = vrsqrt.f32 %v1381_v29  ;;  %vm1384_vm1 = vcmp.eq.f32.partialorder %v1381_v29, inf  ;;  %v1387_v38 = vand.u32 2147483648, %v1381_v29  ;;  %vm1386_vm2 = vcmp.eq.f32.partialorder %v1381_v29, 0.0 }
 0x1e2   : > { %v12763_v30 = vpop.eup %12762 }
 0x1e3   : > { %v1390_v31 = vmul.f32 %v12763_v30, %v13168_v41  ;;  %v1391_v32 = vmul.f32 %v12763_v30, %v13164_v39  ;;  %v1392_v33 = vmul.f32 %v12763_v30, %v13176_v45  ;;  %v1393_v34 = vmul.f32 %v12763_v30, %v13172_v43  ;;  %v1399_v41 = vld [vmem:[%s12890_s9 + $0x8] sm:$0xff]  ;;  %v9490_v43 = vld [vmem:[%s12890_s9 + $0x18] sm:$0xff]  ;;  %v12488_v45 = vld [vmem:[%s12895_s13] sm:$0xff]  }
 0x1e4   : > { %v1383_v36 = vmul.f32 %v12763_v30, %v1381_v29  ;;  %v1394_v58 = vmul.f32 %v12763_v30, %v13184_v49  ;;  %v1395_v59 = vmul.f32 %v12763_v30, %v13180_v47  ;;  %v1396_v61 = vmul.f32 %v12763_v30, %v13210_v1  ;;  %v12490_v47 = vld [vmem:[%s12895_s13 + $0x40] sm:$0xff]  }
 0x1e5   : > { %v12132_v35 = vpack.c.bf16 %v1391_v32, %v1390_v31  ;;  %v12136_v40 = vpack.c.bf16 %v1393_v34, %v1392_v33  ;;  %v1397_v62 = vmul.f32 %v12763_v30, %v13206_v63  ;;  %v12491_v63 = vld [vmem:[%s12895_s13 + $0x48] sm:$0xff]   ;;  %v2262_v1 = vld [vmem:[%s12905_s21] sm:$0xff]  ;;  %v2264_v32 = vld [vmem:[%s12905_s21 + $0x10] sm:$0xff] }
 0x1e6   : > { %v1385_v42 = vsel %vm1384_vm1, %v1381_v29, %v1383_v36  ;;  %v12156_v60 = vpack.c.bf16 %v1395_v59, %v1394_v58  ;;  %v12180_v3 = vpack.c.bf16 %v2263_v2, %v2262_v1  ;;  %v2265_v33 = vld [vmem:[%s12905_s21 + $0x18] sm:$0xff]  ;;  %v2267_v36 = vld [vmem:[%s12905_s21 + $0x28] sm:$0xff] }
 0x1e7   : > { %12133 = vmatprep.subr.bf16.mxu0 %v12132_v35  ;;  %12141 = vmatprep.subr.bf16.mxu1 %v12132_v35  ;;  %v13232_v39 = vsel %vm1386_vm2, %v1387_v38, %v1385_v42  ;;  %v12160_v49 = vpack.c.bf16 %v1397_v62, %v1396_v61  ;;  %v12184_v34 = vpack.c.bf16 %v2265_v33, %v2264_v32  ;;  %v2269_v42 = vld [vmem:[%s12905_s21 + $0x38] sm:$0xff] }
 0x1e8   : > { %12135 = vmatpush3.bf16.msra.mxu0 %v12132_v35  ;;  %12143 = vmatpush3.bf16.msra.mxu1 %v12132_v35 }
 0x1e9   : > { %12137 = vmatprep.subr.bf16.mxu0 %v12136_v40  ;;  %12145 = vmatprep.subr.bf16.mxu1 %v12136_v40 }
 0x1ec   : > { %12139 = vmatpush3.bf16.msra.mxu0 %v12136_v40  ;;  %12147 = vmatpush3.bf16.msra.mxu1 %v12136_v40 }
 0x1ed   : > { %10905 = vmatprep.subr.bf16.mxu0 %v12873_v46  ;;  %10913 = vmatprep.subr.bf16.mxu1 %v12873_v46 }
 0x1ef   : > { %10892 = vmatmul.mubr.msk.f32.vlgmr.msra.gmra.mrb[0].mxu0 %vm1289_vm0, %v1399_v41  ;;  %10903 = vmatmul.mubr.msk.f32.vlgmr.msra.gmra.mrb[0].mxu1 %vm1289_vm0, %v9490_v43 }
 0x1f0   : > { %10906 = vmatpush3.bf16.msra.mxu0 %v12486_v44  ;;  %10914 = vmatpush3.bf16.msra.mxu1 %v12488_v45  ;;  %v2271_v44 = vld [vmem:[%s12905_s21 + $0x48] sm:$0xff] }
 0x1f1   : > { %10907 = vmatprep.subr.bf16.mxu0 %v12873_v46  ;;  %10915 = vmatprep.subr.bf16.mxu1 %v12873_v46 }
 0x1f2   : > { %10909 = vmatprep.mubr.msk.bf16.mxu0 %vm12874_vm3, %v12873_v46  ;;  %10917 = vmatprep.mubr.msk.bf16.mxu1 %vm12874_vm3, %v12873_v46 }
 0x1f4   : > { %10908 = vmatpush3.bf16.msra.mxu0 %v12487_v48  ;;  %10916 = vmatpush3.bf16.msra.mxu1 %v12489_v50  ;;  %v2272_v48 = vld [vmem:[%s12905_s21 + $0x50] sm:$0xff]  ;;  %v2273_v50 = vld [vmem:[%s12905_s21 + $0x58] sm:$0xff] }
 0x1f5   : > { %12149 = vmatprep.subr.bf16.mxu0 %v12132_v35  ;;  %10932 = vmatprep.subr.bf16.mxu1 %v12873_v46 }
 0x2c2   : > { %v10893_v51 = vpop.f32.mrb[0].mxu0  ;;  %v10904_v52 = vpop.f32.mrb[0].mxu1 }
 0x2c3   : > { %v1472_v53 = vpop.f32.mrb[1].mxu0  ;;  %v1561_v54 = vpop.f32.mrb[1].mxu1 }
 0x2c4   : > { %v1481_v55 = vpack.c.bf16 %v10893_v51, %v1472_v53  ;;  %v1570_v56 = vpack.c.bf16 %v10904_v52, %v1561_v54  ;;  %v12200_v51 = vpack.c.bf16 %v2273_v50, %v2272_v48  ;;  %v2274_v52 = vld [vmem:[%s12905_s21 + $0x60] sm:$0xff]  ;;  %v2275_v53 = vld [vmem:[%s12905_s21 + $0x68] sm:$0xff] }
 0x2c5   : > { %v12204_v54 = vpack.c.bf16 %v2275_v53, %v2274_v52 }
 0x2c6   : > { %10910 = vmatmul.mubr.msk.bf16.vlgmr.msra.gmra.mrb[4].mxu0 %vm1289_vm0, %v1570_v56  ;;  %10918 = vmatmul.mubr.msk.bf16.vlgmr.msra.gmra.mrb[4].mxu1 %vm1289_vm0, %v1481_v55  ;;  %v2276_v55 = vld [vmem:[%s12905_s21 + $0x70] sm:$0xff]  ;;  %v2277_v56 = vld [vmem:[%s12905_s21 + $0x78] sm:$0xff] }
 0x2c7   : > { %12151 = vmatpush3.bf16.msra.mxu0 %v12132_v35  ;;  %10929 = vmatprep.mubr.msk.f32.mxu0 %vm1289_vm0, %v9503_v57  ;;  %v2266_v35 = vld [vmem:[%s12905_s21 + $0x20] sm:$0xff] }
 0x2c8   : > { %12153 = vmatprep.subr.bf16.mxu0 %v12136_v40  ;;  %10936 = vmatprep.mubr.msk.bf16.mxu1 %vm12874_vm3, %v12873_v46  ;;  %v12188_v38 = vpack.c.bf16 %v2267_v36, %v2266_v35  ;;  %v9543_v35 = vld [vmem:[%s12915_s29] ss:$0 sm:$0xff] }
 0x2c9   : > { %10933 = vmatpush3.bf16.msra.mxu1 %v12490_v47 }
 0x2ca   : > { %10934 = vmatprep.subr.bf16.mxu1 %v12873_v46 }
 0x2cb   : > { %12155 = vmatpush3.bf16.msra.mxu0 %v12136_v40  ;;  %v2268_v40 = vld [vmem:[%s12905_s21 + $0x30] sm:$0xff] }
 0x2cc   : > { %12157 = vmatprep.subr.bf16.mxu0 %v12156_v60 }
 0x2cd   : > { %10935 = vmatpush3.bf16.msra.mxu1 %v12491_v63 }
 0x2ce   : > { %10930 = vmatmul.mubr.msk.f32.vlgmr.msra.gmra.mrb[2].mxu0 %vm1289_vm0, %v9504_v0  ;;  %10951 = vmatprep.subr.bf16.mxu1 %v12873_v46 }
 0x2cf   : > { %12159 = vmatpush3.bf16.msra.mxu0 %v12156_v60  ;;  %10948 = vmatprep.mubr.msk.f32.mxu0 %vm1289_vm0, %v13219_v6 }
 0x2d0   : > { %12161 = vmatprep.subr.bf16.mxu0 %v12160_v49 }
 0x2d3   : > { %12163 = vmatpush3.bf16.msra.mxu0 %v12160_v49 }
 0x2d4   : > { %12165 = vmatprep.subr.bf16.mxu0 %v12156_v60 }
 0x2d6   : > { %10949 = vmatmul.mubr.msk.f32.vlgmr.msra.gmra.mrb[8].mxu0 %vm1289_vm0, %v1399_v41  ;;  %v12192_v41 = vpack.c.bf16 %v2269_v42, %v2268_v40 }
 0x2d7   : > { %12167 = vmatpush3.bf16.msra.mxu0 %v12156_v60  ;;  %10967 = vmatprep.mubr.msk.f32.mxu0 %vm1289_vm0, %v13222_v7 }
 0x2d8   : > { %12169 = vmatprep.subr.bf16.mxu0 %v12160_v49 }
 0x2db   : > { %12171 = vmatpush3.bf16.msra.mxu0 %v12160_v49 }
 0x2dc   : > { %12173 = vmatprep.subr.bf16.mxu0 %v12156_v60 }
 0x2de   : > { %10968 = vmatmul.mubr.msk.f32.vlgmr.msra.gmra.mrb[10].mxu0 %vm1289_vm0, %v9490_v43  ;;  %v2270_v43 = vld [vmem:[%s12905_s21 + $0x40] sm:$0xff] }
 0x2df   : > { %12175 = vmatpush3.bf16.msra.mxu0 %v12156_v60  ;;  %10986 = vmatprep.mubr.msk.f32.mxu0 %vm1289_vm0, %v9503_v57  ;;  %v12196_v45 = vpack.c.bf16 %v2271_v44, %v2270_v43  ;;  %v12208_v57 = vpack.c.bf16 %v2277_v56, %v2276_v55 }
 0x2e0   : > { %12177 = vmatprep.subr.bf16.mxu0 %v12160_v49 }
 0x2e3   : > { %12179 = vmatpush3.bf16.msra.mxu0 %v12160_v49 }
 0x2e4   : > { %12181 = vmatprep.subr.bf16.mxu0 %v12180_v3 }
 0x2e6   : > { %10987 = vmatmul.mubr.msk.f32.vlgmr.msra.gmra.mrb[12].mxu0 %vm1289_vm0, %v9504_v0 }
 0x2e7   : > { %12183 = vmatpush3.bf16.msra.mxu0 %v12180_v3 }
 0x2e8   : > { %12185 = vmatprep.subr.bf16.mxu0 %v12184_v34 }
 0x2eb   : > { %12187 = vmatpush3.bf16.msra.mxu0 %v12184_v34 }
 0x2ec   : > { %12189 = vmatprep.subr.bf16.mxu0 %v12188_v38 }
 0x2ef   : > { %12191 = vmatpush3.bf16.msra.mxu0 %v12188_v38 }
 0x2f0   : > { %12193 = vmatprep.subr.bf16.mxu0 %v12192_v41 }
 0x2f3   : > { %12195 = vmatpush3.bf16.msra.mxu0 %v12192_v41 }
 0x2f4   : > { %12197 = vmatprep.subr.bf16.mxu0 %v12196_v45 }
 0x2f7   : > { %12199 = vmatpush3.bf16.msra.mxu0 %v12196_v45 }
 0x2f8   : > { %12201 = vmatprep.subr.bf16.mxu0 %v12200_v51 }
 0x2fb   : > { %12203 = vmatpush3.bf16.msra.mxu0 %v12200_v51 }
 0x2fc   : > { %12205 = vmatprep.subr.bf16.mxu0 %v12204_v54 }
 0x2ff   : > { %12207 = vmatpush3.bf16.msra.mxu0 %v12204_v54 }
 0x300   : > { %12209 = vmatprep.subr.bf16.mxu0 %v12208_v57 }
 0x303   : > { %12211 = vmatpush3.bf16.msra.mxu0 %v12208_v57 }
 0x399   : > { %v1625_v4 = vpop.f32.mrb[4].mxu0  ;;  %v1681_v5 = vpop.f32.mrb[4].mxu1 }
 0x39a   : > { %v13277_v6 = vadd.f32 %v1681_v5, %v1625_v4  ;;  %v10911_v7 = vpop.f32.mrb[5].mxu0  ;;  %v10919_v8 = vpop.f32.mrb[5].mxu1 }
 0x39b   : > { %v1628_v9 = vpop.f32.mrb[6].mxu0  ;;  %v1684_v10 = vpop.f32.mrb[6].mxu1 }
 0x39c   : > { %v13279_v11 = vadd.f32 %v1684_v10, %v1628_v9  ;;  %v10912_v12 = vpop.f32.mrb[7].mxu0  ;;  %v10920_v13 = vpop.f32.mrb[7].mxu1 }
 0x3a1   : > { %v10931_v14 = vpop.f32.mrb[2].mxu0 }
 0x3a2   : > { %v1763_v15 = vpop.f32.mrb[3].mxu0 }
 0x3a3   : > { %v1772_v17 = vpack.c.bf16 %v10931_v14, %v1763_v15 }
 0x3a5   : > { %10937 = vmatmul.mubr.msk.bf16.vlgmr.msra.gmra.mrb[8].mxu1 %vm1289_vm0, %v1772_v17 }
 0x3a6   : > { %10952 = vmatpush3.bf16.msra.mxu1 %v12492_v16  ;;  %10955 = vmatprep.mubr.msk.bf16.mxu1 %vm12874_vm3, %v12873_v46 }
 0x3a7   : > { %10953 = vmatprep.subr.bf16.mxu1 %v12873_v46 }
 0x3a9   : > { %v10950_v19 = vpop.f32.mrb[8].mxu0 }
 0x3aa   : > { %v1902_v20 = vpop.f32.mrb[9].mxu0  ;;  %10954 = vmatpush3.bf16.msra.mxu1 %v12493_v18 }
 0x3ab   : > { %v1911_v22 = vpack.c.bf16 %v10950_v19, %v1902_v20  ;;  %10970 = vmatprep.subr.bf16.mxu1 %v12873_v46 }
 0x3ad   : > { %10956 = vmatmul.mubr.msk.bf16.vlgmr.msra.gmra.mrb[12].mxu1 %vm1289_vm0, %v1911_v22 }
 0x3ae   : > { %10971 = vmatpush3.bf16.msra.mxu1 %v12494_v21  ;;  %10974 = vmatprep.mubr.msk.bf16.mxu1 %vm12874_vm3, %v12873_v46 }
 0x3af   : > { %10972 = vmatprep.subr.bf16.mxu1 %v12873_v46 }
 0x3b1   : > { %v10969_v24 = vpop.f32.mrb[10].mxu0 }
 0x3b2   : > { %v2041_v25 = vpop.f32.mrb[11].mxu0  ;;  %10973 = vmatpush3.bf16.msra.mxu1 %v12495_v23 }
 0x3b3   : > { %v2050_v27 = vpack.c.bf16 %v10969_v24, %v2041_v25  ;;  %10989 = vmatprep.subr.bf16.mxu1 %v12873_v46  ;;  %v12875_v25 = vmov 0.0|0.0  }
 0x3b4   : > { %12244 = vmatprep.subr.bf16.mxu0 %v12875_v25 }
 0x3b5   : > { %10975 = vmatmul.mubr.msk.bf16.vlgmr.msra.gmra.mrb[16].mxu1 %vm1289_vm0, %v2050_v27 }
 0x3b6   : > { %10990 = vmatpush3.bf16.msra.mxu1 %v12496_v26  ;;  %10993 = vmatprep.mubr.msk.bf16.mxu1 %vm12874_vm3, %v12873_v46 }
 0x3b7   : > { %10991 = vmatprep.subr.bf16.mxu1 %v12873_v46 }
 0x3b9   : > { %v10988_v29 = vpop.f32.mrb[12].mxu0 }
 0x3ba   : > { %v2180_v30 = vpop.f32.mrb[13].mxu0  ;;  %10992 = vmatpush3.bf16.msra.mxu1 %v12497_v28 }
 0x3bb   : > { %v2189_v31 = vpack.c.bf16 %v10988_v29, %v2180_v30  ;;  %12213 = vmatprep.subr.bf16.mxu1 %v12180_v3 }
 0x3bd   : > { %10994 = vmatmul.mubr.msk.bf16.vlgmr.msra.gmra.mrb[20].mxu1 %vm1289_vm0, %v2189_v31  ;;  %v9542_v31 = vld [vmem:[%s12910_s25] ss:$0 sm:$0xff] }
 0x3be   : > { %12215 = vmatpush3.bf16.msra.mxu1 %v12180_v3 }
 0x3bf   : > { %12217 = vmatprep.subr.bf16.mxu1 %v12184_v34 }
 0x3c2   : > { %12219 = vmatpush3.bf16.msra.mxu1 %v12184_v34 }
 0x3c3   : > { %12221 = vmatprep.subr.bf16.mxu1 %v12188_v38 }
 0x3c6   : > { %12223 = vmatpush3.bf16.msra.mxu1 %v12188_v38 }
 0x3c7   : > { %12225 = vmatprep.subr.bf16.mxu1 %v12192_v41 }
 0x3ca   : > { %12227 = vmatpush3.bf16.msra.mxu1 %v12192_v41 }
 0x3cb   : > { %12229 = vmatprep.subr.bf16.mxu1 %v12196_v45 }
 0x3ce   : > { %12231 = vmatpush3.bf16.msra.mxu1 %v12196_v45 }
 0x3cf   : > { %12233 = vmatprep.subr.bf16.mxu1 %v12200_v51 }
 0x3d2   : > { %12235 = vmatpush3.bf16.msra.mxu1 %v12200_v51 }
 0x3d3   : > { %12237 = vmatprep.subr.bf16.mxu1 %v12204_v54 }
 0x3d6   : > { %12239 = vmatpush3.bf16.msra.mxu1 %v12204_v54 }
 0x3d7   : > { %12241 = vmatprep.subr.bf16.mxu1 %v12208_v57 }
 0x3da   : > { %12243 = vmatpush3.bf16.msra.mxu1 %v12208_v57 }
 0x3db   : > { %12247 = vmatprep.subr.bf16.mxu1 %v12875_v25 }
 0x478   : > { %v1827_v58 = vpop.f32.mrb[8].mxu1 }
 0x479   : > { %v1834_v59 = vadd.f32 %v1827_v58, %v13277_v6  ;;  %v10938_v60 = vpop.f32.mrb[9].mxu1  ;;  %v9541_v6 = vld [vmem:[%s12900_s17] ss:$0 sm:$0xff] }
 0x47a   : > { %v1830_v61 = vpop.f32.mrb[10].mxu1 }
 0x47b   : > { %v1835_v62 = vadd.f32 %v1830_v61, %v13279_v11  ;;  %v10939_v0 = vpop.f32.mrb[11].mxu1 }
 0x480   : > { %v1966_v49 = vpop.f32.mrb[12].mxu1 }
 0x481   : > { %v1973_v47 = vadd.f32 %v1966_v49, %v1834_v59  ;;  %v10957_v63 = vpop.f32.mrb[13].mxu1 }
 0x482   : > { %v1969_v1 = vpop.f32.mrb[14].mxu1 }
 0x483   : > { %v1974_v2 = vadd.f32 %v1969_v1, %v1835_v62  ;;  %v10958_v3 = vpop.f32.mrb[15].mxu1 }
 0x488   : > { %v2105_v4 = vpop.f32.mrb[16].mxu1 }
 0x489   : > { %v2112_v5 = vadd.f32 %v2105_v4, %v1973_v47  ;;  %v10976_v7 = vpop.f32.mrb[17].mxu1 }
 0x48a   : > { %v2108_v8 = vpop.f32.mrb[18].mxu1 }
 0x48b   : > { %v2113_v9 = vadd.f32 %v2108_v8, %v1974_v2  ;;  %v10977_v10 = vpop.f32.mrb[19].mxu1 }
 0x490   : > { %v2244_v12 = vpop.f32.mrb[20].mxu1 }
 0x491   : > { %v2251_v13 = vadd.f32 %v2244_v12, %v2112_v5  ;;  %v10995_v14 = vpop.f32.mrb[21].mxu1 }
 0x492   : > { %v2247_v15 = vpop.f32.mrb[22].mxu1 }
 0x493   : > { %v2260_v16 = vadd.f32 %v9541_v6, %v2251_v13  ;;  %v2252_v11 = vadd.f32 %v2247_v15, %v2113_v9  ;;  %v10996_v17 = vpop.f32.mrb[23].mxu1 }
 0x495   : > { %v2261_v18 = vadd.f32 %v9541_v6, %v2252_v11  ;;  %11029 = vmatprep.mubr.f32.mxu0 %v2260_v16 }
 0x497   : > { %11030 = vmatmul.mubr.f32.vlgmr.msra.gmra.mrb[14].mxu0 %v2261_v18 }
 0x498   : > { %11071 = vmatprep.mubr.msk.f32.mxu0 %vm12874_vm3, %v12873_v46 }
 0x56a   : > { %v11031_v19 = vpop.f32.mrb[14].mxu0 }
 0x56b   : > { %v2354_v20 = vsub.f32 %v2261_v18, %v11031_v19  ;;  %v2344_v21 = vpop.f32.mrb[15].mxu0  ;;  %v12876_v18 = vmov -1.0  }
 0x56c   : > { %v2353_v22 = vsub.f32 %v2260_v16, %v2344_v21 }
 0x56d   : > { %v2356_v24 = vmul.f32 %v2354_v20, %v2354_v20 }
 0x56e   : > { %v2355_v23 = vmul.f32 %v2353_v22, %v2353_v22 }
 0x570   : > { %11064 = vmatprep.mubr.f32.mxu1 %v2355_v23 }
 0x571   : > { %11065 = vmatmul.mubr.f32.vlgmr.msra.gmra.mrb[2].mxu1 %v2356_v24 }
 0x572   : > { %11078 = vmatprep.mubr.msk.f32.mxu1 %vm12874_vm3, %v12873_v46 }
 0x644   : > { %v11066_v26 = vpop.f32.mrb[2].mxu1 }
 0x645   : > { %v2429_v27 = vadd.f32 1e-05, %v11066_v26  ;;  %v2423_v28 = vpop.f32.mrb[3].mxu1 }
 0x646   : > { %v2424_v29 = vadd.f32 1e-05, %v2423_v28 }
 0x647   : > { %12764 = vrsqrt.f32 %v2429_v27 }
 0x648   : > { %12766 = vrsqrt.f32 %v2424_v29 }
 0x651   : > { %v12765_v30 = vpop.eup %12764 }
 0x652   : > { %v12767_v32 = vpop.eup %12766  ;;  %v2435_v33 = vmul.f32 %v12765_v30, %v2354_v20 }
 0x653   : > { %v2434_v34 = vmul.f32 %v12767_v32, %v2353_v22  ;;  %v2508_v32 = vld [vmem:[%s12920_s3] sm:$0xff] }
 0x654   : > { %v2444_v36 = vmul.f32 %v9542_v31, %v2435_v33  ;;  %v9545_v33 = vld [vmem:[%s12920_s3 + $0x8] sm:$0xff] }
 0x655   : > { %v2443_v38 = vmul.f32 %v9542_v31, %v2434_v34  ;;  %v12498_v34 = vld [vmem:[%s12925_s8 + $0x40] sm:$0xff]  }
 0x656   : > { %v2453_v40 = vadd.f32 %v9543_v35, %v2444_v36  ;;  %v12500_v36 = vld [vmem:[%s12925_s8 + $0x48] sm:$0xff]  }
 0x657   : > { %v2452_v42 = vadd.f32 %v9543_v35, %v2443_v38  ;;  %v12499_v35 = vld [vmem:[%s12925_s8] sm:$0xff]   ;;  %v12501_v38 = vld [vmem:[%s12925_s8 + $0x8] sm:$0xff]  }
 0x658   : > { %v2457_v41 = vmul.f32 0.70710677, %v2453_v40  ;;  %v2455_v24 = vmul.f32 0.5, %v2453_v40  ;;  %v12502_v40 = vld [vmem:[%s12925_s8 + $0x50] sm:$0xff]  }
 0x659   : > { %v2456_v43 = vmul.f32 0.70710677, %v2452_v42  ;;  %v2454_v27 = vmul.f32 0.5, %v2452_v42  ;;  %v12503_v42 = vld [vmem:[%s12925_s8 + $0x10] sm:$0xff]  }
 0x65a   : > { %v2463_v44 = vand.u32 2147483647, %v2457_v41  ;;  %vm2459_vm4 = vcmp.ge.f32.partialorder %v2457_v41, 0.0  ;;  %v12504_v41 = vld [vmem:[%s12925_s8 + $0x58] sm:$0xff]  }
 0x65b   : > { %v2462_v45 = vand.u32 2147483647, %v2456_v43  ;;  %vm2458_vm5 = vcmp.ge.f32.partialorder %v2456_v43, 0.0  ;;  %v2461_v19 = vsel %vm2459_vm4, 1.0, %v12876_v18  ;;  %v12505_v43 = vld [vmem:[%s12925_s8 + $0x18] sm:$0xff]  }
 0x65c   : > { %v2465_v48 = vmul.f32 0.3275911, %v2463_v44  ;;  %v2491_v53 = vsub.f32 0.0, %v2463_v44  ;;  %v2460_v21 = vsel %vm2458_vm5, 1.0, %v12876_v18 }
 0x65d   : > { %v2464_v50 = vmul.f32 0.3275911, %v2462_v45  ;;  %v2490_v54 = vsub.f32 0.0, %v2462_v45 }
 0x65e   : > { %v2467_v51 = vadd.f32 1.0, %v2465_v48  ;;  %v2493_v56 = vmul.f32 %v2491_v53, %v2463_v44  ;;  %v12506_v44 = vld [vmem:[%s12925_s8 + $0x60] sm:$0xff]   ;;  %v12508_v48 = vld [vmem:[%s12925_s8 + $0x68] sm:$0xff]   ;;  %v12512_v53 = vld [vmem:[%s12925_s8 + $0x78] sm:$0xff]  }
 0x65f   : > { %v2466_v52 = vadd.f32 1.0, %v2464_v50  ;;  %v2492_v59 = vmul.f32 %v2490_v54, %v2462_v45  ;;  %v12507_v45 = vld [vmem:[%s12925_s8 + $0x20] sm:$0xff]   ;;  %v12509_v50 = vld [vmem:[%s12925_s8 + $0x28] sm:$0xff]   ;;  %v12513_v54 = vld [vmem:[%s12925_s8 + $0x38] sm:$0xff]  }
 0x660   : > { %12768 = vrcp.f32 %v2467_v51  ;;  %v2496_v0 = vmul.f32 1.442695, %v2493_v56  ;;  %v12510_v51 = vld [vmem:[%s12925_s8 + $0x70] sm:$0xff]  }
 0x661   : > { %12770 = vrcp.f32 %v2466_v52  ;;  %v2494_v47 = vmul.f32 1.442695, %v2492_v59  ;;  %v12511_v52 = vld [vmem:[%s12925_s8 + $0x30] sm:$0xff]  }
 0x662   : > { %12772 = vpow2.f32 %v2496_v0  ;;  %v9579_v0 = vld [vmem:[%s12920_s3 + $0x10] sm:$0xff] }
 0x663   : > { %12774 = vpow2.f32 %v2494_v47  ;;  %v12517_v47 = vld [vmem:[%s12925_s8 + $0x98] sm:$0xff]  }
 0x66a   : > { %v12769_v55 = vpop.eup %12768 }
 0x66b   : > { %v12771_v57 = vpop.eup %12770  ;;  %v2473_v58 = vmul.f32 1.0614054, %v12769_v55 }
 0x66c   : > { %v2472_v60 = vmul.f32 1.0614054, %v12771_v57  ;;  %v12773_v13 = vpop.eup %12772 }
 0x66d   : > { %v2475_v61 = vadd.f32 -1.4531521, %v2473_v58  ;;  %v12775_v15 = vpop.eup %12774 }
 0x66e   : > { %v2474_v62 = vadd.f32 -1.4531521, %v2472_v60 }
 0x66f   : > { %v2477_v49 = vmul.f32 %v12769_v55, %v2475_v61  ;;  %v12514_v61 = vld [vmem:[%s12925_s8 + $0x80] sm:$0xff]  }
 0x670   : > { %v2476_v63 = vmul.f32 %v12771_v57, %v2474_v62  ;;  %v12515_v62 = vld [vmem:[%s12925_s8 + $0x88] sm:$0xff]  }
 0x671   : > { %v2479_v1 = vadd.f32 1.4214138, %v2477_v49  ;;  %v12516_v49 = vld [vmem:[%s12925_s8 + $0x90] sm:$0xff]  }
 0x672   : > { %v2478_v2 = vadd.f32 1.4214138, %v2476_v63  ;;  %v12518_v63 = vld [vmem:[%s12925_s8 + $0xa0] sm:$0xff]  }
 0x673   : > { %v2481_v3 = vmul.f32 %v12769_v55, %v2479_v1  ;;  %v12519_v1 = vld [vmem:[%s12925_s8 + $0xa8] sm:$0xff]  }
 0x674   : > { %v2480_v4 = vmul.f32 %v12771_v57, %v2478_v2  ;;  %v12520_v2 = vld [vmem:[%s12925_s8 + $0xb0] sm:$0xff]  }
 0x675   : > { %v2483_v5 = vadd.f32 -0.28449672, %v2481_v3  ;;  %v12521_v3 = vld [vmem:[%s12925_s8 + $0xb8] sm:$0xff]  }
 0x676   : > { %v2482_v7 = vadd.f32 -0.28449672, %v2480_v4  ;;  %v3059_v4 = vld [vmem:[%s12935_s19] sm:$0xff] }
 0x677   : > { %v2485_v8 = vmul.f32 %v12769_v55, %v2483_v5  ;;  %v3060_v5 = vld [vmem:[%s12935_s19 + $0x8] sm:$0xff] }
 0x678   : > { %v2484_v9 = vmul.f32 %v12771_v57, %v2482_v7  ;;  %v3061_v7 = vld [vmem:[%s12935_s19 + $0x10] sm:$0xff] }
 0x679   : > { %v2487_v10 = vadd.f32 0.2548296, %v2485_v8  ;;  %v12254_v8 = vpack.c.bf16 %v3060_v5, %v3059_v4  ;;  %v9607_v4 = vld [vmem:[%s14434_s10] ss:$0 sm:$0xff]  ;;  %s14444_s10 = sld [smem:[#allocation14_spill]] }
 0x67a   : > { %v2486_v12 = vadd.f32 0.2548296, %v2484_v9  ;;  %v3062_v9 = vld [vmem:[%s12935_s19 + $0x18] sm:$0xff] }
 0x67b   : > { %v2489_v6 = vmul.f32 %v12769_v55, %v2487_v10  ;;  %v12257_v10 = vpack.c.bf16 %v3062_v9, %v3061_v7  ;;  %v9609_v9 = vld [vmem:[%s14435_s11 + $0x4] sm:$0xf] }
 0x67c   : > { %v2488_v14 = vmul.f32 %v12771_v57, %v2486_v12  ;;  %v3063_v12 = vld [vmem:[%s12935_s19 + $0x20] sm:$0xff] }
 0x67d   : > { %v2499_v16 = vmul.f32 %v12773_v13, %v2489_v6  ;;  %v3064_v6 = vld [vmem:[%s12935_s19 + $0x28] sm:$0xff] }
 0x67e   : > { %v2498_v11 = vmul.f32 %v12775_v15, %v2488_v14  ;;  %v12260_v13 = vpack.c.bf16 %v3064_v6, %v3063_v12  ;;  %v3065_v14 = vld [vmem:[%s12935_s19 + $0x30] sm:$0xff]  ;;  %v3066_v15 = vld [vmem:[%s12935_s19 + $0x38] sm:$0xff]  ;;  %v12525_v12 = vld [vmem:[%s12955_s12 + $0x48] sm:$0xff]  }
 0x67f   : > { %v2501_v17 = vsub.f32 1.0, %v2499_v16  ;;  %v12263_v16 = vpack.c.bf16 %v3066_v15, %v3065_v14  ;;  %v12527_v6 = vld [vmem:[%s12955_s12 + $0x50] sm:$0xff]   ;;  %v12531_v14 = vld [vmem:[%s12955_s12 + $0x60] sm:$0xff]   ;;  %v12533_v15 = vld [vmem:[%s12955_s12 + $0x68] sm:$0xff]  }
 0x680   : > { %v2500_v20 = vsub.f32 1.0, %v2498_v11  ;;  %v3067_v11 = vld [vmem:[%s12935_s19 + $0x40] sm:$0xff] }
 0x681   : > { %v2503_v22 = vmul.f32 %v2501_v17, %v2461_v19  ;;  %v3068_v17 = vld [vmem:[%s12935_s19 + $0x48] sm:$0xff]  ;;  %v3069_v19 = vld [vmem:[%s12935_s19 + $0x50] sm:$0xff] }
 0x682   : > { %v2502_v23 = vmul.f32 %v2500_v20, %v2460_v21  ;;  %v12266_v18 = vpack.c.bf16 %v3068_v17, %v3067_v11  ;;  %v3070_v20 = vld [vmem:[%s12935_s19 + $0x58] sm:$0xff] }
 0x683   : > { %v2505_v26 = vadd.f32 1.0, %v2503_v22  ;;  %v12269_v21 = vpack.c.bf16 %v3070_v20, %v3069_v19  ;;  %v3071_v22 = vld [vmem:[%s12935_s19 + $0x60] sm:$0xff]  ;;  %v12536_v11 = vld [vmem:[%s12955_s12 + $0x38] sm:$0xff]  }
 0x684   : > { %v2504_v28 = vadd.f32 1.0, %v2502_v23  ;;  %v3072_v23 = vld [vmem:[%s12935_s19 + $0x68] sm:$0xff]  ;;  %v12537_v17 = vld [vmem:[%s12955_s12 + $0x78] sm:$0xff]  }
 0x685   : > { %v2507_v29 = vmul.f32 %v2505_v26, %v2455_v24  ;;  %v12272_v24 = vpack.c.bf16 %v3072_v23, %v3071_v22 }
 0x686   : > { %v2506_v30 = vmul.f32 %v2504_v28, %v2454_v27 }
 0x688   : > { %v13327_v31 = vpack.c.bf16 %v2507_v29, %v2506_v30 }
 0x68a   : > { %12246 = vmatpush3.bf16.msra.mxu0 %v13327_v31  ;;  %12249 = vmatpush3.bf16.msra.mxu1 %v13327_v31 }
 0x68b   : > { %11081 = vmatprep.subr.bf16.mxu0 %v12873_v46  ;;  %11101 = vmatprep.subr.bf16.mxu1 %v12873_v46 }
 0x68d   : > { %11072 = vmatmul.mubr.msk.f32.vlgmr.msra.gmra.mrb[16].mxu0 %vm2509_vm6, %v2508_v32  ;;  %11079 = vmatmul.mubr.msk.f32.vlgmr.msra.gmra.mrb[24].mxu1 %vm2509_vm6, %v9545_v33 }
 0x68e   : > { %11082 = vmatpush3.bf16.msra.mxu0 %v12498_v34  ;;  %11102 = vmatpush3.bf16.msra.mxu1 %v12499_v35 }
 0x68f   : > { %11083 = vmatprep.subr.bf16.mxu0 %v12873_v46  ;;  %11103 = vmatprep.subr.bf16.mxu1 %v12873_v46 }
 0x690   : > { %11097 = vmatprep.mubr.msk.bf16.mxu0 %vm12874_vm3, %v12873_v46  ;;  %11117 = vmatprep.mubr.msk.bf16.mxu1 %vm12874_vm3, %v12873_v46 }
 0x692   : > { %11084 = vmatpush3.bf16.msra.mxu0 %v12500_v36  ;;  %11104 = vmatpush3.bf16.msra.mxu1 %v12501_v38 }
 0x693   : > { %11085 = vmatprep.subr.bf16.mxu0 %v12873_v46  ;;  %11105 = vmatprep.subr.bf16.mxu1 %v12873_v46 }
 0x696   : > { %11086 = vmatpush3.bf16.msra.mxu0 %v12502_v40  ;;  %11106 = vmatpush3.bf16.msra.mxu1 %v12503_v42  ;;  %v3073_v40 = vld [vmem:[%s12935_s19 + $0x70] sm:$0xff]  ;;  %v3074_v42 = vld [vmem:[%s12935_s19 + $0x78] sm:$0xff] }
 0x697   : > { %11087 = vmatprep.subr.bf16.mxu0 %v12873_v46  ;;  %11107 = vmatprep.subr.bf16.mxu1 %v12873_v46 }
 0x69a   : > { %11088 = vmatpush3.bf16.msra.mxu0 %v12504_v41  ;;  %11108 = vmatpush3.bf16.msra.mxu1 %v12505_v43  ;;  %v12275_v41 = vpack.c.bf16 %v3074_v42, %v3073_v40 }
 0x69b   : > { %11089 = vmatprep.subr.bf16.mxu0 %v12873_v46  ;;  %11109 = vmatprep.subr.bf16.mxu1 %v12873_v46 }
 0x69e   : > { %11090 = vmatpush3.bf16.msra.mxu0 %v12506_v44  ;;  %11110 = vmatpush3.bf16.msra.mxu1 %v12507_v45  ;;  %v9605_v44 = vld [vmem:[%s12930_s14] ss:$0 sm:$0xff] }
 0x69f   : > { %11091 = vmatprep.subr.bf16.mxu0 %v12873_v46  ;;  %11111 = vmatprep.subr.bf16.mxu1 %v12873_v46 }
 0x6a2   : > { %11092 = vmatpush3.bf16.msra.mxu0 %v12508_v48  ;;  %11112 = vmatpush3.bf16.msra.mxu1 %v12509_v50 }
 0x6a3   : > { %11093 = vmatprep.subr.bf16.mxu0 %v12873_v46  ;;  %11113 = vmatprep.subr.bf16.mxu1 %v12873_v46 }
 0x6a6   : > { %11094 = vmatpush3.bf16.msra.mxu0 %v12510_v51  ;;  %11114 = vmatpush3.bf16.msra.mxu1 %v12511_v52 }
 0x6a7   : > { %11095 = vmatprep.subr.bf16.mxu0 %v12873_v46  ;;  %11115 = vmatprep.subr.bf16.mxu1 %v12873_v46 }
 0x6aa   : > { %11096 = vmatpush3.bf16.msra.mxu0 %v12512_v53  ;;  %11116 = vmatpush3.bf16.msra.mxu1 %v12513_v54 }
 0x6ab   : > { %12250 = vmatprep.subr.bf16.mxu0 %v12875_v25  ;;  %11128 = vmatprep.subr.bf16.mxu1 %v12873_v46 }
 0x760   : > { %v2579_v55 = vpop.f32.mrb[16].mxu0  ;;  %v2671_v56 = vpop.f32.mrb[24].mxu1 }
 0x761   : > { %v2583_v57 = vpack.c.bf16 %v2579_v55, %v2579_v55  ;;  %v2675_v58 = vpack.c.bf16 %v2671_v56, %v2671_v56  ;;  %v11080_v59 = vpop.f32.mrb[25].mxu1  ;;  %v11073_v60 = vpop.f32.mrb[17].mxu0 }
 0x762   : > { %v12526_v59 = vld [vmem:[%s12955_s12 + $0x10] sm:$0xff]   ;;  %v12528_v60 = vld [vmem:[%s12955_s12 + $0x18] sm:$0xff]  }
 0x763   : > { %11098 = vmatmul.mubr.bf16.vlgmr.msra.gmra.mrb[20].mxu0 %v2675_v58  ;;  %11118 = vmatmul.mubr.bf16.vlgmr.msra.gmra.mrb[28].mxu1 %v2583_v57  ;;  %v12522_v57 = vld [vmem:[%s12955_s12] sm:$0xff]   ;;  %v12524_v58 = vld [vmem:[%s12955_s12 + $0x8] sm:$0xff]  }
 0x764   : > { %12252 = vmatpush3.bf16.msra.mxu0 %v13327_v31  ;;  %11125 = vmatprep.mubr.msk.f32.mxu0 %vm12874_vm3, %v12873_v46 }
 0x765   : > { %11129 = vmatpush3.bf16.msra.mxu1 %v12514_v61  ;;  %11144 = vmatprep.mubr.msk.bf16.mxu1 %vm12874_vm3, %v12873_v46  ;;  %v12530_v61 = vld [vmem:[%s12955_s12 + $0x20] sm:$0xff]  }
 0x766   : > { %11130 = vmatprep.subr.bf16.mxu1 %v12873_v46  ;;  %12253 = vmatprep.subr.bf16.mxu0 %v12875_v25 }
 0x769   : > { %11131 = vmatpush3.bf16.msra.mxu1 %v12515_v62  ;;  %v12532_v62 = vld [vmem:[%s12955_s12 + $0x28] sm:$0xff]  }
 0x76a   : > { %11132 = vmatprep.subr.bf16.mxu1 %v12873_v46 }
 0x76b   : > { %11126 = vmatmul.mubr.msk.f32.vlgmr.msra.gmra.mrb[18].mxu0 %vm2509_vm6, %v9579_v0  ;;  %v12534_v0 = vld [vmem:[%s12955_s12 + $0x30] sm:$0xff]  }
 0x76c   : > { %11180 = vmatprep.mubr.msk.f32.mxu0 %vm12874_vm3, %v12873_v46  ;;  %12255 = vmatpush3.bf16.msra.mxu0 %v12254_v8 }
 0x76d   : > { %11133 = vmatpush3.bf16.msra.mxu1 %v12516_v49  ;;  %12256 = vmatprep.subr.bf16.mxu0 %v12875_v25 }
 0x76e   : > { %11134 = vmatprep.subr.bf16.mxu1 %v12873_v46 }
 0x770   : > { %12258 = vmatpush3.bf16.msra.mxu0 %v12257_v10 }
 0x771   : > { %11135 = vmatpush3.bf16.msra.mxu1 %v12517_v47  ;;  %12259 = vmatprep.subr.bf16.mxu0 %v12875_v25 }
 0x772   : > { %11136 = vmatprep.subr.bf16.mxu1 %v12873_v46 }
 0x774   : > { %12261 = vmatpush3.bf16.msra.mxu0 %v12260_v13 }
 0x775   : > { %11137 = vmatpush3.bf16.msra.mxu1 %v12518_v63  ;;  %12262 = vmatprep.subr.bf16.mxu0 %v12875_v25 }
 0x776   : > { %11138 = vmatprep.subr.bf16.mxu1 %v12873_v46 }
 0x778   : > { %12264 = vmatpush3.bf16.msra.mxu0 %v12263_v16 }
 0x779   : > { %11139 = vmatpush3.bf16.msra.mxu1 %v12519_v1  ;;  %12265 = vmatprep.subr.bf16.mxu0 %v12875_v25 }
 0x77a   : > { %11140 = vmatprep.subr.bf16.mxu1 %v12873_v46 }
 0x77c   : > { %12267 = vmatpush3.bf16.msra.mxu0 %v12266_v18 }
 0x77d   : > { %11141 = vmatpush3.bf16.msra.mxu1 %v12520_v2  ;;  %12268 = vmatprep.subr.bf16.mxu0 %v12875_v25  ;;  %v9606_v2 = vld [vmem:[%s12940_s24] ss:$0 sm:$0xff] }
 0x77e   : > { %11142 = vmatprep.subr.bf16.mxu1 %v12873_v46 }
 0x780   : > { %12270 = vmatpush3.bf16.msra.mxu0 %v12269_v21 }
 0x781   : > { %11143 = vmatpush3.bf16.msra.mxu1 %v12521_v3  ;;  %12271 = vmatprep.subr.bf16.mxu0 %v12875_v25 }
 0x782   : > { %12277 = vmatprep.subr.bf16.mxu1 %v12875_v25 }
 0x784   : > { %12273 = vmatpush3.bf16.msra.mxu0 %v12272_v24 }
 0x785   : > { %12274 = vmatprep.subr.bf16.mxu0 %v12875_v25 }
 0x788   : > { %12276 = vmatpush3.bf16.msra.mxu0 %v12275_v41 }
 0x789   : > { %11218 = vmatprep.subr.mxu0 %v12873_v46 }
 0x836   : > { %v2775_v26 = vpop.f32.mrb[20].mxu0  ;;  %v2863_v27 = vpop.f32.mrb[28].mxu1 }
 0x837   : > { %v2864_v28 = vadd.f32 %v2863_v27, %v2775_v26  ;;  %v11099_v29 = vpop.f32.mrb[21].mxu0  ;;  %v11119_v30 = vpop.f32.mrb[29].mxu1  ;;  %v12538_v26 = vld [vmem:[%s12955_s12 + $0x80] sm:$0xff]   ;;  %v12539_v27 = vld [vmem:[%s12955_s12 + $0x88] sm:$0xff]  }
 0x838   : > { %v2778_v31 = vpop.f32.mrb[22].mxu0  ;;  %v2866_v32 = vpop.f32.mrb[30].mxu1  ;;  %v12541_v29 = vld [vmem:[%s12955_s12 + $0x98] sm:$0xff]   ;;  %v12542_v30 = vld [vmem:[%s12955_s12 + $0xa0] sm:$0xff]  }
 0x839   : > { %v11100_v33 = vpop.f32.mrb[23].mxu0  ;;  %v11120_v34 = vpop.f32.mrb[31].mxu1  ;;  %v12543_v31 = vld [vmem:[%s12955_s12 + $0xa8] sm:$0xff]   ;;  %v12544_v32 = vld [vmem:[%s12955_s12 + $0xb0] sm:$0xff]  }
 0x83a   : > { %v12545_v33 = vld [vmem:[%s12955_s12 + $0xb8] sm:$0xff]  }
 0x83e   : > { %v2940_v35 = vpop.f32.mrb[18].mxu0 }
 0x83f   : > { %v2944_v36 = vpack.c.bf16 %v2940_v35, %v2940_v35  ;;  %v11127_v38 = vpop.f32.mrb[19].mxu0 }
 0x841   : > { %11145 = vmatmul.mubr.bf16.vlgmr.msra.gmra.mrb[32].mxu1 %v2944_v36 }
 0x842   : > { %12279 = vmatpush3.bf16.msra.mxu1 %v12254_v8  ;;  %11215 = vmatprep.mubr.msk.f32.mxu1 %vm12874_vm3, %v12873_v46  ;;  %v3235_v8 = vld [vmem:[%s14435_s11] sm:$0xf] }
 0x843   : > { %12280 = vmatprep.subr.bf16.mxu1 %v12875_v25 }
 0x846   : > { %12282 = vmatpush3.bf16.msra.mxu1 %v12257_v10  ;;  %v12523_v10 = vld [vmem:[%s12955_s12 + $0x40] sm:$0xff]  }
 0x847   : > { %12283 = vmatprep.subr.bf16.mxu1 %v12875_v25 }
 0x84a   : > { %12285 = vmatpush3.bf16.msra.mxu1 %v12260_v13  ;;  %v12529_v13 = vld [vmem:[%s12955_s12 + $0x58] sm:$0xff]  }
 0x84b   : > { %12286 = vmatprep.subr.bf16.mxu1 %v12875_v25 }
 0x84e   : > { %12288 = vmatpush3.bf16.msra.mxu1 %v12263_v16  ;;  %v12535_v16 = vld [vmem:[%s12955_s12 + $0x70] sm:$0xff]  }
 0x84f   : > { %12289 = vmatprep.subr.bf16.mxu1 %v12875_v25 }
 0x852   : > { %12291 = vmatpush3.bf16.msra.mxu1 %v12266_v18 }
 0x853   : > { %12292 = vmatprep.subr.bf16.mxu1 %v12875_v25 }
 0x856   : > { %12294 = vmatpush3.bf16.msra.mxu1 %v12269_v21 }
 0x857   : > { %12295 = vmatprep.subr.bf16.mxu1 %v12875_v25 }
 0x85a   : > { %12297 = vmatpush3.bf16.msra.mxu1 %v12272_v24  ;;  %v9643_v24 = vld [vmem:[%s14435_s11 + $0x8] sm:$0xf] }
 0x85b   : > { %12298 = vmatprep.subr.bf16.mxu1 %v12875_v25 }
 0x85e   : > { %12300 = vmatpush3.bf16.msra.mxu1 %v12275_v41 }
 0x85f   : > { %11248 = vmatprep.subr.bf16.mxu1 %v12873_v46 }
 0x914   : > { %v3044_v43 = vpop.f32.mrb[32].mxu1 }
 0x915   : > { %v3050_v45 = vadd.f32 %v3044_v43, %v2864_v28  ;;  %v11146_v48 = vpop.f32.mrb[33].mxu1  ;;  %v12540_v28 = vld [vmem:[%s12955_s12 + $0x90] sm:$0xff]  }
 0x916   : > { %v3047_v50 = vpop.f32.mrb[34].mxu1 }
 0x917   : > { %v3058_v51 = vadd.f32 %v9605_v44, %v3050_v45  ;;  %v11147_v52 = vpop.f32.mrb[35].mxu1 }
 0x918   : > { %v12548_v52 = vld [vmem:[%s14436_s0 + $0x8] sm:$0xff]  }
 0x919   : > { %11181 = vmatmul.mubr.f32.vlgmr.msra.gmra.mrb[24].mxu0 %v3058_v51 }
 0x91a   : > { %11220 = vmatprep.mubr.msk.f32.mxu0 %vm12874_vm3, %v12873_v46 }
 0x9ec   : > { %v3141_v53 = vpop.f32.mrb[24].mxu0 }
 0x9ed   : > { %v3145_v54 = vsub.f32 %v3058_v51, %v3141_v53  ;;  %v11182_v55 = vpop.f32.mrb[25].mxu0  ;;  %v12546_v51 = vld [vmem:[%s14436_s0] sm:$0xff]   ;;  %v12550_v53 = vld [vmem:[%s14436_s0 + $0x10] sm:$0xff]  }
 0x9ee   : > { %v12554_v55 = vld [vmem:[%s14436_s0 + $0x20] sm:$0xff]  }
 0x9ef   : > { %v3146_v56 = vmul.f32 %v3145_v54, %v3145_v54 }
 0x9f1   : > { %11216 = vmatmul.mubr.f32.vlgmr.msra.gmra.mrb[26].mxu1 %v3146_v56  ;;  %v12556_v56 = vld [vmem:[%s14436_s0 + $0x28] sm:$0xff]  }
 0x9f2   : > { %11264 = vmatprep.mubr.msk.bf16.mxu1 %vm12874_vm3, %v12873_v46  ;;  %11249 = vmatpush3.bf16.msra.mxu1 %v12522_v57  ;;  %v12558_v57 = vld [vmem:[%s14436_s0 + $0x30] sm:$0xff]  }
 0x9f3   : > { %11250 = vmatprep.subr.bf16.mxu1 %v12873_v46 }
 0x9f6   : > { %11251 = vmatpush3.bf16.msra.mxu1 %v12524_v58 }
 0x9f7   : > { %11252 = vmatprep.subr.bf16.mxu1 %v12873_v46 }
 0x9fa   : > { %11253 = vmatpush3.bf16.msra.mxu1 %v12526_v59  ;;  %v9669_v59 = vld [vmem:[%s14437_s18] ss:$0 sm:$0xff]  ;;  %s14445_s18 = sld [smem:[#allocation16_spill]] }
 0x9fb   : > { %11254 = vmatprep.subr.bf16.mxu1 %v12873_v46 }
 0x9fe   : > { %11255 = vmatpush3.bf16.msra.mxu1 %v12528_v60 }
 0x9ff   : > { %11256 = vmatprep.subr.bf16.mxu1 %v12873_v46 }
 0xa02   : > { %11257 = vmatpush3.bf16.msra.mxu1 %v12530_v61 }
 0xa03   : > { %11258 = vmatprep.subr.bf16.mxu1 %v12873_v46 }
 0xa06   : > { %11259 = vmatpush3.bf16.msra.mxu1 %v12532_v62 }
 0xa07   : > { %11260 = vmatprep.subr.bf16.mxu1 %v12873_v46 }
 0xa0a   : > { %11261 = vmatpush3.bf16.msra.mxu1 %v12534_v0 }
 0xa0b   : > { %11262 = vmatprep.subr.bf16.mxu1 %v12873_v46 }
 0xa0e   : > { %11263 = vmatpush3.bf16.msra.mxu1 %v12536_v11 }
 0xa0f   : > { %11293 = vmatprep.subr.mxu1 %v12873_v46 }
 0xac4   : > { %v3213_v49 = vpop.f32.mrb[26].mxu1 }
 0xac5   : > { %v3214_v47 = vadd.f32 1e-05, %v3213_v49  ;;  %v11217_v63 = vpop.f32.mrb[27].mxu1 }
 0xac6   : > { %v9672_v63 = vld [vmem:[%s14438_s22 + $0x2] sm:$0x3] }
 0xac7   : > { %12776 = vrsqrt.f32 %v3214_v47  ;;  %v3786_v47 = vld [vmem:[%s14438_s22] sm:$0x3] }
 0xad1   : > { %v12777_v1 = vpop.eup %12776 }
 0xad2   : > { %v3218_v3 = vmul.f32 %v12777_v1, %v3145_v54  ;;  %v12552_v54 = vld [vmem:[%s14436_s0 + $0x18] sm:$0xff]   ;;  %v12547_v1 = vld [vmem:[%s14436_s0 + $0x40] sm:$0xff]  }
 0xad4   : > { %v3226_v5 = vmul.f32 %v9606_v2, %v3218_v3  ;;  %v12549_v2 = vld [vmem:[%s14436_s0 + $0x48] sm:$0xff]   ;;  %v12551_v3 = vld [vmem:[%s14436_s0 + $0x50] sm:$0xff]  }
 0xad6   : > { %v13454_v7 = vadd.f32 %v9607_v4, %v3226_v5  ;;  %v12553_v4 = vld [vmem:[%s14436_s0 + $0x58] sm:$0xff]   ;;  %v12555_v5 = vld [vmem:[%s14436_s0 + $0x60] sm:$0xff]  }
 0xad8   : > { %11219 = vmatpush3.msra.mxu0 %v13454_v7 }
 0xad9   : > { %11221 = vmatmul.mubr.msk.f32.vlgmr.msra.gmra.mrb[26].mxu0 %vm3236_vm7, %v3235_v8  ;;  %11223 = vmatprep.subr.mxu0 %v12873_v46  ;;  %v12557_v8 = vld [vmem:[%s14436_s0 + $0x68] sm:$0xff]  }
 0xada   : > { %11224 = vmatpush3.msra.mxu0 %v13454_v7  ;;  %11225 = vmatprep.mubr.msk.f32.mxu0 %vm12874_vm3, %v12873_v46 }
 0xadb   : > { %11228 = vmatprep.subr.bf16.mxu0 %v12873_v46 }
 0xadd   : > { %11226 = vmatmul.mubr.msk.f32.vlgmr.msra.gmra.mrb[28].mxu0 %vm3236_vm7, %v9609_v9  ;;  %v12559_v9 = vld [vmem:[%s14436_s0 + $0x70] sm:$0xff]  }
 0xade   : > { %11229 = vmatpush3.bf16.msra.mxu0 %v12523_v10  ;;  %11244 = vmatprep.mubr.msk.bf16.mxu0 %vm12874_vm3, %v12873_v46  ;;  %v12560_v10 = vld [vmem:[%s14436_s0 + $0x38] sm:$0xff]  }
 0xadf   : > { %11230 = vmatprep.subr.bf16.mxu0 %v12873_v46 }
 0xae2   : > { %11231 = vmatpush3.bf16.msra.mxu0 %v12525_v12  ;;  %v12561_v12 = vld [vmem:[%s14436_s0 + $0x78] sm:$0xff]  }
 0xae3   : > { %11232 = vmatprep.subr.bf16.mxu0 %v12873_v46 }
 0xae6   : > { %11233 = vmatpush3.bf16.msra.mxu0 %v12527_v6 }
 0xae7   : > { %11234 = vmatprep.subr.bf16.mxu0 %v12873_v46 }
 0xaea   : > { %11235 = vmatpush3.bf16.msra.mxu0 %v12529_v13 }
 0xaeb   : > { %11236 = vmatprep.subr.bf16.mxu0 %v12873_v46 }
 0xaee   : > { %11237 = vmatpush3.bf16.msra.mxu0 %v12531_v14 }
 0xaef   : > { %11238 = vmatprep.subr.bf16.mxu0 %v12873_v46 }
 0xaf2   : > { %11239 = vmatpush3.bf16.msra.mxu0 %v12533_v15 }
 0xaf3   : > { %11240 = vmatprep.subr.bf16.mxu0 %v12873_v46 }
 0xaf6   : > { %11241 = vmatpush3.bf16.msra.mxu0 %v12535_v16 }
 0xaf7   : > { %11242 = vmatprep.subr.bf16.mxu0 %v12873_v46 }
 0xafa   : > { %11243 = vmatpush3.bf16.msra.mxu0 %v12537_v17  ;;  %v9707_v17 = vld [vmem:[%s14438_s22 + $0x4] sm:$0x3] }
 0xafb   : > { %11268 = vmatprep.subr.mxu0 %v12873_v46 }
 0xbac   : > { %v3306_v18 = vpop.f32.mrb[26].mxu0 }
 0xbad   : > { %v3310_v19 = vpack.c.bf16 %v3306_v18, %v3306_v18  ;;  %v11222_v20 = vpop.f32.mrb[27].mxu0  ;;  %v12562_v18 = vld [vmem:[%s14436_s0 + $0x80] sm:$0xff]  }
 0xbae   : > { %v12564_v20 = vld [vmem:[%s14436_s0 + $0x90] sm:$0xff]  }
 0xbaf   : > { %11265 = vmatmul.mubr.bf16.vlgmr.msra.gmra.mrb[36].mxu1 %v3310_v19  ;;  %v12563_v19 = vld [vmem:[%s14436_s0 + $0x88] sm:$0xff]  }
 0xbb0   : > { %v3398_v21 = vpop.f32.mrb[28].mxu0  ;;  %11295 = vmatprep.mubr.msk.f32.mxu1 %vm12874_vm3, %v12873_v46 }
 0xbb1   : > { %v3402_v22 = vpack.c.bf16 %v3398_v21, %v3398_v21  ;;  %v11227_v23 = vpop.f32.mrb[29].mxu0  ;;  %v12565_v21 = vld [vmem:[%s14436_s0 + $0x98] sm:$0xff]  }
 0xbb2   : > { %v12567_v23 = vld [vmem:[%s14436_s0 + $0xa8] sm:$0xff]  }
 0xbb3   : > { %11245 = vmatmul.mubr.bf16.vlgmr.msra.gmra.mrb[32].mxu0 %v3402_v22  ;;  %v12566_v22 = vld [vmem:[%s14436_s0 + $0xa0] sm:$0xff]  }
 0xbb4   : > { %11269 = vmatpush3.msra.mxu0 %v13454_v7  ;;  %11270 = vmatprep.mubr.msk.f32.mxu0 %vm12874_vm3, %v12873_v46 }
 0xbb5   : > { %11273 = vmatprep.subr.bf16.mxu0 %v12873_v46 }
 0xbbb   : > { %11271 = vmatmul.mubr.msk.f32.vlgmr.msra.gmra.mrb[30].mxu0 %vm3236_vm7, %v9643_v24  ;;  %v12568_v24 = vld [vmem:[%s14436_s0 + $0xb0] sm:$0xff]  }
 0xbbc   : > { %11274 = vmatpush3.bf16.msra.mxu0 %v12538_v26  ;;  %11289 = vmatprep.mubr.msk.bf16.mxu0 %vm12874_vm3, %v12873_v46  ;;  %v12569_v26 = vld [vmem:[%s14436_s0 + $0xb8] sm:$0xff]   ;;  %s14450_s0 = sld [smem:[#allocation20_spill]] }
 0xbbd   : > { %11275 = vmatprep.subr.bf16.mxu0 %v12873_v46 }
 0xbc0   : > { %11276 = vmatpush3.bf16.msra.mxu0 %v12539_v27  ;;  %v12570_v27 = vld [vmem:[%s14439_s23] sm:$0xff]  }
 0xbc1   : > { %11277 = vmatprep.subr.bf16.mxu0 %v12873_v46 }
 0xbc4   : > { %11278 = vmatpush3.bf16.msra.mxu0 %v12540_v28  ;;  %v12572_v28 = vld [vmem:[%s14439_s23 + $0x8] sm:$0xff]  }
 0xbc5   : > { %11279 = vmatprep.subr.bf16.mxu0 %v12873_v46 }
 0xbc8   : > { %11280 = vmatpush3.bf16.msra.mxu0 %v12541_v29  ;;  %v12574_v29 = vld [vmem:[%s14439_s23 + $0x10] sm:$0xff]  }
 0xbc9   : > { %11281 = vmatprep.subr.bf16.mxu0 %v12873_v46 }
 0xbcc   : > { %11282 = vmatpush3.bf16.msra.mxu0 %v12542_v30  ;;  %v12576_v30 = vld [vmem:[%s14439_s23 + $0x18] sm:$0xff]  }
 0xbcd   : > { %11283 = vmatprep.subr.bf16.mxu0 %v12873_v46 }
 0xbd0   : > { %11284 = vmatpush3.bf16.msra.mxu0 %v12543_v31  ;;  %v12578_v31 = vld [vmem:[%s14439_s23 + $0x20] sm:$0xff]  }
 0xbd1   : > { %11285 = vmatprep.subr.bf16.mxu0 %v12873_v46 }
 0xbd4   : > { %11286 = vmatpush3.bf16.msra.mxu0 %v12544_v32  ;;  %v12580_v32 = vld [vmem:[%s14439_s23 + $0x28] sm:$0xff]  }
 0xbd5   : > { %11287 = vmatprep.subr.bf16.mxu0 %v12873_v46 }
 0xbd8   : > { %11288 = vmatpush3.bf16.msra.mxu0 %v12545_v33 }
 0xbd9   : > { %11323 = vmatprep.subr.bf16.mxu0 %v12873_v46 }
 0xc82   : > { %v3590_v34 = vpop.f32.mrb[36].mxu1 }
 0xc83   : > { %v11266_v35 = vpop.f32.mrb[37].mxu1 }
 0xc84   : > { %v3593_v36 = vpop.f32.mrb[38].mxu1 }
 0xc85   : > { %v11267_v38 = vpop.f32.mrb[39].mxu1 }
 0xc86   : > { %v3502_v40 = vpop.f32.mrb[32].mxu0 }
 0xc87   : > { %v3591_v42 = vadd.f32 %v3590_v34, %v3502_v40  ;;  %v11246_v41 = vpop.f32.mrb[33].mxu0 }
 0xc88   : > { %v3505_v43 = vpop.f32.mrb[34].mxu0 }
 0xc89   : > { %v11247_v44 = vpop.f32.mrb[35].mxu0 }
 0xc8e   : > { %v3667_v45 = vpop.f32.mrb[30].mxu0 }
 0xc8f   : > { %v3671_v48 = vpack.c.bf16 %v3667_v45, %v3667_v45  ;;  %v11272_v50 = vpop.f32.mrb[31].mxu0  ;;  %v12571_v45 = vld [vmem:[%s14439_s23 + $0x40] sm:$0xff]  }
 0xc91   : > { %11290 = vmatmul.mubr.bf16.vlgmr.msra.gmra.mrb[36].mxu0 %v3671_v48 }
 0xc92   : > { %11339 = vmatprep.mubr.msk.bf16.mxu0 %vm12874_vm3, %v12873_v46  ;;  %11324 = vmatpush3.bf16.msra.mxu0 %v12546_v51  ;;  %v12573_v51 = vld [vmem:[%s14439_s23 + $0x48] sm:$0xff]  }
 0xc93   : > { %11325 = vmatprep.subr.bf16.mxu0 %v12873_v46 }
 0xc96   : > { %11326 = vmatpush3.bf16.msra.mxu0 %v12548_v52  ;;  %v12575_v52 = vld [vmem:[%s14439_s23 + $0x50] sm:$0xff]  }
 0xc97   : > { %11327 = vmatprep.subr.bf16.mxu0 %v12873_v46 }
 0xc9a   : > { %11328 = vmatpush3.bf16.msra.mxu0 %v12550_v53  ;;  %v12577_v53 = vld [vmem:[%s14439_s23 + $0x58] sm:$0xff]  }
 0xc9b   : > { %11329 = vmatprep.subr.bf16.mxu0 %v12873_v46 }
 0xc9e   : > { %11330 = vmatpush3.bf16.msra.mxu0 %v12552_v54  ;;  %v12579_v54 = vld [vmem:[%s14439_s23 + $0x60] sm:$0xff]  }
 0xc9f   : > { %11331 = vmatprep.subr.bf16.mxu0 %v12873_v46 }
 0xca2   : > { %11332 = vmatpush3.bf16.msra.mxu0 %v12554_v55  ;;  %v12581_v55 = vld [vmem:[%s14439_s23 + $0x68] sm:$0xff]  }
 0xca3   : > { %11333 = vmatprep.subr.bf16.mxu0 %v12873_v46 }
 0xca6   : > { %11334 = vmatpush3.bf16.msra.mxu0 %v12556_v56  ;;  %v12582_v56 = vld [vmem:[%s14439_s23 + $0x30] sm:$0xff]  }
 0xca7   : > { %11335 = vmatprep.subr.bf16.mxu0 %v12873_v46 }
 0xcaa   : > { %11336 = vmatpush3.bf16.msra.mxu0 %v12558_v57  ;;  %v12583_v57 = vld [vmem:[%s14439_s23 + $0x70] sm:$0xff]  }
 0xcab   : > { %11337 = vmatprep.subr.bf16.mxu0 %v12873_v46 }
 0xcae   : > { %11338 = vmatpush3.bf16.msra.mxu0 %v12560_v10 }
 0xcaf   : > { %11368 = vmatprep.subr.bf16.mxu0 %v12873_v46 }
 0xd64   : > { %v3771_v58 = vpop.f32.mrb[36].mxu0 }
 0xd65   : > { %v3777_v60 = vadd.f32 %v3771_v58, %v3591_v42  ;;  %v11291_v61 = vpop.f32.mrb[37].mxu0  ;;  %v12584_v58 = vld [vmem:[%s14439_s23 + $0x38] sm:$0xff]  }
 0xd66   : > { %v3774_v62 = vpop.f32.mrb[38].mxu0  ;;  %v9734_v61 = vld [vmem:[%s14440_s26] ss:$0 sm:$0xff]  ;;  %s14446_s26 = sld [smem:[#allocation18_spill]] }
 0xd67   : > { %v13529_v0 = vadd.f32 %v9669_v59, %v3777_v60  ;;  %v11292_v49 = vpop.f32.mrb[39].mxu0  ;;  %v12585_v59 = vld [vmem:[%s14439_s23 + $0x78] sm:$0xff]  }
 0xd69   : > { %11294 = vmatpush3.msk.msra.mxu1 %vm3791_vm8, %v13529_v0 }
 0xd6a   : > { %11296 = vmatmul.mubr.msk.f32.vlgmr.msra.gmra.mrb[40].mxu1 %vm3787_vm9, %v3786_v47  ;;  %11298 = vmatprep.subr.mxu1 %v12873_v46 }
 0xd6b   : > { %11299 = vmatpush3.msk.msra.mxu1 %vm3791_vm8, %v13529_v0  ;;  %11300 = vmatprep.mubr.msk.f32.mxu1 %vm12874_vm3, %v12873_v46 }
 0xd6c   : > { %11303 = vmatprep.subr.bf16.mxu1 %v12873_v46 }
 0xd6e   : > { %11301 = vmatmul.mubr.msk.f32.vlgmr.msra.gmra.mrb[42].mxu1 %vm3787_vm9, %v9672_v63 }
 0xd6f   : > { %11304 = vmatpush3.bf16.msra.mxu1 %v12547_v1  ;;  %11319 = vmatprep.mubr.msk.bf16.mxu1 %vm12874_vm3, %v12873_v46 }
 0xd70   : > { %11305 = vmatprep.subr.bf16.mxu1 %v12873_v46 }
 0xd73   : > { %11306 = vmatpush3.bf16.msra.mxu1 %v12549_v2 }
 0xd74   : > { %11307 = vmatprep.subr.bf16.mxu1 %v12873_v46 }
 0xd77   : > { %11308 = vmatpush3.bf16.msra.mxu1 %v12551_v3  ;;  %v9767_v3 = vld [vmem:[%s14441_s28 + $0x4] sm:$0xf] }
 0xd78   : > { %11309 = vmatprep.subr.bf16.mxu1 %v12873_v46 }
 0xd7b   : > { %11310 = vmatpush3.bf16.msra.mxu1 %v12553_v4 }
 0xd7c   : > { %11311 = vmatprep.subr.bf16.mxu1 %v12873_v46 }
 0xd7f   : > { %11312 = vmatpush3.bf16.msra.mxu1 %v12555_v5 }
 0xd80   : > { %11313 = vmatprep.subr.bf16.mxu1 %v12873_v46 }
 0xd83   : > { %11314 = vmatpush3.bf16.msra.mxu1 %v12557_v8 }
 0xd84   : > { %11315 = vmatprep.subr.bf16.mxu1 %v12873_v46 }
 0xd87   : > { %11316 = vmatpush3.bf16.msra.mxu1 %v12559_v9 }
 0xd88   : > { %11317 = vmatprep.subr.bf16.mxu1 %v12873_v46 }
 0xd8b   : > { %11318 = vmatpush3.bf16.msra.mxu1 %v12561_v12 }
 0xd8c   : > { %11343 = vmatprep.subr.mxu1 %v12873_v46 }
 0xe3d   : > { %v3861_v6 = vpop.f32.mrb[40].mxu1 }
 0xe3e   : > { %v3865_v13 = vpack.c.bf16 %v3861_v6, %v3861_v6  ;;  %v11297_v14 = vpop.f32.mrb[41].mxu1 }
 0xe3f   : > { %v4446_v14 = vld [vmem:[%s14441_s28] sm:$0xf] }
 0xe40   : > { %11340 = vmatmul.mubr.bf16.vlgmr.msra.gmra.mrb[40].mxu0 %v3865_v13 }
 0xe41   : > { %v3953_v15 = vpop.f32.mrb[42].mxu1  ;;  %11384 = vmatprep.mubr.msk.bf16.mxu0 %vm12874_vm3, %v12873_v46  ;;  %11369 = vmatpush3.bf16.msra.mxu0 %v12570_v27 }
 0xe42   : > { %v3957_v16 = vpack.c.bf16 %v3953_v15, %v3953_v15  ;;  %v11302_v11 = vpop.f32.mrb[43].mxu1  ;;  %11370 = vmatprep.subr.bf16.mxu0 %v12873_v46  ;;  %v12586_v15 = vld [vmem:[%s14442_s1] sm:$0xff]  }
 0xe43   : > { %v12590_v11 = vld [vmem:[%s14442_s1 + $0x10] sm:$0xff]  }
 0xe44   : > { %11320 = vmatmul.mubr.bf16.vlgmr.msra.gmra.mrb[44].mxu1 %v3957_v16  ;;  %v12588_v16 = vld [vmem:[%s14442_s1 + $0x8] sm:$0xff]  }
 0xe45   : > { %11344 = vmatpush3.msk.msra.mxu1 %vm3791_vm8, %v13529_v0  ;;  %11345 = vmatprep.mubr.msk.f32.mxu1 %vm12874_vm3, %v12873_v46 }
 0xe46   : > { %11348 = vmatprep.subr.bf16.mxu1 %v12873_v46  ;;  %11371 = vmatpush3.bf16.msra.mxu0 %v12572_v28 }
 0xe47   : > { %11372 = vmatprep.subr.bf16.mxu0 %v12873_v46 }
 0xe4a   : > { %11373 = vmatpush3.bf16.msra.mxu0 %v12574_v29  ;;  %v4716_v29 = vld [vmem:[%s14444_s10] sm:$0xf] }
 0xe4b   : > { %11374 = vmatprep.subr.bf16.mxu0 %v12873_v46 }
 0xe4c   : > { %11346 = vmatmul.mubr.msk.f32.vlgmr.msra.gmra.mrb[48].mxu1 %vm3787_vm9, %v9707_v17  ;;  %v12592_v17 = vld [vmem:[%s14442_s1 + $0x18] sm:$0xff]  }
 0xe4d   : > { %11349 = vmatpush3.bf16.msra.mxu1 %v12562_v18  ;;  %11364 = vmatprep.mubr.msk.bf16.mxu1 %vm12874_vm3, %v12873_v46  ;;  %v12594_v18 = vld [vmem:[%s14442_s1 + $0x20] sm:$0xff]  }
 0xe4e   : > { %11350 = vmatprep.subr.bf16.mxu1 %v12873_v46  ;;  %11375 = vmatpush3.bf16.msra.mxu0 %v12576_v30  ;;  %v12587_v30 = vld [vmem:[%s14445_s18] sm:$0xff]  }
 0xe4f   : > { %11376 = vmatprep.subr.bf16.mxu0 %v12873_v46 }
 0xe51   : > { %11351 = vmatpush3.bf16.msra.mxu1 %v12563_v19  ;;  %v12596_v19 = vld [vmem:[%s14442_s1 + $0x28] sm:$0xff]  }
 0xe52   : > { %11352 = vmatprep.subr.bf16.mxu1 %v12873_v46  ;;  %11377 = vmatpush3.bf16.msra.mxu0 %v12578_v31  ;;  %v12589_v31 = vld [vmem:[%s14445_s18 + $0x8] sm:$0xff]  }
 0xe53   : > { %11378 = vmatprep.subr.bf16.mxu0 %v12873_v46 }
 0xe55   : > { %11353 = vmatpush3.bf16.msra.mxu1 %v12564_v20  ;;  %v12598_v20 = vld [vmem:[%s14442_s1 + $0x30] sm:$0xff]  }
 0xe56   : > { %11354 = vmatprep.subr.bf16.mxu1 %v12873_v46  ;;  %11379 = vmatpush3.bf16.msra.mxu0 %v12580_v32  ;;  %v12591_v32 = vld [vmem:[%s14445_s18 + $0x10] sm:$0xff]  }
 0xe57   : > { %11380 = vmatprep.subr.bf16.mxu0 %v12873_v46 }
 0xe59   : > { %11355 = vmatpush3.bf16.msra.mxu1 %v12565_v21 }
 0xe5a   : > { %11356 = vmatprep.subr.bf16.mxu1 %v12873_v46  ;;  %11381 = vmatpush3.bf16.msra.mxu0 %v12582_v56  ;;  %v12609_v56 = vld [vmem:[%s14442_s1 + $0x60] sm:$0xff]  }
 0xe5b   : > { %11382 = vmatprep.subr.bf16.mxu0 %v12873_v46 }
 0xe5d   : > { %11357 = vmatpush3.bf16.msra.mxu1 %v12566_v22 }
 0xe5e   : > { %11358 = vmatprep.subr.bf16.mxu1 %v12873_v46  ;;  %11383 = vmatpush3.bf16.msra.mxu0 %v12584_v58  ;;  %v12608_v58 = vld [vmem:[%s14445_s18 + $0x50] sm:$0xff]  }
 0xe5f   : > { %11408 = vmatprep.subr.mxu0 %v12873_v46 }
 0xe61   : > { %11359 = vmatpush3.bf16.msra.mxu1 %v12567_v23 }
 0xe62   : > { %11360 = vmatprep.subr.bf16.mxu1 %v12873_v46 }
 0xe65   : > { %11361 = vmatpush3.bf16.msra.mxu1 %v12568_v24  ;;  %v9772_v24 = vld [vmem:[%s14443_s7] ss:$0 sm:$0xff]  ;;  %s14447_s7 = sld [smem:[#allocation17_spill]] }
 0xe66   : > { %11362 = vmatprep.subr.bf16.mxu1 %v12873_v46 }
 0xe69   : > { %11363 = vmatpush3.bf16.msra.mxu1 %v12569_v26 }
 0xe6a   : > { %11388 = vmatprep.subr.bf16.mxu1 %v12873_v46 }
 0xf13   : > { %v4145_v33 = vpop.f32.mrb[40].mxu0 }
 0xf14   : > { %v11341_v34 = vpop.f32.mrb[41].mxu0 }
 0xf15   : > { %v4148_v35 = vpop.f32.mrb[42].mxu0  ;;  %v12595_v34 = vld [vmem:[%s14445_s18 + $0x20] sm:$0xff]  }
 0xf16   : > { %v11342_v36 = vpop.f32.mrb[43].mxu0  ;;  %v12597_v35 = vld [vmem:[%s14445_s18 + $0x28] sm:$0xff]  }
 0xf17   : > { %v4057_v38 = vpop.f32.mrb[44].mxu1  ;;  %v12599_v36 = vld [vmem:[%s14445_s18 + $0x30] sm:$0xff]  }
 0xf18   : > { %v4146_v40 = vadd.f32 %v4145_v33, %v4057_v38  ;;  %v11321_v42 = vpop.f32.mrb[45].mxu1  ;;  %v12593_v33 = vld [vmem:[%s14445_s18 + $0x18] sm:$0xff]  }
 0xf19   : > { %v4060_v41 = vpop.f32.mrb[46].mxu1  ;;  %v12600_v38 = vld [vmem:[%s14442_s1 + $0x38] sm:$0xff]  }
 0xf1a   : > { %v11322_v43 = vpop.f32.mrb[47].mxu1  ;;  %v12602_v41 = vld [vmem:[%s14442_s1 + $0x40] sm:$0xff]  }
 0xf1f   : > { %v4222_v44 = vpop.f32.mrb[48].mxu1 }
 0xf20   : > { %v4226_v48 = vpack.c.bf16 %v4222_v44, %v4222_v44  ;;  %v11347_v50 = vpop.f32.mrb[49].mxu1 }
 0xf22   : > { %11365 = vmatmul.mubr.bf16.vlgmr.msra.gmra.mrb[52].mxu1 %v4226_v48 }
 0xf23   : > { %11389 = vmatpush3.bf16.msra.mxu1 %v12571_v45  ;;  %11404 = vmatprep.mubr.msk.bf16.mxu1 %vm12874_vm3, %v12873_v46 }
 0xf24   : > { %11390 = vmatprep.subr.bf16.mxu1 %v12873_v46 }
 0xf27   : > { %11391 = vmatpush3.bf16.msra.mxu1 %v12573_v51  ;;  %v12603_v51 = vld [vmem:[%s14442_s1 + $0x48] sm:$0xff]  }
 0xf28   : > { %11392 = vmatprep.subr.bf16.mxu1 %v12873_v46 }
 0xf2b   : > { %11393 = vmatpush3.bf16.msra.mxu1 %v12575_v52  ;;  %v12605_v52 = vld [vmem:[%s14442_s1 + $0x50] sm:$0xff]  }
 0xf2c   : > { %11394 = vmatprep.subr.bf16.mxu1 %v12873_v46 }
 0xf2f   : > { %11395 = vmatpush3.bf16.msra.mxu1 %v12577_v53  ;;  %v9793_v53 = vld [vmem:[%s14444_s10 + $0x4] sm:$0xf] }
 0xf30   : > { %11396 = vmatprep.subr.bf16.mxu1 %v12873_v46 }
 0xf33   : > { %11397 = vmatpush3.bf16.msra.mxu1 %v12579_v54  ;;  %v12607_v54 = vld [vmem:[%s14442_s1 + $0x58] sm:$0xff]  }
 0xf34   : > { %11398 = vmatprep.subr.bf16.mxu1 %v12873_v46 }
 0xf37   : > { %11399 = vmatpush3.bf16.msra.mxu1 %v12581_v55  ;;  %v12604_v55 = vld [vmem:[%s14445_s18 + $0x40] sm:$0xff]  }
 0xf38   : > { %11400 = vmatprep.subr.bf16.mxu1 %v12873_v46 }
 0xf3b   : > { %11401 = vmatpush3.bf16.msra.mxu1 %v12583_v57  ;;  %v12606_v57 = vld [vmem:[%s14445_s18 + $0x48] sm:$0xff]  }
 0xf3c   : > { %11402 = vmatprep.subr.bf16.mxu1 %v12873_v46 }
 0xf3f   : > { %11403 = vmatpush3.bf16.msra.mxu1 %v12585_v59  ;;  %v12610_v59 = vld [vmem:[%s14445_s18 + $0x58] sm:$0xff]  }
 0xf40   : > { %11448 = vmatprep.subr.bf16.mxu1 %v12873_v46 }
 0xff5   : > { %v4326_v60 = vpop.f32.mrb[52].mxu1 }
 0xff6   : > { %v4332_v62 = vadd.f32 %v4326_v60, %v4146_v40  ;;  %v11366_v49 = vpop.f32.mrb[53].mxu1  ;;  %v12601_v40 = vld [vmem:[%s14445_s18 + $0x38] sm:$0xff]   ;;  %v12611_v60 = vld [vmem:[%s14442_s1 + $0x68] sm:$0xff]  }
 0xff7   : > { %v4329_v47 = vpop.f32.mrb[54].mxu1  ;;  %v12614_v49 = vld [vmem:[%s14445_s18 + $0x68] sm:$0xff]  }
 0xff8   : > { %v4340_v63 = vadd.f32 %v9734_v61, %v4332_v62  ;;  %v11367_v1 = vpop.f32.mrb[55].mxu1  ;;  %v12612_v61 = vld [vmem:[%s14445_s18 + $0x60] sm:$0xff]   ;;  %v12613_v62 = vld [vmem:[%s14442_s1 + $0x70] sm:$0xff]   ;;  %v12615_v47 = vld [vmem:[%s14442_s1 + $0x78] sm:$0xff]  }
 0xff9   : > { %v12617_v1 = vld [vmem:[%s14445_s18 + $0x78] sm:$0xff]  }
 0xffa   : > { %v4341_v2 = vpack.c.bf16 %v4340_v63, %v4340_v63  ;;  %v12616_v63 = vld [vmem:[%s14445_s18 + $0x70] sm:$0xff]  }
 0xffc   : > { %11385 = vmatmul.mubr.bf16.vlgmr.msra.gmra.mrb[44].mxu0 %v4341_v2  ;;  %11405 = vmatmul.mubr.bf16.vlgmr.msra.gmra.mrb[56].mxu1 %v4341_v2 }
 0xffd   : > { %11410 = vmatprep.mubr.msk.f32.mxu0 %vm12874_vm3, %v12873_v46  ;;  %11464 = vmatprep.mubr.msk.bf16.mxu1 %vm12874_vm3, %v12873_v46 }
 0xffe   : > { %11449 = vmatpush3.bf16.msra.mxu1 %v12586_v15 }
 0xfff   : > { %11450 = vmatprep.subr.bf16.mxu1 %v12873_v46 }
0x1002   : > { %11451 = vmatpush3.bf16.msra.mxu1 %v12588_v16 }
0x1003   : > { %11452 = vmatprep.subr.bf16.mxu1 %v12873_v46 }
0x1006   : > { %11453 = vmatpush3.bf16.msra.mxu1 %v12590_v11 }
0x1007   : > { %11454 = vmatprep.subr.bf16.mxu1 %v12873_v46 }
0x100a   : > { %11455 = vmatpush3.bf16.msra.mxu1 %v12592_v17 }
0x100b   : > { %11456 = vmatprep.subr.bf16.mxu1 %v12873_v46 }
0x100e   : > { %11457 = vmatpush3.bf16.msra.mxu1 %v12594_v18  ;;  %v9846_v18 = vld [vmem:[%s14444_s10 + $0x8] sm:$0xf] }
0x100f   : > { %11458 = vmatprep.subr.bf16.mxu1 %v12873_v46 }
0x1012   : > { %11459 = vmatpush3.bf16.msra.mxu1 %v12596_v19  ;;  %v12618_v19 = vld [vmem:[%s14442_s1 + $0x80] sm:$0xff]  }
0x1013   : > { %11460 = vmatprep.subr.bf16.mxu1 %v12873_v46 }
0x1016   : > { %11461 = vmatpush3.bf16.msra.mxu1 %v12598_v20  ;;  %v12619_v20 = vld [vmem:[%s14442_s1 + $0x88] sm:$0xff]  }
0x1017   : > { %11462 = vmatprep.subr.bf16.mxu1 %v12873_v46 }
0x101a   : > { %11463 = vmatpush3.bf16.msra.mxu1 %v12600_v38 }
0x101b   : > { %11478 = vmatprep.subr.bf16.mxu1 %v12873_v46 }
0x10cf   : > { %v4440_v4 = vpop.f32.mrb[44].mxu0  ;;  %v4546_v5 = vpop.f32.mrb[56].mxu1 }
0x10d0   : > { %v11386_v8 = vpop.f32.mrb[45].mxu0  ;;  %v11406_v9 = vpop.f32.mrb[57].mxu1  ;;  %11409 = vmatpush3.msk.msra.mxu0 %vm4558_vm10, %v4546_v5 }
0x10d1   : > { %v4443_v10 = vpop.f32.mrb[46].mxu0  ;;  %v4549_v12 = vpop.f32.mrb[58].mxu1  ;;  %11411 = vmatmul.mubr.msk.f32.vlgmr.msra.gmra.mrb[48].mxu0 %vm4554_vm11, %v9767_v3  ;;  %11413 = vmatprep.subr.mxu0 %v12873_v46 }
0x10d2   : > { %v11387_v6 = vpop.f32.mrb[47].mxu0  ;;  %v11407_v13 = vpop.f32.mrb[59].mxu1  ;;  %11414 = vmatpush3.msk.msra.mxu0 %vm4558_vm10, %v4440_v4  ;;  %11415 = vmatprep.mubr.msk.f32.mxu0 %vm12874_vm3, %v12873_v46 }
0x10d3   : > { %11418 = vmatprep.subr.mxu0 %v12873_v46 }
0x10d5   : > { %11416 = vmatmul.mubr.msk.f32.vlgmr.msra.gmra.mrb[50].mxu0 %vm4554_vm11, %v4446_v14 }
0x10d6   : > { %11420 = vmatprep.mubr.msk.f32.mxu0 %vm12874_vm3, %v12873_v46 }
0x11a4   : > { %v4628_v21 = vpop.f32.mrb[48].mxu0 }
0x11a5   : > { %v11412_v22 = vpop.f32.mrb[49].mxu0 }
0x11a6   : > { %v12622_v22 = vld [vmem:[%s14445_s18 + $0x88] sm:$0xff]  }
0x11a8   : > { %v4704_v23 = vpop.f32.mrb[50].mxu0 }
0x11a9   : > { %v4705_v26 = vadd.f32 %v4704_v23, %v4628_v21  ;;  %v11417_v27 = vpop.f32.mrb[51].mxu0  ;;  %v12620_v21 = vld [vmem:[%s14445_s18 + $0x80] sm:$0xff]   ;;  %v12623_v23 = vld [vmem:[%s14442_s1 + $0x98] sm:$0xff]  }
0x11aa   : > { %v12626_v27 = vld [vmem:[%s14445_s18 + $0x98] sm:$0xff]  }
0x11ab   : > { %v13654_v28 = vadd.f32 %v9772_v24, %v4705_v26  ;;  %v12624_v24 = vld [vmem:[%s14445_s18 + $0x90] sm:$0xff]   ;;  %v12625_v26 = vld [vmem:[%s14442_s1 + $0xa0] sm:$0xff]  }
0x11ad   : > { %11419 = vmatpush3.msk.msra.mxu0 %vm3791_vm8, %v13654_v28 }
0x11ae   : > { %11421 = vmatmul.mubr.msk.f32.vlgmr.msra.gmra.mrb[52].mxu0 %vm3787_vm9, %v4716_v29  ;;  %11423 = vmatprep.subr.mxu0 %v12873_v46 }
0x11af   : > { %11424 = vmatpush3.msk.msra.mxu0 %vm3791_vm8, %v13529_v0  ;;  %11425 = vmatprep.mubr.msk.f32.mxu0 %vm12874_vm3, %v12873_v46 }
0x11b0   : > { %11428 = vmatprep.subr.bf16.mxu0 %v12873_v46 }
0x11b2   : > { %11426 = vmatmul.mubr.msk.f32.vlgmr.msra.gmra.mrb[54].mxu0 %vm3787_vm9, %v4716_v29  ;;  %v12628_v29 = vld [vmem:[%s14445_s18 + $0xa0] sm:$0xff]  }
0x11b3   : > { %11429 = vmatpush3.bf16.msra.mxu0 %v12587_v30  ;;  %11444 = vmatprep.mubr.msk.bf16.mxu0 %vm12874_vm3, %v12873_v46  ;;  %v12629_v30 = vld [vmem:[%s14442_s1 + $0xb0] sm:$0xff]  }
0x11b4   : > { %11430 = vmatprep.subr.bf16.mxu0 %v12873_v46 }
0x11b7   : > { %11431 = vmatpush3.bf16.msra.mxu0 %v12589_v31  ;;  %v12630_v31 = vld [vmem:[%s14445_s18 + $0xa8] sm:$0xff]  }
0x11b8   : > { %11432 = vmatprep.subr.bf16.mxu0 %v12873_v46 }
0x11bb   : > { %11433 = vmatpush3.bf16.msra.mxu0 %v12591_v32  ;;  %v12631_v32 = vld [vmem:[%s14442_s1 + $0xb8] sm:$0xff]  }
0x11bc   : > { %11434 = vmatprep.subr.bf16.mxu0 %v12873_v46 }
0x11bf   : > { %11435 = vmatpush3.bf16.msra.mxu0 %v12593_v33  ;;  %v12632_v33 = vld [vmem:[%s14445_s18 + $0xb0] sm:$0xff]  }
0x11c0   : > { %11436 = vmatprep.subr.bf16.mxu0 %v12873_v46 }
0x11c3   : > { %11437 = vmatpush3.bf16.msra.mxu0 %v12595_v34  ;;  %v12633_v34 = vld [vmem:[%s14445_s18 + $0xb8] sm:$0xff]  }
0x11c4   : > { %11438 = vmatprep.subr.bf16.mxu0 %v12873_v46 }
0x11c7   : > { %11439 = vmatpush3.bf16.msra.mxu0 %v12597_v35 }
0x11c8   : > { %11440 = vmatprep.subr.bf16.mxu0 %v12873_v46 }
0x11cb   : > { %11441 = vmatpush3.bf16.msra.mxu0 %v12599_v36 }
0x11cc   : > { %11442 = vmatprep.subr.bf16.mxu0 %v12873_v46 }
0x11cf   : > { %11443 = vmatpush3.bf16.msra.mxu0 %v12601_v40 }
0x11d0   : > { %11468 = vmatprep.subr.mxu0 %v12873_v46 }
0x1281   : > { %v4789_v42 = vpop.f32.mrb[52].mxu0 }
0x1282   : > { %v4863_v43 = vpack.c.bf16 %v4789_v42, %v4789_v42  ;;  %v11422_v44 = vpop.f32.mrb[53].mxu0 }
0x1284   : > { %11465 = vmatmul.mubr.bf16.vlgmr.msra.gmra.mrb[60].mxu1 %v4863_v43 }
0x1285   : > { %v4859_v45 = vpop.f32.mrb[54].mxu0  ;;  %11479 = vmatpush3.bf16.msra.mxu1 %v12602_v41  ;;  %11494 = vmatprep.mubr.msk.bf16.mxu1 %vm12874_vm3, %v12873_v46 }
0x1286   : > { %v4880_v48 = vpack.c.bf16 %v4859_v45, %v4859_v45  ;;  %v11427_v50 = vpop.f32.mrb[55].mxu0  ;;  %11480 = vmatprep.subr.bf16.mxu1 %v12873_v46  ;;  %v5799_v45 = vld [vmem:[%s14446_s26] sm:$0xff] }
0x1288   : > { %11445 = vmatmul.mubr.bf16.vlgmr.msra.gmra.mrb[56].mxu0 %v4880_v48  ;;  %v5800_v48 = vld [vmem:[%s14446_s26 + $0x8] sm:$0xff] }
0x1289   : > { %11469 = vmatpush3.msk.msra.mxu0 %vm3791_vm8, %v13654_v28  ;;  %11470 = vmatprep.mubr.msk.f32.mxu0 %vm12874_vm3, %v12873_v46 }
0x128a   : > { %11473 = vmatprep.subr.mxu0 %v12873_v46  ;;  %11481 = vmatpush3.bf16.msra.mxu1 %v12603_v51 }
0x128b   : > { %11482 = vmatprep.subr.bf16.mxu1 %v12873_v46 }
0x128e   : > { %11483 = vmatpush3.bf16.msra.mxu1 %v12605_v52 }
0x128f   : > { %11484 = vmatprep.subr.bf16.mxu1 %v12873_v46 }
0x1290   : > { %11471 = vmatmul.mubr.msk.f32.vlgmr.msra.gmra.mrb[60].mxu0 %vm3787_vm9, %v9793_v53 }
0x1291   : > { %11474 = vmatpush3.msk.msra.mxu0 %vm3791_vm8, %v13529_v0  ;;  %11475 = vmatprep.mubr.msk.f32.mxu0 %vm12874_vm3, %v12873_v46 }
0x1292   : > { %11498 = vmatprep.subr.bf16.mxu0 %v12873_v46  ;;  %11485 = vmatpush3.bf16.msra.mxu1 %v12607_v54 }
0x1293   : > { %11486 = vmatprep.subr.bf16.mxu1 %v12873_v46 }
0x1294   : > { %11476 = vmatmul.mubr.msk.f32.vlgmr.msra.gmra.mrb[62].mxu0 %vm3787_vm9, %v9793_v53  ;;  %v12302_v53 = vpack.c.bf16 %v5800_v48, %v5799_v45 }
0x1295   : > { %11499 = vmatpush3.bf16.msra.mxu0 %v12604_v55  ;;  %11514 = vmatprep.mubr.msk.bf16.mxu0 %vm12874_vm3, %v12873_v46 }
0x1296   : > { %11500 = vmatprep.subr.bf16.mxu0 %v12873_v46  ;;  %11487 = vmatpush3.bf16.msra.mxu1 %v12609_v56  ;;  %v5801_v56 = vld [vmem:[%s14446_s26 + $0x10] sm:$0xff] }
0x1297   : > { %11488 = vmatprep.subr.bf16.mxu1 %v12873_v46 }
0x1299   : > { %11501 = vmatpush3.bf16.msra.mxu0 %v12606_v57  ;;  %v5802_v57 = vld [vmem:[%s14446_s26 + $0x18] sm:$0xff] }
0x129a   : > { %11502 = vmatprep.subr.bf16.mxu0 %v12873_v46  ;;  %11489 = vmatpush3.bf16.msra.mxu1 %v12611_v60 }
0x129b   : > { %11490 = vmatprep.subr.bf16.mxu1 %v12873_v46 }
0x129d   : > { %11503 = vmatpush3.bf16.msra.mxu0 %v12608_v58 }
0x129e   : > { %11504 = vmatprep.subr.bf16.mxu0 %v12873_v46  ;;  %11491 = vmatpush3.bf16.msra.mxu1 %v12613_v62  ;;  %v5803_v62 = vld [vmem:[%s14446_s26 + $0x20] sm:$0xff] }
0x129f   : > { %11492 = vmatprep.subr.bf16.mxu1 %v12873_v46 }
0x12a1   : > { %11505 = vmatpush3.bf16.msra.mxu0 %v12610_v59  ;;  %v12305_v59 = vpack.c.bf16 %v5802_v57, %v5801_v56  ;;  %v12635_v57 = vld [vmem:[%s14448_s2 + $0x40] sm:$0xff]  }
0x12a2   : > { %11506 = vmatprep.subr.bf16.mxu0 %v12873_v46  ;;  %11493 = vmatpush3.bf16.msra.mxu1 %v12615_v47 }
0x12a3   : > { %11518 = vmatprep.subr.mxu1 %v12873_v46 }
0x12a5   : > { %11507 = vmatpush3.bf16.msra.mxu0 %v12612_v61 }
0x12a6   : > { %11508 = vmatprep.subr.bf16.mxu0 %v12873_v46 }
0x12a9   : > { %11509 = vmatpush3.bf16.msra.mxu0 %v12614_v49  ;;  %v5804_v49 = vld [vmem:[%s14446_s26 + $0x28] sm:$0xff] }
0x12aa   : > { %11510 = vmatprep.subr.bf16.mxu0 %v12873_v46  ;;  %v12308_v47 = vpack.c.bf16 %v5804_v49, %v5803_v62  ;;  %v12639_v62 = vld [vmem:[%s14448_s2 + $0x50] sm:$0xff]   ;;  %v12640_v49 = vld [vmem:[%s14448_s2 + $0x18] sm:$0xff]  }
0x12ad   : > { %11511 = vmatpush3.bf16.msra.mxu0 %v12616_v63  ;;  %v5805_v63 = vld [vmem:[%s14446_s26 + $0x30] sm:$0xff] }
0x12ae   : > { %11512 = vmatprep.subr.bf16.mxu0 %v12873_v46 }
0x12b1   : > { %11513 = vmatpush3.bf16.msra.mxu0 %v12617_v1  ;;  %v5806_v1 = vld [vmem:[%s14446_s26 + $0x38] sm:$0xff] }
0x12b2   : > { %11523 = vmatprep.subr.mxu0 %v12873_v46 }
0x1357   : > { %v5067_v2 = vpop.f32.mrb[60].mxu1 }
0x1358   : > { %v11466_v3 = vpop.f32.mrb[61].mxu1 }
0x1359   : > { %v5070_v4 = vpop.f32.mrb[62].mxu1  ;;  %v5807_v3 = vld [vmem:[%s14446_s26 + $0x40] sm:$0xff] }
0x135a   : > { %v11467_v5 = vpop.f32.mrb[63].mxu1  ;;  %v5808_v4 = vld [vmem:[%s14446_s26 + $0x48] sm:$0xff] }
0x135b   : > { %v4979_v8 = vpop.f32.mrb[56].mxu0  ;;  %v12314_v5 = vpack.c.bf16 %v5808_v4, %v5807_v3  ;;  %v12645_v3 = vld [vmem:[%s14448_s2 + $0x68] sm:$0xff]   ;;  %v12646_v4 = vld [vmem:[%s14448_s2 + $0x30] sm:$0xff]  }
0x135c   : > { %v13736_v9 = vadd.f32 %v5067_v2, %v4979_v8  ;;  %v11446_v10 = vpop.f32.mrb[57].mxu0  ;;  %v12311_v2 = vpack.c.bf16 %v5806_v1, %v5805_v63  ;;  %v5809_v8 = vld [vmem:[%s14446_s26 + $0x50] sm:$0xff]  ;;  %v12642_v63 = vld [vmem:[%s14448_s2 + $0x20] sm:$0xff]  }
0x135d   : > { %v4982_v12 = vpop.f32.mrb[58].mxu0  ;;  %v12643_v1 = vld [vmem:[%s14448_s2 + $0x60] sm:$0xff]  }
0x135e   : > { %v11447_v6 = vpop.f32.mrb[59].mxu0  ;;  %v5811_v12 = vld [vmem:[%s14446_s26 + $0x60] sm:$0xff] }
0x135f   : > { %v5812_v6 = vld [vmem:[%s14446_s26 + $0x68] sm:$0xff] }
0x1363   : > { %v5144_v13 = vpop.f32.mrb[60].mxu0 }
0x1364   : > { %v5218_v14 = vpack.c.bf16 %v5144_v13, %v5144_v13  ;;  %v11472_v15 = vpop.f32.mrb[61].mxu0  ;;  %v12320_v13 = vpack.c.bf16 %v5812_v6, %v5811_v12 }
0x1365   : > { %v5814_v15 = vld [vmem:[%s14446_s26 + $0x78] sm:$0xff] }
0x1366   : > { %11495 = vmatmul.mubr.bf16.vlgmr.msra.gmra.mrb[64].mxu1 %v5218_v14  ;;  %v5813_v14 = vld [vmem:[%s14446_s26 + $0x70] sm:$0xff] }
0x1367   : > { %11519 = vmatpush3.msk.msra.mxu1 %vm3791_vm8, %v13654_v28  ;;  %v5214_v16 = vpop.f32.mrb[62].mxu0  ;;  %11520 = vmatprep.mubr.msk.f32.mxu1 %vm12874_vm3, %v12873_v46  ;;  %v12627_v28 = vld [vmem:[%s14442_s1 + $0xa8] sm:$0xff]  }
0x1368   : > { %v5325_v11 = vpack.c.bf16 %v5214_v16, %v5214_v16  ;;  %v11477_v17 = vpop.f32.mrb[63].mxu0  ;;  %11528 = vmatprep.subr.bf16.mxu1 %v12873_v46  ;;  %v12323_v16 = vpack.c.bf16 %v5814_v15, %v5813_v14 }
0x136a   : > { %11515 = vmatmul.mubr.bf16.vlgmr.msra.gmra.mrb[64].mxu0 %v5325_v11 }
0x136b   : > { %11524 = vmatpush3.msk.msra.mxu0 %vm3791_vm8, %v13529_v0  ;;  %11525 = vmatprep.mubr.msk.f32.mxu0 %vm12874_vm3, %v12873_v46  ;;  %v12621_v0 = vld [vmem:[%s14442_s1 + $0x90] sm:$0xff]   ;;  %s14451_s1 = sld [smem:[#allocation21_spill]] }
0x136c   : > { %11548 = vmatprep.subr.bf16.mxu0 %v12873_v46 }
0x136e   : > { %11521 = vmatmul.mubr.msk.f32.vlgmr.msra.gmra.mrb[50].mxu1 %vm3787_vm9, %v9846_v18 }
0x136f   : > { %11529 = vmatpush3.bf16.msra.mxu1 %v12618_v19  ;;  %11544 = vmatprep.mubr.msk.bf16.mxu1 %vm12874_vm3, %v12873_v46 }
0x1370   : > { %11530 = vmatprep.subr.bf16.mxu1 %v12873_v46 }
0x1372   : > { %11526 = vmatmul.mubr.msk.f32.vlgmr.msra.gmra.mrb[68].mxu0 %vm3787_vm9, %v9846_v18 }
0x1373   : > { %11531 = vmatpush3.bf16.msra.mxu1 %v12619_v20  ;;  %11549 = vmatpush3.bf16.msra.mxu0 %v12620_v21 }
0x1374   : > { %11532 = vmatprep.subr.bf16.mxu1 %v12873_v46  ;;  %11550 = vmatprep.subr.bf16.mxu0 %v12873_v46 }
0x1375   : > { %11564 = vmatprep.mubr.msk.bf16.mxu0 %vm12874_vm3, %v12873_v46 }
0x1377   : > { %11533 = vmatpush3.bf16.msra.mxu1 %v12621_v0  ;;  %11551 = vmatpush3.bf16.msra.mxu0 %v12622_v22  ;;  %v9899_v0 = vld [vmem:[%s14447_s7] ss:$0 sm:$0xff]  ;;  %s14449_s7 = sld [smem:[#allocation19_spill]] }
0x1378   : > { %11534 = vmatprep.subr.bf16.mxu1 %v12873_v46  ;;  %11552 = vmatprep.subr.bf16.mxu0 %v12873_v46 }
0x137b   : > { %11535 = vmatpush3.bf16.msra.mxu1 %v12623_v23  ;;  %11553 = vmatpush3.bf16.msra.mxu0 %v12624_v24 }
0x137c   : > { %11536 = vmatprep.subr.bf16.mxu1 %v12873_v46  ;;  %11554 = vmatprep.subr.bf16.mxu0 %v12873_v46 }
0x137d   : > { %v9900_v15 = vld [vmem:[%s14449_s7] ss:$0 sm:$0xff]  ;;  %s14454_s7 = sld [smem:[#allocation23_spill]] }
0x137f   : > { %11537 = vmatpush3.bf16.msra.mxu1 %v12625_v26  ;;  %11555 = vmatpush3.bf16.msra.mxu0 %v12626_v27 }
0x1380   : > { %11538 = vmatprep.subr.bf16.mxu1 %v12873_v46  ;;  %11556 = vmatprep.subr.bf16.mxu0 %v12873_v46 }
0x1383   : > { %11539 = vmatpush3.bf16.msra.mxu1 %v12627_v28  ;;  %11557 = vmatpush3.bf16.msra.mxu0 %v12628_v29 }
0x1384   : > { %11540 = vmatprep.subr.bf16.mxu1 %v12873_v46  ;;  %11558 = vmatprep.subr.bf16.mxu0 %v12873_v46 }
0x1387   : > { %11541 = vmatpush3.bf16.msra.mxu1 %v12629_v30  ;;  %11559 = vmatpush3.bf16.msra.mxu0 %v12630_v31 }
0x1388   : > { %11542 = vmatprep.subr.bf16.mxu1 %v12873_v46  ;;  %11560 = vmatprep.subr.bf16.mxu0 %v12873_v46 }
0x138b   : > { %11543 = vmatpush3.bf16.msra.mxu1 %v12631_v32  ;;  %11561 = vmatpush3.bf16.msra.mxu0 %v12632_v33 }
0x138c   : > { %11562 = vmatprep.subr.bf16.mxu0 %v12873_v46  ;;  %12301 = vmatprep.subr.bf16.mxu1 %v12875_v25 }
0x138f   : > { %11563 = vmatpush3.bf16.msra.mxu0 %v12633_v34 }
0x1390   : > { %12325 = vmatprep.subr.bf16.mxu0 %v12875_v25 }
0x1439   : > { %v5318_v35 = vpop.f32.mrb[64].mxu1 }
0x143a   : > { %v5324_v36 = vadd.f32 %v5318_v35, %v13736_v9  ;;  %v11496_v38 = vpop.f32.mrb[65].mxu1  ;;  %v5810_v9 = vld [vmem:[%s14446_s26 + $0x58] sm:$0xff] }
0x143b   : > { %v5321_v40 = vpop.f32.mrb[66].mxu1  ;;  %v12317_v10 = vpack.c.bf16 %v5810_v9, %v5809_v8  ;;  %v5894_v38 = vlaneseq  ;;  %v12648_v8 = vld [vmem:[%s14448_s2 + $0x38] sm:$0xff]  }
0x143c   : > { %v11497_v42 = vpop.f32.mrb[67].mxu1  ;;  %v12649_v9 = vld [vmem:[%s14448_s2 + $0x78] sm:$0xff]  }
0x143d   : > { %v5425_v41 = vpop.f32.mrb[64].mxu0  ;;  %v5895_v40 = vshrl.u32 %v5894_v38, 7 }
0x143e   : > { %v13788_v43 = vadd.f32 %v5425_v41, %v5324_v36  ;;  %v11516_v44 = vpop.f32.mrb[65].mxu0  ;;  %v12634_v36 = vld [vmem:[%s14448_s2] sm:$0xff]  }
0x143f   : > { %v5428_v50 = vpop.f32.mrb[66].mxu0  ;;  %v13833_v42 = vsub.s32 0, %v5895_v40 }
0x1440   : > { %v11517_v51 = vpop.f32.mrb[67].mxu0 }
0x1441   : > { %v5503_v52 = vpop.f32.mrb[50].mxu1 }
0x1442   : > { %v5577_v54 = vpack.c.bf16 %v5503_v52, %v5503_v52  ;;  %v11522_v55 = vpop.f32.mrb[51].mxu1 }
0x1444   : > { %11545 = vmatmul.mubr.bf16.vlgmr.msra.gmra.mrb[68].mxu1 %v5577_v54 }
0x1445   : > { %v5573_v58 = vpop.f32.mrb[68].mxu0  ;;  %12303 = vmatpush3.bf16.msra.mxu1 %v12302_v53  ;;  %11600 = vmatprep.mubr.msk.f32.mxu1 %vm12874_vm3, %v12873_v46 }
0x1446   : > { %v5684_v60 = vpack.c.bf16 %v5573_v58, %v5573_v58  ;;  %v11527_v61 = vpop.f32.mrb[69].mxu0  ;;  %12304 = vmatprep.subr.bf16.mxu1 %v12875_v25 }
0x1447   : > { %v12638_v61 = vld [vmem:[%s14448_s2 + $0x10] sm:$0xff]  }
0x1448   : > { %11565 = vmatmul.mubr.bf16.vlgmr.msra.gmra.mrb[72].mxu0 %v5684_v60  ;;  %v12637_v60 = vld [vmem:[%s14448_s2 + $0x48] sm:$0xff]  }
0x1449   : > { %12306 = vmatpush3.bf16.msra.mxu1 %v12305_v59  ;;  %12327 = vmatpush3.bf16.msra.mxu0 %v12302_v53 }
0x144a   : > { %12307 = vmatprep.subr.bf16.mxu1 %v12875_v25  ;;  %12328 = vmatprep.subr.bf16.mxu0 %v12875_v25 }
0x144b   : > { %11635 = vmatprep.mubr.msk.f32.mxu0 %vm12874_vm3, %v12873_v46 }
0x144d   : > { %12330 = vmatpush3.bf16.msra.mxu0 %v12305_v59  ;;  %12309 = vmatpush3.bf16.msra.mxu1 %v12308_v47  ;;  %v12636_v59 = vld [vmem:[%s14448_s2 + $0x8] sm:$0xff]  }
0x144e   : > { %12331 = vmatprep.subr.bf16.mxu0 %v12875_v25  ;;  %12310 = vmatprep.subr.bf16.mxu1 %v12875_v25 }
0x1451   : > { %12333 = vmatpush3.bf16.msra.mxu0 %v12308_v47  ;;  %12312 = vmatpush3.bf16.msra.mxu1 %v12311_v2  ;;  %v12641_v47 = vld [vmem:[%s14448_s2 + $0x58] sm:$0xff]  }
0x1452   : > { %12334 = vmatprep.subr.bf16.mxu0 %v12875_v25  ;;  %12313 = vmatprep.subr.bf16.mxu1 %v12875_v25 }
0x1455   : > { %12336 = vmatpush3.bf16.msra.mxu0 %v12311_v2  ;;  %12315 = vmatpush3.bf16.msra.mxu1 %v12314_v5  ;;  %v12644_v2 = vld [vmem:[%s14448_s2 + $0x28] sm:$0xff]  }
0x1456   : > { %12337 = vmatprep.subr.bf16.mxu0 %v12875_v25  ;;  %12316 = vmatprep.subr.bf16.mxu1 %v12875_v25 }
0x1459   : > { %12339 = vmatpush3.bf16.msra.mxu0 %v12314_v5  ;;  %12318 = vmatpush3.bf16.msra.mxu1 %v12317_v10  ;;  %v12647_v5 = vld [vmem:[%s14448_s2 + $0x70] sm:$0xff]   ;;  %s14452_s2 = sld [smem:[#allocation24_spill]] }
0x145a   : > { %12340 = vmatprep.subr.bf16.mxu0 %v12875_v25  ;;  %12319 = vmatprep.subr.bf16.mxu1 %v12875_v25 }
0x145d   : > { %12342 = vmatpush3.bf16.msra.mxu0 %v12317_v10  ;;  %12321 = vmatpush3.bf16.msra.mxu1 %v12320_v13 }
0x145e   : > { %12343 = vmatprep.subr.bf16.mxu0 %v12875_v25  ;;  %12322 = vmatprep.subr.bf16.mxu1 %v12875_v25 }
0x1461   : > { %12345 = vmatpush3.bf16.msra.mxu0 %v12320_v13  ;;  %12324 = vmatpush3.bf16.msra.mxu1 %v12323_v16 }
0x1462   : > { %12346 = vmatprep.subr.bf16.mxu0 %v12875_v25  ;;  %11638 = vmatprep.subr.bf16.mxu1 %v12873_v46 }
0x1465   : > { %12348 = vmatpush3.bf16.msra.mxu0 %v12323_v16 }
0x1466   : > { %11658 = vmatprep.subr.bf16.mxu0 %v12873_v46 }
0x1517   : > { %v5677_v11 = vpop.f32.mrb[68].mxu1 }
0x1518   : > { %v5683_v17 = vadd.f32 %v5677_v11, %v13788_v43  ;;  %v11546_v18 = vpop.f32.mrb[69].mxu1  ;;  %v9901_v11 = vld [vmem:[%s14450_s0] ss:$0 sm:$0xff]  ;;  %s14453_s0 = sld [smem:[#allocation25_spill]] }
0x1519   : > { %v5680_v19 = vpop.f32.mrb[70].mxu1 }
0x151a   : > { %v11547_v20 = vpop.f32.mrb[71].mxu1 }
0x151b   : > { %v5784_v21 = vpop.f32.mrb[72].mxu0 }
0x151c   : > { %v5790_v22 = vadd.f32 %v5784_v21, %v5683_v17  ;;  %v11566_v23 = vpop.f32.mrb[73].mxu0 }
0x151d   : > { %v5787_v24 = vpop.f32.mrb[74].mxu0 }
0x151e   : > { %v5798_v26 = vadd.f32 %v9899_v0, %v5790_v22  ;;  %v11567_v27 = vpop.f32.mrb[75].mxu0  ;;  %v9934_v0 = vld [vmem:[%s14451_s1 + $0x8] sm:$0xff]  ;;  %v6108_v22 = vld [vmem:[%s14451_s1] sm:$0xff]  ;;  %s14455_s1 = sld [smem:[#allocation26_spill]] }
0x151f   : > { %v12662_v38 = vld [vmem:[%s14453_s0 + $0x20] sm:$0xff]   ;;  %v12663_v40 = vld [vmem:[%s14453_s0 + $0x28] sm:$0xff]  }
0x1520   : > { %v5815_v28 = vsel %vm3791_vm8, %v5798_v26, 0.0 }
0x1521   : > { %v5816_v29 = vrot.slane %v5815_v28, 4 }
0x1523   : > { %v5817_v30 = vadd.f32 %v5816_v29, %v5815_v28 }
0x1525   : > { %v5818_v31 = vrot.slane %v5817_v30, 2 }
0x1527   : > { %v5819_v32 = vadd.f32 %v5818_v31, %v5817_v30 }
0x1529   : > { %v5820_v33 = vrot.slane %v5819_v32, 1 }
0x152b   : > { %v5821_v34 = vadd.f32 %v5820_v33, %v5819_v32  ;;  %v6376_v32 = vld [vmem:[%s14452_s2] sm:$0xff] }
0x152c   : > { %v12658_v33 = vld [vmem:[%s14453_s0] sm:$0xff]  }
0x152d   : > { %v5823_v35 = vmul.f32 0.25, %v5821_v34  ;;  %v12659_v34 = vld [vmem:[%s14453_s0 + $0x8] sm:$0xff]  }
0x152f   : > { %11601 = vmatmul.mubr.f32.vlgmr.msra.gmra.mrb[72].mxu1 %v5823_v35  ;;  %v12660_v35 = vld [vmem:[%s14453_s0 + $0x10] sm:$0xff]  }
0x1530   : > { %11654 = vmatprep.mubr.msk.bf16.mxu1 %vm12874_vm3, %v12873_v46  ;;  %11639 = vmatpush3.bf16.msra.mxu1 %v12634_v36  ;;  %v12661_v36 = vld [vmem:[%s14453_s0 + $0x18] sm:$0xff]  }
0x1531   : > { %11640 = vmatprep.subr.bf16.mxu1 %v12873_v46 }
0x1534   : > { %11641 = vmatpush3.bf16.msra.mxu1 %v12636_v59  ;;  %v12653_v59 = vld [vmem:[%s14455_s1 + $0x18] sm:$0xff]  }
0x1535   : > { %11642 = vmatprep.subr.bf16.mxu1 %v12873_v46 }
0x1538   : > { %11643 = vmatpush3.bf16.msra.mxu1 %v12638_v61  ;;  %v12655_v61 = vld [vmem:[%s14455_s1 + $0x28] sm:$0xff]  }
0x1539   : > { %11644 = vmatprep.subr.bf16.mxu1 %v12873_v46 }
0x153c   : > { %11645 = vmatpush3.bf16.msra.mxu1 %v12640_v49  ;;  %v12657_v49 = vld [vmem:[%s14455_s1 + $0x38] sm:$0xff]  }
0x153d   : > { %11646 = vmatprep.subr.bf16.mxu1 %v12873_v46 }
0x1540   : > { %11647 = vmatpush3.bf16.msra.mxu1 %v12642_v63  ;;  %v9958_v63 = vld [vmem:[%s14452_s2 + $0x8] sm:$0xff] }
0x1541   : > { %11648 = vmatprep.subr.bf16.mxu1 %v12873_v46 }
0x1544   : > { %11649 = vmatpush3.bf16.msra.mxu1 %v12644_v2  ;;  %v12667_v2 = vld [vmem:[%s14453_s0 + $0x48] sm:$0xff]  }
0x1545   : > { %11650 = vmatprep.subr.bf16.mxu1 %v12873_v46 }
0x1548   : > { %11651 = vmatpush3.bf16.msra.mxu1 %v12646_v4  ;;  %v12669_v4 = vld [vmem:[%s14453_s0 + $0x58] sm:$0xff]  }
0x1549   : > { %11652 = vmatprep.subr.bf16.mxu1 %v12873_v46 }
0x154c   : > { %11653 = vmatpush3.bf16.msra.mxu1 %v12648_v8  ;;  %v12671_v8 = vld [vmem:[%s14453_s0 + $0x68] sm:$0xff]  }
0x154d   : > { %11678 = vmatprep.subr.mxu1 %v12873_v46 }
0x1602   : > { %v5890_v41 = vpop.f32.mrb[72].mxu1 }
0x1603   : > { %v5897_v43 = vrot.slane %v5890_v41, %v13833_v42  ;;  %v11602_v44 = vpop.f32.mrb[73].mxu1  ;;  %v12664_v41 = vld [vmem:[%s14453_s0 + $0x30] sm:$0xff]  }
0x1605   : > { %v13836_v45 = vsub.f32 %v5798_v26, %v5897_v43  ;;  %v12665_v43 = vld [vmem:[%s14453_s0 + $0x38] sm:$0xff]  }
0x1607   : > { %v5899_v48 = vmul.f32 %v13836_v45, %v13836_v45 }
0x1609   : > { %v5900_v50 = vsel %vm3791_vm8, %v5899_v48, 0.0  ;;  %v9939_v48 = vld [vmem:[%s14454_s7] ss:$0 sm:$0xff]  ;;  %s14456_s7 = sld [smem:[#allocation28_spill]] }
0x160a   : > { %v5901_v51 = vrot.slane %v5900_v50, 4 }
0x160c   : > { %v5902_v52 = vadd.f32 %v5901_v51, %v5900_v50 }
0x160e   : > { %v5903_v53 = vrot.slane %v5902_v52, 2 }
0x1610   : > { %v5904_v54 = vadd.f32 %v5903_v53, %v5902_v52 }
0x1612   : > { %v5905_v55 = vrot.slane %v5904_v54, 1 }
0x1614   : > { %v5906_v56 = vadd.f32 %v5905_v55, %v5904_v54  ;;  %v12650_v54 = vld [vmem:[%s14455_s1] sm:$0xff]  }
0x1616   : > { %v5907_v58 = vmul.f32 0.25, %v5906_v56 }
0x1618   : > { %11636 = vmatmul.mubr.f32.vlgmr.msra.gmra.mrb[70].mxu0 %v5907_v58  ;;  %v12652_v58 = vld [vmem:[%s14455_s1 + $0x10] sm:$0xff]  }
0x1619   : > { %11659 = vmatpush3.bf16.msra.mxu0 %v12635_v57  ;;  %11674 = vmatprep.mubr.msk.bf16.mxu0 %vm12874_vm3, %v12873_v46  ;;  %v12651_v57 = vld [vmem:[%s14455_s1 + $0x8] sm:$0xff]  }
0x161a   : > { %11660 = vmatprep.subr.bf16.mxu0 %v12873_v46 }
0x161d   : > { %11661 = vmatpush3.bf16.msra.mxu0 %v12637_v60  ;;  %v12654_v60 = vld [vmem:[%s14455_s1 + $0x20] sm:$0xff]  }
0x161e   : > { %11662 = vmatprep.subr.bf16.mxu0 %v12873_v46 }
0x1621   : > { %11663 = vmatpush3.bf16.msra.mxu0 %v12639_v62  ;;  %v12656_v62 = vld [vmem:[%s14455_s1 + $0x30] sm:$0xff]  }
0x1622   : > { %11664 = vmatprep.subr.bf16.mxu0 %v12873_v46 }
0x1625   : > { %11665 = vmatpush3.bf16.msra.mxu0 %v12641_v47 }
0x1626   : > { %11666 = vmatprep.subr.bf16.mxu0 %v12873_v46 }
0x1629   : > { %11667 = vmatpush3.bf16.msra.mxu0 %v12643_v1  ;;  %v12666_v1 = vld [vmem:[%s14453_s0 + $0x40] sm:$0xff]  }
0x162a   : > { %11668 = vmatprep.subr.bf16.mxu0 %v12873_v46 }
0x162d   : > { %11669 = vmatpush3.bf16.msra.mxu0 %v12645_v3  ;;  %v12668_v3 = vld [vmem:[%s14453_s0 + $0x50] sm:$0xff]  }
0x162e   : > { %11670 = vmatprep.subr.bf16.mxu0 %v12873_v46 }
0x1631   : > { %11671 = vmatpush3.bf16.msra.mxu0 %v12647_v5  ;;  %v12670_v5 = vld [vmem:[%s14453_s0 + $0x60] sm:$0xff]  }
0x1632   : > { %11672 = vmatprep.subr.bf16.mxu0 %v12873_v46 }
0x1635   : > { %11673 = vmatpush3.bf16.msra.mxu0 %v12649_v9  ;;  %v12672_v9 = vld [vmem:[%s14453_s0 + $0x70] sm:$0xff]  }
0x1636   : > { %11683 = vmatprep.subr.mxu0 %v12873_v46 }
0x16eb   : > { %v5974_v10 = vpop.f32.mrb[70].mxu0 }
0x16ec   : > { %v5975_v12 = vadd.f32 1e-05, %v5974_v10  ;;  %v11637_v6 = vpop.f32.mrb[71].mxu0  ;;  %v12673_v10 = vld [vmem:[%s14453_s0 + $0x78] sm:$0xff]  }
0x16ee   : > { %12778 = vrsqrt.f32 %v5975_v12 }
0x16f8   : > { %v12779_v13 = vpop.eup %12778 }
0x16f9   : > { %v5982_v14 = vrot.slane %v12779_v13, %v13833_v42 }
0x16fb   : > { %v5983_v16 = vmul.f32 %v5982_v14, %v13836_v45  ;;  %v12674_v14 = vld [vmem:[%s14455_s1 + $0x40] sm:$0xff]  }
0x16fd   : > { %v5991_v17 = vmul.f32 %v9900_v15, %v5983_v16  ;;  %v12675_v15 = vld [vmem:[%s14455_s1 + $0x48] sm:$0xff]   ;;  %v12676_v16 = vld [vmem:[%s14455_s1 + $0x50] sm:$0xff]  }
0x16ff   : > { %v5999_v18 = vadd.f32 %v9901_v11, %v5991_v17  ;;  %v12677_v11 = vld [vmem:[%s14455_s1 + $0x58] sm:$0xff]   ;;  %v12678_v17 = vld [vmem:[%s14455_s1 + $0x60] sm:$0xff]  }
0x1701   : > { %vm6000_vm12 = vcmp.ge.f32.partialorder %v5999_v18, 0.0  ;;  %v6001_v19 = vmul.f32 0.01, %v5999_v18 }
0x1703   : > { %v6002_v20 = vsel %vm6000_vm12, %v5999_v18, %v6001_v19  ;;  %v12679_v18 = vld [vmem:[%s14455_s1 + $0x68] sm:$0xff]  }
0x1704   : > { %v6003_v21 = vpack.c.bf16 %v6002_v20, %v6002_v20 }
0x1706   : > { %11655 = vmatmul.mubr.bf16.vlgmr.msra.gmra.mrb[76].mxu1 %v6003_v21  ;;  %11675 = vmatmul.mubr.bf16.vlgmr.msra.gmra.mrb[76].mxu0 %v6003_v21 }
0x1707   : > { %11680 = vmatprep.mubr.msk.f32.mxu1 %vm12874_vm3, %v12873_v46  ;;  %11685 = vmatprep.mubr.msk.f32.mxu0 %vm12874_vm3, %v12873_v46 }
0x17d9   : > { %v6102_v23 = vpop.f32.mrb[76].mxu1  ;;  %v6208_v24 = vpop.f32.mrb[76].mxu0 }
0x17da   : > { %v11656_v26 = vpop.f32.mrb[77].mxu1  ;;  %v11676_v27 = vpop.f32.mrb[77].mxu0  ;;  %11679 = vmatpush3.msk.msra.mxu1 %vm3791_vm8, %v6208_v24  ;;  %11684 = vmatpush3.msk.msra.mxu0 %vm3791_vm8, %v6102_v23 }
0x17db   : > { %v6105_v28 = vpop.f32.mrb[78].mxu1  ;;  %v6211_v29 = vpop.f32.mrb[78].mxu0  ;;  %11681 = vmatmul.mubr.msk.f32.vlgmr.msra.gmra.mrb[74].mxu1 %vm3787_vm9, %v9934_v0  ;;  %11686 = vmatmul.mubr.msk.f32.vlgmr.msra.gmra.mrb[80].mxu0 %vm3787_vm9, %v6108_v22  ;;  %v10009_v26 = vld [vmem:[%s14452_s2 + $0x10] sm:$0xff] }
0x17dc   : > { %11693 = vmatprep.subr.mxu0 %v12873_v46  ;;  %v11657_v30 = vpop.f32.mrb[79].mxu1  ;;  %v11677_v31 = vpop.f32.mrb[79].mxu0  ;;  %11695 = vmatprep.mubr.msk.f32.mxu0 %vm12874_vm3, %v12873_v46  ;;  %v12680_v27 = vld [vmem:[%s14455_s1 + $0x70] sm:$0xff]   ;;  %v12681_v28 = vld [vmem:[%s14455_s1 + $0x78] sm:$0xff]   ;;  %v12682_v29 = vld [vmem:[%s14453_s0 + $0x80] sm:$0xff]  }
0x17dd   : > { %11694 = vmatpush3.msra.mxu0 %v13454_v7  ;;  %11688 = vmatprep.subr.mxu1 %v12873_v46  ;;  %v12683_v30 = vld [vmem:[%s14453_s0 + $0x88] sm:$0xff]   ;;  %v12684_v31 = vld [vmem:[%s14453_s0 + $0x90] sm:$0xff]  }
0x17de   : > { %11690 = vmatprep.mubr.msk.f32.mxu1 %vm12874_vm3, %v12873_v46  ;;  %11718 = vmatprep.subr.bf16.mxu0 %v12873_v46 }
0x17df   : > { %11696 = vmatmul.mubr.msk.f32.vlgmr.msra.gmra.mrb[82].mxu0 %vm3236_vm7, %v6376_v32 }
0x17e0   : > { %11734 = vmatprep.mubr.msk.bf16.mxu0 %vm12874_vm3, %v12873_v46  ;;  %11719 = vmatpush3.bf16.msra.mxu0 %v12658_v33  ;;  %v12686_v33 = vld [vmem:[%s14453_s0 + $0xa0] sm:$0xff]  }
0x17e1   : > { %11720 = vmatprep.subr.bf16.mxu0 %v12873_v46 }
0x17e4   : > { %11721 = vmatpush3.bf16.msra.mxu0 %v12659_v34  ;;  %v12687_v34 = vld [vmem:[%s14453_s0 + $0xa8] sm:$0xff]  }
0x17e5   : > { %11722 = vmatprep.subr.bf16.mxu0 %v12873_v46 }
0x17e8   : > { %11723 = vmatpush3.bf16.msra.mxu0 %v12660_v35  ;;  %v12688_v35 = vld [vmem:[%s14453_s0 + $0xb0] sm:$0xff]  }
0x17e9   : > { %11724 = vmatprep.subr.bf16.mxu0 %v12873_v46 }
0x17ec   : > { %11725 = vmatpush3.bf16.msra.mxu0 %v12661_v36  ;;  %v12689_v36 = vld [vmem:[%s14453_s0 + $0xb8] sm:$0xff]  }
0x17ed   : > { %11726 = vmatprep.subr.bf16.mxu0 %v12873_v46 }
0x17f0   : > { %11727 = vmatpush3.bf16.msra.mxu0 %v12662_v38 }
0x17f1   : > { %11728 = vmatprep.subr.bf16.mxu0 %v12873_v46 }
0x17f4   : > { %11729 = vmatpush3.bf16.msra.mxu0 %v12663_v40 }
0x17f5   : > { %11730 = vmatprep.subr.bf16.mxu0 %v12873_v46 }
0x17f8   : > { %11731 = vmatpush3.bf16.msra.mxu0 %v12664_v41 }
0x17f9   : > { %11732 = vmatprep.subr.bf16.mxu0 %v12873_v46 }
0x17fc   : > { %11733 = vmatpush3.bf16.msra.mxu0 %v12665_v43 }
0x17fd   : > { %11743 = vmatprep.subr.mxu0 %v12873_v46 }
0x18ae   : > { %v6288_v44 = vpop.f32.mrb[74].mxu1  ;;  %v6364_v45 = vpop.f32.mrb[80].mxu0 }
0x18af   : > { %v6365_v50 = vadd.f32 %v6364_v45, %v6288_v44  ;;  %v11682_v51 = vpop.f32.mrb[75].mxu1  ;;  %v11687_v52 = vpop.f32.mrb[81].mxu0 }
0x18b0   : > { %v12690_v51 = vld [vmem:[%s14455_s1 + $0x80] sm:$0xff]   ;;  %v12691_v52 = vld [vmem:[%s14455_s1 + $0x88] sm:$0xff]  }
0x18b1   : > { %v13916_v53 = vadd.f32 %v9939_v48, %v6365_v50 }
0x18b2   : > { %v6516_v55 = vpop.f32.mrb[82].mxu0 }
0x18b3   : > { %11689 = vmatpush3.msra.mxu1 %v13916_v53  ;;  %v11697_v56 = vpop.f32.mrb[83].mxu0  ;;  %v6537_v47 = vpack.c.bf16 %v6516_v55, %v6516_v55 }
0x18b4   : > { %11691 = vmatmul.mubr.msk.f32.vlgmr.msra.gmra.mrb[80].mxu1 %vm3236_vm7, %v6376_v32  ;;  %11698 = vmatprep.subr.bf16.mxu1 %v12873_v46  ;;  %v12685_v32 = vld [vmem:[%s14453_s0 + $0x98] sm:$0xff]   ;;  %s14457_s0 = sld [smem:[#allocation27_spill]] }
0x18b5   : > { %11699 = vmatpush3.bf16.msra.mxu1 %v12650_v54  ;;  %11714 = vmatprep.mubr.msk.bf16.mxu1 %vm12874_vm3, %v12873_v46  ;;  %v12694_v54 = vld [vmem:[%s14455_s1 + $0xa0] sm:$0xff]  }
0x18b6   : > { %11700 = vmatprep.subr.bf16.mxu1 %v12873_v46 }
0x18b9   : > { %11701 = vmatpush3.bf16.msra.mxu1 %v12651_v57 }
0x18ba   : > { %11702 = vmatprep.subr.bf16.mxu1 %v12873_v46 }
0x18bd   : > { %11703 = vmatpush3.bf16.msra.mxu1 %v12652_v58 }
0x18be   : > { %11704 = vmatprep.subr.bf16.mxu1 %v12873_v46 }
0x18c1   : > { %11705 = vmatpush3.bf16.msra.mxu1 %v12653_v59 }
0x18c2   : > { %11706 = vmatprep.subr.bf16.mxu1 %v12873_v46 }
0x18c5   : > { %11707 = vmatpush3.bf16.msra.mxu1 %v12654_v60 }
0x18c6   : > { %11708 = vmatprep.subr.bf16.mxu1 %v12873_v46 }
0x18c9   : > { %11709 = vmatpush3.bf16.msra.mxu1 %v12655_v61 }
0x18ca   : > { %11710 = vmatprep.subr.bf16.mxu1 %v12873_v46 }
0x18cd   : > { %11711 = vmatpush3.bf16.msra.mxu1 %v12656_v62 }
0x18ce   : > { %11712 = vmatprep.subr.bf16.mxu1 %v12873_v46 }
0x18d1   : > { %11713 = vmatpush3.bf16.msra.mxu1 %v12657_v49  ;;  %v12695_v49 = vld [vmem:[%s14455_s1 + $0xa8] sm:$0xff]  }
0x18d2   : > { %11738 = vmatprep.subr.mxu1 %v12873_v46 }
0x18d4   : > { %11715 = vmatmul.mubr.bf16.vlgmr.msra.gmra.mrb[84].mxu1 %v6537_v47  ;;  %v12696_v47 = vld [vmem:[%s14455_s1 + $0xb0] sm:$0xff]  }
0x18d5   : > { %11739 = vmatpush3.msra.mxu1 %v13916_v53  ;;  %11740 = vmatprep.mubr.msk.f32.mxu1 %vm12874_vm3, %v12873_v46 }
0x18d6   : > { %11748 = vmatprep.subr.bf16.mxu1 %v12873_v46 }
0x18dc   : > { %11741 = vmatmul.mubr.msk.f32.vlgmr.msra.gmra.mrb[82].mxu1 %vm3236_vm7, %v9958_v63 }
0x18dd   : > { %11764 = vmatprep.mubr.msk.bf16.mxu1 %vm12874_vm3, %v12873_v46  ;;  %11749 = vmatpush3.bf16.msra.mxu1 %v12666_v1  ;;  %v7456_v1 = vld [vmem:[%s14456_s7] sm:$0xff] }
0x18de   : > { %11750 = vmatprep.subr.bf16.mxu1 %v12873_v46 }
0x18e1   : > { %11751 = vmatpush3.bf16.msra.mxu1 %v12667_v2  ;;  %v7457_v2 = vld [vmem:[%s14456_s7 + $0x8] sm:$0xff] }
0x18e2   : > { %11752 = vmatprep.subr.bf16.mxu1 %v12873_v46 }
0x18e5   : > { %11753 = vmatpush3.bf16.msra.mxu1 %v12668_v3  ;;  %v7458_v3 = vld [vmem:[%s14456_s7 + $0x10] sm:$0xff] }
0x18e6   : > { %11754 = vmatprep.subr.bf16.mxu1 %v12873_v46 }
0x18e9   : > { %11755 = vmatpush3.bf16.msra.mxu1 %v12669_v4  ;;  %v12350_v4 = vpack.c.bf16 %v7457_v2, %v7456_v1 }
0x18ea   : > { %11756 = vmatprep.subr.bf16.mxu1 %v12873_v46 }
0x18ed   : > { %11757 = vmatpush3.bf16.msra.mxu1 %v12670_v5  ;;  %v7459_v5 = vld [vmem:[%s14456_s7 + $0x18] sm:$0xff] }
0x18ee   : > { %11758 = vmatprep.subr.bf16.mxu1 %v12873_v46 }
0x18f1   : > { %11759 = vmatpush3.bf16.msra.mxu1 %v12671_v8  ;;  %v12353_v8 = vpack.c.bf16 %v7459_v5, %v7458_v3 }
0x18f2   : > { %11760 = vmatprep.subr.bf16.mxu1 %v12873_v46 }
0x18f5   : > { %11761 = vmatpush3.bf16.msra.mxu1 %v12672_v9  ;;  %v7460_v9 = vld [vmem:[%s14456_s7 + $0x20] sm:$0xff] }
0x18f6   : > { %11762 = vmatprep.subr.bf16.mxu1 %v12873_v46 }
0x18f9   : > { %11763 = vmatpush3.bf16.msra.mxu1 %v12673_v10  ;;  %v7461_v10 = vld [vmem:[%s14456_s7 + $0x28] sm:$0xff] }
0x18fa   : > { %11788 = vmatprep.subr.mxu1 %v12873_v46 }
0x1987   : > { %v6446_v12 = vpop.f32.mrb[80].mxu1 }
0x1988   : > { %v6520_v6 = vpack.c.bf16 %v6446_v12, %v6446_v12  ;;  %v11692_v13 = vpop.f32.mrb[81].mxu1  ;;  %v12356_v12 = vpack.c.bf16 %v7461_v10, %v7460_v9  ;;  %v12701_v9 = vld [vmem:[%s13085_s27 + $0x8] sm:$0xff]   ;;  %v12702_v10 = vld [vmem:[%s13085_s27 + $0x90] sm:$0xff]  }
0x198a   : > { %11735 = vmatmul.mubr.bf16.vlgmr.msra.gmra.mrb[84].mxu0 %v6520_v6 }
0x198b   : > { %11744 = vmatpush3.msra.mxu0 %v13454_v7  ;;  %11745 = vmatprep.mubr.msk.f32.mxu0 %vm12874_vm3, %v12873_v46 }
0x198c   : > { %11768 = vmatprep.subr.bf16.mxu0 %v12873_v46 }
0x1992   : > { %11746 = vmatmul.mubr.msk.f32.vlgmr.msra.gmra.mrb[88].mxu0 %vm3236_vm7, %v9958_v63  ;;  %v12697_v63 = vld [vmem:[%s14455_s1 + $0xb8] sm:$0xff]  }
0x1993   : > { %11769 = vmatpush3.bf16.msra.mxu0 %v12674_v14  ;;  %11784 = vmatprep.mubr.msk.bf16.mxu0 %vm12874_vm3, %v12873_v46 }
0x1994   : > { %11770 = vmatprep.subr.bf16.mxu0 %v12873_v46 }
0x1997   : > { %11771 = vmatpush3.bf16.msra.mxu0 %v12675_v15 }
0x1998   : > { %11772 = vmatprep.subr.bf16.mxu0 %v12873_v46 }
0x199b   : > { %11773 = vmatpush3.bf16.msra.mxu0 %v12676_v16 }
0x199c   : > { %11774 = vmatprep.subr.bf16.mxu0 %v12873_v46 }
0x199f   : > { %11775 = vmatpush3.bf16.msra.mxu0 %v12677_v11 }
0x19a0   : > { %11776 = vmatprep.subr.bf16.mxu0 %v12873_v46 }
0x19a3   : > { %11777 = vmatpush3.bf16.msra.mxu0 %v12678_v17 }
0x19a4   : > { %11778 = vmatprep.subr.bf16.mxu0 %v12873_v46 }
0x19a7   : > { %v6636_v19 = vpop.f32.mrb[84].mxu1  ;;  %11779 = vmatpush3.bf16.msra.mxu0 %v12679_v18 }
0x19a8   : > { %v11716_v20 = vpop.f32.mrb[85].mxu1  ;;  %11780 = vmatprep.subr.bf16.mxu0 %v12873_v46 }
0x19a9   : > { %v6639_v21 = vpop.f32.mrb[86].mxu1 }
0x19aa   : > { %v11717_v0 = vpop.f32.mrb[87].mxu1 }
0x19ab   : > { %11781 = vmatpush3.bf16.msra.mxu0 %v12680_v27  ;;  %v7464_v27 = vld [vmem:[%s14456_s7 + $0x40] sm:$0xff] }
0x19ac   : > { %11782 = vmatprep.subr.bf16.mxu0 %v12873_v46 }
0x19af   : > { %v6801_v22 = vpop.f32.mrb[82].mxu1  ;;  %11783 = vmatpush3.bf16.msra.mxu0 %v12681_v28  ;;  %v7465_v28 = vld [vmem:[%s14456_s7 + $0x48] sm:$0xff] }
0x19b0   : > { %v6875_v23 = vpack.c.bf16 %v6801_v22, %v6801_v22  ;;  %v11742_v24 = vpop.f32.mrb[83].mxu1  ;;  %11793 = vmatprep.subr.mxu0 %v12873_v46 }
0x19b1   : > { %v7463_v24 = vld [vmem:[%s14456_s7 + $0x38] sm:$0xff] }
0x19b2   : > { %11765 = vmatmul.mubr.bf16.vlgmr.msra.gmra.mrb[88].mxu1 %v6875_v23  ;;  %v7462_v23 = vld [vmem:[%s14456_s7 + $0x30] sm:$0xff] }
0x19b3   : > { %11789 = vmatpush3.msra.mxu1 %v13916_v53  ;;  %11790 = vmatprep.mubr.msk.f32.mxu1 %vm12874_vm3, %v12873_v46  ;;  %v12692_v53 = vld [vmem:[%s14455_s1 + $0x90] sm:$0xff]  }
0x19b4   : > { %11798 = vmatprep.subr.bf16.mxu1 %v12873_v46 }
0x19ba   : > { %11791 = vmatmul.mubr.msk.f32.vlgmr.msra.gmra.mrb[92].mxu1 %vm3236_vm7, %v10009_v26 }
0x19bb   : > { %11814 = vmatprep.mubr.msk.bf16.mxu1 %vm12874_vm3, %v12873_v46  ;;  %11799 = vmatpush3.bf16.msra.mxu1 %v12682_v29  ;;  %v12362_v29 = vpack.c.bf16 %v7465_v28, %v7464_v27  ;;  %v10062_v28 = vld [vmem:[#allocation2] ss:$0 sm:$0xff] }
0x19bc   : > { %11800 = vmatprep.subr.bf16.mxu1 %v12873_v46 }
0x19bf   : > { %11801 = vmatpush3.bf16.msra.mxu1 %v12683_v30  ;;  %v7466_v30 = vld [vmem:[%s14456_s7 + $0x50] sm:$0xff] }
0x19c0   : > { %11802 = vmatprep.subr.bf16.mxu1 %v12873_v46 }
0x19c3   : > { %11803 = vmatpush3.bf16.msra.mxu1 %v12684_v31  ;;  %v7467_v31 = vld [vmem:[%s14456_s7 + $0x58] sm:$0xff] }
0x19c4   : > { %11804 = vmatprep.subr.bf16.mxu1 %v12873_v46 }
0x19c7   : > { %11805 = vmatpush3.bf16.msra.mxu1 %v12685_v32  ;;  %v12365_v32 = vpack.c.bf16 %v7467_v31, %v7466_v30 }
0x19c8   : > { %11806 = vmatprep.subr.bf16.mxu1 %v12873_v46 }
0x19cb   : > { %11807 = vmatpush3.bf16.msra.mxu1 %v12686_v33  ;;  %v7468_v33 = vld [vmem:[%s14456_s7 + $0x60] sm:$0xff] }
0x19cc   : > { %11808 = vmatprep.subr.bf16.mxu1 %v12873_v46 }
0x19cf   : > { %11809 = vmatpush3.bf16.msra.mxu1 %v12687_v34  ;;  %v7469_v34 = vld [vmem:[%s14456_s7 + $0x68] sm:$0xff] }
0x19d0   : > { %11810 = vmatprep.subr.bf16.mxu1 %v12873_v46 }
0x19d3   : > { %11811 = vmatpush3.bf16.msra.mxu1 %v12688_v35  ;;  %v12368_v35 = vpack.c.bf16 %v7469_v34, %v7468_v33  ;;  %v12714_v33 = vld [vmem:[%s13085_s27 + $0x100] sm:$0xff]  }
0x19d4   : > { %11812 = vmatprep.subr.bf16.mxu1 %v12873_v46 }
0x19d7   : > { %11813 = vmatpush3.bf16.msra.mxu1 %v12689_v36  ;;  %v7470_v36 = vld [vmem:[%s14456_s7 + $0x70] sm:$0xff] }
0x19d8   : > { %12349 = vmatprep.subr.bf16.mxu1 %v12875_v25 }
0x1a5d   : > { %v6724_v38 = vpop.f32.mrb[84].mxu0 }
0x1a5e   : > { %v6725_v40 = vadd.f32 %v6724_v38, %v6636_v19  ;;  %v11736_v41 = vpop.f32.mrb[85].mxu0  ;;  %v7471_v38 = vld [vmem:[%s14456_s7 + $0x78] sm:$0xff] }
0x1a5f   : > { %v6727_v43 = vpop.f32.mrb[86].mxu0 }
0x1a60   : > { %v11737_v44 = vpop.f32.mrb[87].mxu0  ;;  %v10060_v43 = vld [vmem:[%s14457_s0] ss:$0 sm:$0xff]  ;;  %s14458_s0 = sld [smem:[#allocation29_spill]] }
0x1a65   : > { %v6871_v45 = vpop.f32.mrb[88].mxu0 }
0x1a66   : > { %v6982_v48 = vpack.c.bf16 %v6871_v45, %v6871_v45  ;;  %v11747_v50 = vpop.f32.mrb[89].mxu0 }
0x1a68   : > { %11785 = vmatmul.mubr.bf16.vlgmr.msra.gmra.mrb[92].mxu0 %v6982_v48 }
0x1a69   : > { %11794 = vmatpush3.msra.mxu0 %v13454_v7  ;;  %11795 = vmatprep.mubr.msk.f32.mxu0 %vm12874_vm3, %v12873_v46  ;;  %v12693_v7 = vld [vmem:[%s14455_s1 + $0x98] sm:$0xff]  }
0x1a6a   : > { %11818 = vmatprep.subr.bf16.mxu0 %v12873_v46 }
0x1a70   : > { %11796 = vmatmul.mubr.msk.f32.vlgmr.msra.gmra.mrb[90].mxu0 %vm3236_vm7, %v10009_v26  ;;  %v12359_v26 = vpack.c.bf16 %v7463_v24, %v7462_v23 }
0x1a71   : > { %11819 = vmatpush3.bf16.msra.mxu0 %v12690_v51  ;;  %11834 = vmatprep.mubr.msk.bf16.mxu0 %vm12874_vm3, %v12873_v46 }
0x1a72   : > { %11820 = vmatprep.subr.bf16.mxu0 %v12873_v46 }
0x1a75   : > { %11821 = vmatpush3.bf16.msra.mxu0 %v12691_v52 }
0x1a76   : > { %11822 = vmatprep.subr.bf16.mxu0 %v12873_v46 }
0x1a79   : > { %11823 = vmatpush3.bf16.msra.mxu0 %v12692_v53 }
0x1a7a   : > { %11824 = vmatprep.subr.bf16.mxu0 %v12873_v46 }
0x1a7d   : > { %11825 = vmatpush3.bf16.msra.mxu0 %v12693_v7 }
0x1a7e   : > { %11826 = vmatprep.subr.bf16.mxu0 %v12873_v46 }
0x1a81   : > { %11827 = vmatpush3.bf16.msra.mxu0 %v12694_v54 }
0x1a82   : > { %11828 = vmatprep.subr.bf16.mxu0 %v12873_v46 }
0x1a85   : > { %v6975_v55 = vpop.f32.mrb[88].mxu1  ;;  %11829 = vmatpush3.bf16.msra.mxu0 %v12695_v49 }
0x1a86   : > { %v6981_v56 = vadd.f32 %v6975_v55, %v6725_v40  ;;  %v11766_v57 = vpop.f32.mrb[89].mxu1  ;;  %11830 = vmatprep.subr.bf16.mxu0 %v12873_v46  ;;  %v12371_v40 = vpack.c.bf16 %v7471_v38, %v7470_v36  ;;  %v12717_v36 = vld [vmem:[%s13085_s27 + $0x118] sm:$0xff]   ;;  %v12718_v38 = vld [vmem:[%s13085_s27 + $0x120] sm:$0xff]  }
0x1a87   : > { %v6978_v58 = vpop.f32.mrb[90].mxu1  ;;  %v12699_v57 = vld [vmem:[%s13085_s27] sm:$0xff]  }
0x1a88   : > { %v11767_v59 = vpop.f32.mrb[91].mxu1 }
0x1a89   : > { %11831 = vmatpush3.bf16.msra.mxu0 %v12696_v47 }
0x1a8a   : > { %11832 = vmatprep.subr.bf16.mxu0 %v12873_v46 }
0x1a8d   : > { %v7160_v60 = vpop.f32.mrb[92].mxu1  ;;  %11833 = vmatpush3.bf16.msra.mxu0 %v12697_v63 }
0x1a8e   : > { %v7234_v61 = vpack.c.bf16 %v7160_v60, %v7160_v60  ;;  %v11792_v62 = vpop.f32.mrb[93].mxu1  ;;  %12373 = vmatprep.subr.bf16.mxu0 %v12875_v25 }
0x1a90   : > { %11815 = vmatmul.mubr.bf16.vlgmr.msra.gmra.mrb[96].mxu1 %v7234_v61 }
0x1a91   : > { %11870 = vmatprep.mubr.msk.f32.mxu1 %vm12874_vm3, %v12873_v46  ;;  %12351 = vmatpush3.bf16.msra.mxu1 %v12350_v4 }
0x1a92   : > { %12352 = vmatprep.subr.bf16.mxu1 %v12875_v25 }
0x1a95   : > { %12354 = vmatpush3.bf16.msra.mxu1 %v12353_v8 }
0x1a96   : > { %12355 = vmatprep.subr.bf16.mxu1 %v12875_v25 }
0x1a99   : > { %12357 = vmatpush3.bf16.msra.mxu1 %v12356_v12 }
0x1a9a   : > { %12358 = vmatprep.subr.bf16.mxu1 %v12875_v25 }
0x1a9d   : > { %12360 = vmatpush3.bf16.msra.mxu1 %v12359_v26 }
0x1a9e   : > { %12361 = vmatprep.subr.bf16.mxu1 %v12875_v25 }
0x1aa1   : > { %12363 = vmatpush3.bf16.msra.mxu1 %v12362_v29 }
0x1aa2   : > { %12364 = vmatprep.subr.bf16.mxu1 %v12875_v25 }
0x1aa5   : > { %12366 = vmatpush3.bf16.msra.mxu1 %v12365_v32 }
0x1aa6   : > { %12367 = vmatprep.subr.bf16.mxu1 %v12875_v25 }
0x1aa9   : > { %12369 = vmatpush3.bf16.msra.mxu1 %v12368_v35 }
0x1aaa   : > { %12370 = vmatprep.subr.bf16.mxu1 %v12875_v25 }
0x1aad   : > { %12372 = vmatpush3.bf16.msra.mxu1 %v12371_v40 }
0x1aae   : > { %11908 = vmatprep.subr.bf16.mxu1 %v12873_v46 }
0x1b3b   : > { %v7082_v6 = vpop.f32.mrb[92].mxu0 }
0x1b3c   : > { %v7088_v13 = vadd.f32 %v7082_v6, %v6981_v56  ;;  %v11786_v14 = vpop.f32.mrb[93].mxu0  ;;  %v12704_v6 = vld [vmem:[%s13085_s27 + $0x98] sm:$0xff]  }
0x1b3d   : > { %v7085_v15 = vpop.f32.mrb[94].mxu0  ;;  %v12706_v14 = vld [vmem:[%s13085_s27 + $0xa0] sm:$0xff]  }
0x1b3e   : > { %v11787_v16 = vpop.f32.mrb[95].mxu0  ;;  %v12707_v15 = vld [vmem:[%s13085_s27 + $0x20] sm:$0xff]  }
0x1b3f   : > { %v12708_v16 = vld [vmem:[%s13085_s27 + $0xa8] sm:$0xff]  }
0x1b43   : > { %v7230_v11 = vpop.f32.mrb[90].mxu0 }
0x1b44   : > { %v7341_v17 = vpack.c.bf16 %v7230_v11, %v7230_v11  ;;  %v11797_v18 = vpop.f32.mrb[91].mxu0  ;;  %v12709_v11 = vld [vmem:[%s13085_s27 + $0x28] sm:$0xff]  }
0x1b45   : > { %v12711_v18 = vld [vmem:[%s13085_s27 + $0x30] sm:$0xff]  }
0x1b46   : > { %11835 = vmatmul.mubr.bf16.vlgmr.msra.gmra.mrb[96].mxu0 %v7341_v17  ;;  %v12710_v17 = vld [vmem:[%s13085_s27 + $0xb0] sm:$0xff]  }
0x1b47   : > { %12375 = vmatpush3.bf16.msra.mxu0 %v12350_v4  ;;  %11905 = vmatprep.mubr.msk.f32.mxu0 %vm12874_vm3, %v12873_v46  ;;  %v12698_v4 = vld [vmem:[%s13085_s27 + $0x80] sm:$0xff]  }
0x1b48   : > { %12376 = vmatprep.subr.bf16.mxu0 %v12875_v25 }
0x1b4b   : > { %12378 = vmatpush3.bf16.msra.mxu0 %v12353_v8  ;;  %v12700_v8 = vld [vmem:[%s13085_s27 + $0x88] sm:$0xff]  }
0x1b4c   : > { %12379 = vmatprep.subr.bf16.mxu0 %v12875_v25 }
0x1b4f   : > { %12381 = vmatpush3.bf16.msra.mxu0 %v12356_v12  ;;  %v12703_v12 = vld [vmem:[%s13085_s27 + $0x10] sm:$0xff]  }
0x1b50   : > { %12382 = vmatprep.subr.bf16.mxu0 %v12875_v25 }
0x1b53   : > { %12384 = vmatpush3.bf16.msra.mxu0 %v12359_v26  ;;  %v10061_v26 = vld [vmem:[%s14458_s0] ss:$0 sm:$0xff]  ;;  %s14459_s0 = sshll.u32 %s14461_s16, 6 }
0x1b54   : > { %12385 = vmatprep.subr.bf16.mxu0 %v12875_v25  ;;  %s14291_s1 = scalar_lea.vmem %s13095_s30, %s14459_s0 }
0x1b57   : > { %12387 = vmatpush3.bf16.msra.mxu0 %v12362_v29 }
0x1b58   : > { %12388 = vmatprep.subr.bf16.mxu0 %v12875_v25 }
0x1b5b   : > { %12390 = vmatpush3.bf16.msra.mxu0 %v12365_v32 }
0x1b5c   : > { %12391 = vmatprep.subr.bf16.mxu0 %v12875_v25 }
0x1b5f   : > { %12393 = vmatpush3.bf16.msra.mxu0 %v12368_v35  ;;  %v12716_v35 = vld [vmem:[%s13085_s27 + $0x110] sm:$0xff]  }
0x1b60   : > { %12394 = vmatprep.subr.bf16.mxu0 %v12875_v25 }
0x1b63   : > { %v7334_v19 = vpop.f32.mrb[96].mxu1  ;;  %12396 = vmatpush3.bf16.msra.mxu0 %v12371_v40  ;;  %v12719_v40 = vld [vmem:[%s13085_s27 + $0x128] sm:$0xff]  }
0x1b64   : > { %v7340_v20 = vadd.f32 %v7334_v19, %v7088_v13  ;;  %v11816_v21 = vpop.f32.mrb[97].mxu1  ;;  %11928 = vmatprep.subr.bf16.mxu0 %v12873_v46  ;;  %v12705_v13 = vld [vmem:[%s13085_s27 + $0x18] sm:$0xff]  }
0x1b65   : > { %v7337_v0 = vpop.f32.mrb[98].mxu1  ;;  %v12712_v19 = vld [vmem:[%s13085_s27 + $0xb8] sm:$0xff]  }
0x1b66   : > { %v11817_v22 = vpop.f32.mrb[99].mxu1 }
0x1c19   : > { %v7441_v41 = vpop.f32.mrb[96].mxu0 }
0x1c1a   : > { %v7447_v44 = vadd.f32 %v7441_v41, %v7340_v20  ;;  %v11836_v45 = vpop.f32.mrb[97].mxu0  ;;  %v12713_v20 = vld [vmem:[%s13085_s27 + $0x38] sm:$0xff]   ;;  %v12720_v41 = vld [vmem:[%s13085_s27 + $0x130] sm:$0xff]  }
0x1c1b   : > { %v7444_v48 = vpop.f32.mrb[98].mxu0  ;;  %v12723_v45 = vld [vmem:[%s13085_s27 + $0x48] sm:$0xff]  }
0x1c1c   : > { %v7455_v50 = vadd.f32 %v10060_v43, %v7447_v44  ;;  %v11837_v51 = vpop.f32.mrb[99].mxu0  ;;  %v12721_v43 = vld [vmem:[%s13085_s27 + $0x138] sm:$0xff]   ;;  %v12722_v44 = vld [vmem:[%s13085_s27 + $0x40] sm:$0xff]   ;;  %v12724_v48 = vld [vmem:[%s13085_s27 + $0x50] sm:$0xff]  }
0x1c1d   : > { %v12726_v51 = vld [vmem:[%s13085_s27 + $0x60] sm:$0xff]  }
0x1c1e   : > { %v7472_v52 = vrot.slane %v7455_v50, 4 }
0x1c20   : > { %v7473_v53 = vadd.f32 %v7472_v52, %v7455_v50  ;;  %v12727_v52 = vld [vmem:[%s13085_s27 + $0x68] sm:$0xff]  }
0x1c22   : > { %v7474_v7 = vrot.slane %v7473_v53, 2 }
0x1c24   : > { %v7475_v54 = vadd.f32 %v7474_v7, %v7473_v53  ;;  %v12728_v53 = vld [vmem:[%s13085_s27 + $0x70] sm:$0xff]   ;;  %v12729_v7 = vld [vmem:[%s13085_s27 + $0x78] sm:$0xff]  }
0x1c26   : > { %v7476_v55 = vrot.slane %v7475_v54, 1 }
0x1c28   : > { %v7477_v25 = vadd.f32 %v7476_v55, %v7475_v54  ;;  %v10095_v54 = vld [vmem:[%s13080_s20 + $0x20] sm:$0xff] }
0x1c2a   : > { %v7479_v56 = vmul.f32 0.125, %v7477_v25 }
0x1c2c   : > { %11871 = vmatmul.mubr.f32.vlgmr.msra.gmra.mrb[94].mxu1 %v7479_v56  ;;  %v14153_v56 = vld [vmem:[%s13080_s20 + $0x28] sm:$0xff] }
0x1c2d   : > { %11924 = vmatprep.mubr.msk.bf16.mxu1 %vm12874_vm3, %v12873_v46  ;;  %11909 = vmatpush3.bf16.msra.mxu1 %v12699_v57 }
0x1c2e   : > { %11910 = vmatprep.subr.bf16.mxu1 %v12873_v46 }
0x1c31   : > { %11911 = vmatpush3.bf16.msra.mxu1 %v12701_v9  ;;  %v12730_v9 = vld [vmem:[%s13085_s27 + $0x180] sm:$0xff]  }
0x1c32   : > { %11912 = vmatprep.subr.bf16.mxu1 %v12873_v46 }
0x1c35   : > { %11913 = vmatpush3.bf16.msra.mxu1 %v12703_v12  ;;  %v14197_v12 = vld [vmem:[%s13080_s20 + $0x50] sm:$0xff] }
0x1c36   : > { %11914 = vmatprep.subr.bf16.mxu1 %v12873_v46 }
0x1c39   : > { %11915 = vmatpush3.bf16.msra.mxu1 %v12705_v13 }
0x1c3a   : > { %11916 = vmatprep.subr.bf16.mxu1 %v12873_v46 }
0x1c3d   : > { %11917 = vmatpush3.bf16.msra.mxu1 %v12707_v15  ;;  %v14206_v15 = vld [vmem:[%s13080_s20 + $0x58] sm:$0xff] }
0x1c3e   : > { %11918 = vmatprep.subr.bf16.mxu1 %v12873_v46 }
0x1c41   : > { %11919 = vmatpush3.bf16.msra.mxu1 %v12709_v11  ;;  %v12733_v11 = vld [vmem:[%s13085_s27 + $0x198] sm:$0xff]  }
0x1c42   : > { %11920 = vmatprep.subr.bf16.mxu1 %v12873_v46 }
0x1c45   : > { %11921 = vmatpush3.bf16.msra.mxu1 %v12711_v18  ;;  %v12735_v18 = vld [vmem:[%s13085_s27 + $0x1a8] sm:$0xff]  }
0x1c46   : > { %11922 = vmatprep.subr.bf16.mxu1 %v12873_v46 }
0x1c49   : > { %11923 = vmatpush3.bf16.msra.mxu1 %v12713_v20  ;;  %v12737_v20 = vld [vmem:[%s13085_s27 + $0x1b8] sm:$0xff]  }
0x1cff   : > { %v7546_v58 = vpop.f32.mrb[94].mxu1 }
0x1d00   : > { %v7553_v59 = vrot.slane %v7546_v58, %v13833_v42  ;;  %v11872_v60 = vpop.f32.mrb[95].mxu1 }
0x1d02   : > { %v7554_v61 = vsub.f32 %v7455_v50, %v7553_v59  ;;  %v12725_v50 = vld [vmem:[%s13085_s27 + $0x58] sm:$0xff]   ;;  %v14156_v59 = vld [vmem:[%s13080_s20 + $0x30] sm:$0xff] }
0x1d04   : > { %v7555_v62 = vmul.f32 %v7554_v61, %v7554_v61 }
0x1d06   : > { %v7556_v49 = vrot.slane %v7555_v62, 4 }
0x1d08   : > { %v7557_v47 = vadd.f32 %v7556_v49, %v7555_v62 }
0x1d0a   : > { %v7558_v63 = vrot.slane %v7557_v47, 2 }
0x1d0c   : > { %v7559_v1 = vadd.f32 %v7558_v63, %v7557_v47  ;;  %v14163_v47 = vld [vmem:[%s13080_s20 + $0x38] sm:$0xff]  ;;  %v14166_v63 = vld [vmem:[%s13080_s20] sm:$0xff] }
0x1d0e   : > { %v7560_v2 = vrot.slane %v7559_v1, 1 }
0x1d10   : > { %v7561_v3 = vadd.f32 %v7560_v2, %v7559_v1  ;;  %v14173_v1 = vld [vmem:[%s13080_s20 + $0x8] sm:$0xff]  ;;  %v14176_v2 = vld [vmem:[%s13080_s20 + $0x10] sm:$0xff] }
0x1d12   : > { %v7562_v5 = vmul.f32 0.125, %v7561_v3  ;;  %v14183_v3 = vld [vmem:[%s13080_s20 + $0x18] sm:$0xff] }
0x1d14   : > { %11906 = vmatmul.mubr.f32.vlgmr.msra.gmra.mrb[100].mxu0 %v7562_v5 }
0x1d15   : > { %11929 = vmatpush3.bf16.msra.mxu0 %v12698_v4  ;;  %11944 = vmatprep.mubr.msk.bf16.mxu0 %vm12874_vm3, %v12873_v46  ;;  %v14186_v4 = vld [vmem:[%s13080_s20 + $0x40] sm:$0xff] }
0x1d16   : > { %11930 = vmatprep.subr.bf16.mxu0 %v12873_v46 }
0x1d19   : > { %11931 = vmatpush3.bf16.msra.mxu0 %v12700_v8  ;;  %v14193_v8 = vld [vmem:[%s13080_s20 + $0x48] sm:$0xff] }
0x1d1a   : > { %11932 = vmatprep.subr.bf16.mxu0 %v12873_v46 }
0x1d1d   : > { %11933 = vmatpush3.bf16.msra.mxu0 %v12702_v10 }
0x1d1e   : > { %11934 = vmatprep.subr.bf16.mxu0 %v12873_v46 }
0x1d21   : > { %11935 = vmatpush3.bf16.msra.mxu0 %v12704_v6 }
0x1d22   : > { %11936 = vmatprep.subr.bf16.mxu0 %v12873_v46 }
0x1d25   : > { %11937 = vmatpush3.bf16.msra.mxu0 %v12706_v14  ;;  %v12731_v14 = vld [vmem:[%s13085_s27 + $0x188] sm:$0xff]  }
0x1d26   : > { %11938 = vmatprep.subr.bf16.mxu0 %v12873_v46 }
0x1d29   : > { %11939 = vmatpush3.bf16.msra.mxu0 %v12708_v16  ;;  %v12732_v16 = vld [vmem:[%s13085_s27 + $0x190] sm:$0xff]  }
0x1d2a   : > { %11940 = vmatprep.subr.bf16.mxu0 %v12873_v46 }
0x1d2d   : > { %11941 = vmatpush3.bf16.msra.mxu0 %v12710_v17  ;;  %v12734_v17 = vld [vmem:[%s13085_s27 + $0x1a0] sm:$0xff]  }
0x1d2e   : > { %11942 = vmatprep.subr.bf16.mxu0 %v12873_v46 }
0x1d31   : > { %11943 = vmatpush3.bf16.msra.mxu0 %v12712_v19  ;;  %v12736_v19 = vld [vmem:[%s13085_s27 + $0x1b0] sm:$0xff]  }
0x1d32   : > { %11964 = vmatprep.subr.bf16.mxu0 %v12873_v46 }
0x1de7   : > { %v7629_v21 = vpop.f32.mrb[100].mxu0 }
0x1de8   : > { %v7630_v0 = vadd.f32 1e-05, %v7629_v21  ;;  %v11907_v22 = vpop.f32.mrb[101].mxu0 }
0x1dea   : > { %12780 = vrsqrt.f32 %v7630_v0 }
0x1df4   : > { %v12781_v23 = vpop.eup %12780 }
0x1df5   : > { %v7637_v24 = vrot.slane %v12781_v23, %v13833_v42  ;;  %v12715_v42 = vld [vmem:[%s13085_s27 + $0x108] sm:$0xff]  }
0x1df7   : > { %v7638_v27 = vmul.f32 %v7637_v24, %v7554_v61  ;;  %v14229_v24 = vld [vmem:[%s13080_s20 + $0x60] sm:$0xff] }
0x1df9   : > { %v7646_v29 = vmul.f32 %v10061_v26, %v7638_v27  ;;  %v14234_v27 = vld [vmem:[%s13080_s20 + $0x68] sm:$0xff] }
0x1dfb   : > { %v7654_v30 = vadd.f32 %v10062_v28, %v7646_v29  ;;  %v12738_v28 = vld [vmem:[%s13085_s27 + $0xc0] sm:$0xff]  }
0x1dfd   : > { %vm7655_vm13 = vcmp.ge.f32.partialorder %v7654_v30, 0.0  ;;  %v7656_v31 = vmul.f32 0.01, %v7654_v30 }
0x1dff   : > { %v7657_v32 = vsel %vm7655_vm13, %v7654_v30, %v7656_v31  ;;  %v14238_v30 = vld [vmem:[%s13080_s20 + $0x70] sm:$0xff] }
0x1e00   : > { %v14109_v34 = vpack.c.bf16 %v7657_v32, %v7657_v32 }
0x1e02   : > { %11925 = vmatmul.mubr.bf16.vlgmr.msra.gmra.mrb[100].mxu1 %v14109_v34  ;;  %11945 = vmatmul.mubr.bf16.vlgmr.msra.gmra.mrb[104].mxu0 %v14109_v34 }
0x1e03   : > { %11965 = vmatpush3.bf16.msra.mxu0 %v12714_v33  ;;  %11980 = vmatprep.mubr.msk.bf16.mxu0 %vm12874_vm3, %v12873_v46  ;;  %v14246_v33 = vld [vmem:[%s13080_s20 + $0x78] sm:$0xff] }
0x1e04   : > { %11966 = vmatprep.subr.bf16.mxu0 %v12873_v46  ;;  %11950 = vmatprep.mubr.msk.f32.mxu1 %vm3236_vm7, %v10095_v54 }
0x1e07   : > { %11967 = vmatpush3.bf16.msra.mxu0 %v12715_v42  ;;  %v12739_v42 = vld [vmem:[%s13085_s27 + $0xc8] sm:$0xff]  }
0x1e08   : > { %11968 = vmatprep.subr.bf16.mxu0 %v12873_v46 }
0x1e0b   : > { %11969 = vmatpush3.bf16.msra.mxu0 %v12716_v35  ;;  %v12740_v35 = vld [vmem:[%s13085_s27 + $0xd0] sm:$0xff]  }
0x1e0c   : > { %11970 = vmatprep.subr.bf16.mxu0 %v12873_v46 }
0x1e0f   : > { %11971 = vmatpush3.bf16.msra.mxu0 %v12717_v36  ;;  %v12741_v36 = vld [vmem:[%s13085_s27 + $0xd8] sm:$0xff]  }
0x1e10   : > { %11972 = vmatprep.subr.bf16.mxu0 %v12873_v46 }
0x1e13   : > { %11973 = vmatpush3.bf16.msra.mxu0 %v12718_v38  ;;  %v12742_v38 = vld [vmem:[%s13085_s27 + $0xe0] sm:$0xff]  }
0x1e14   : > { %11974 = vmatprep.subr.bf16.mxu0 %v12873_v46 }
0x1e17   : > { %11975 = vmatpush3.bf16.msra.mxu0 %v12719_v40  ;;  %v12743_v40 = vld [vmem:[%s13085_s27 + $0xe8] sm:$0xff]  }
0x1e18   : > { %11976 = vmatprep.subr.bf16.mxu0 %v12873_v46 }
0x1e1b   : > { %11977 = vmatpush3.bf16.msra.mxu0 %v12720_v41  ;;  %v12744_v41 = vld [vmem:[%s13085_s27 + $0xf0] sm:$0xff]  }
0x1e1c   : > { %11978 = vmatprep.subr.bf16.mxu0 %v12873_v46 }
0x1e1f   : > { %11979 = vmatpush3.bf16.msra.mxu0 %v12721_v43  ;;  %v12745_v43 = vld [vmem:[%s13085_s27 + $0xf8] sm:$0xff]  }
0x1e20   : > { %12020 = vmatprep.subr.bf16.mxu0 %v12873_v46 }
0x1e22   : > { %11981 = vmatmul.mubr.bf16.vlgmr.msra.gmra.mrb[108].mxu0 %v14109_v34 }
0x1e23   : > { %12021 = vmatpush3.bf16.msra.mxu0 %v12722_v44  ;;  %12036 = vmatprep.mubr.msk.bf16.mxu0 %vm12874_vm3, %v12873_v46  ;;  %v12746_v44 = vld [vmem:[%s13085_s27 + $0x1c0] sm:$0xff]  }
0x1e24   : > { %12022 = vmatprep.subr.bf16.mxu0 %v12873_v46 }
0x1e27   : > { %12023 = vmatpush3.bf16.msra.mxu0 %v12723_v45  ;;  %v12747_v45 = vld [vmem:[%s13085_s27 + $0x1c8] sm:$0xff]  }
0x1e28   : > { %12024 = vmatprep.subr.bf16.mxu0 %v12873_v46 }
0x1e2b   : > { %12025 = vmatpush3.bf16.msra.mxu0 %v12724_v48  ;;  %v12748_v48 = vld [vmem:[%s13085_s27 + $0x1d0] sm:$0xff]  }
0x1e2c   : > { %12026 = vmatprep.subr.bf16.mxu0 %v12873_v46 }
0x1e2f   : > { %12027 = vmatpush3.bf16.msra.mxu0 %v12725_v50  ;;  %v12749_v50 = vld [vmem:[%s13085_s27 + $0x1d8] sm:$0xff]  }
0x1e30   : > { %12028 = vmatprep.subr.bf16.mxu0 %v12873_v46 }
0x1e33   : > { %12029 = vmatpush3.bf16.msra.mxu0 %v12726_v51  ;;  %v12750_v51 = vld [vmem:[%s13085_s27 + $0x1e0] sm:$0xff]  }
0x1e34   : > { %12030 = vmatprep.subr.bf16.mxu0 %v12873_v46 }
0x1e37   : > { %12031 = vmatpush3.bf16.msra.mxu0 %v12727_v52  ;;  %v12751_v52 = vld [vmem:[%s13085_s27 + $0x1e8] sm:$0xff]  }
0x1e38   : > { %12032 = vmatprep.subr.bf16.mxu0 %v12873_v46 }
0x1e3b   : > { %12033 = vmatpush3.bf16.msra.mxu0 %v12728_v53  ;;  %v12752_v53 = vld [vmem:[%s13085_s27 + $0x1f0] sm:$0xff]  }
0x1e3c   : > { %12034 = vmatprep.subr.bf16.mxu0 %v12873_v46 }
0x1e3f   : > { %12035 = vmatpush3.bf16.msra.mxu0 %v12729_v7  ;;  %v12753_v7 = vld [vmem:[%s13085_s27 + $0x1f8] sm:$0xff]  }
0x1e42   : > { %12037 = vmatmul.mubr.bf16.vlgmr.msra.gmra.mrb[112].mxu0 %v14109_v34 }
0x1e43   : > { %12062 = vmatprep.mubr.msk.f32.mxu0 %vm3236_vm7, %v10095_v54  ;;  %v10171_v54 = vld [vmem:[%s13090_s4] ss:$0 sm:$0xff] }
0x1ed5   : > { %v7757_v55 = vpop.f32.mrb[100].mxu1  ;;  %v7866_v25 = vpop.f32.mrb[104].mxu0 }
0x1ed6   : > { %v11926_v57 = vpop.f32.mrb[101].mxu1  ;;  %v11946_v58 = vpop.f32.mrb[105].mxu0  ;;  %11948 = vmatprep.subr.mxu1 %v7866_v25 }
0x1ed7   : > { %v7760_v60 = vpop.f32.mrb[102].mxu1  ;;  %v7869_v61 = vpop.f32.mrb[106].mxu0  ;;  %11949 = vmatpush3.msra.mxu1 %v7866_v25 }
0x1ed8   : > { %v11927_v62 = vpop.f32.mrb[103].mxu1  ;;  %v11947_v49 = vpop.f32.mrb[107].mxu0  ;;  %11956 = vmatprep.subr.mxu1 %v7757_v55  ;;  %11951 = vmatmul.mubr.msk.f32.vlgmr.msra.gmra.mrb[104].mxu1 %vm3236_vm7, %v14153_v56 }
0x1ed9   : > { %11957 = vmatpush3.msra.mxu1 %v7757_v55  ;;  %11953 = vmatprep.mubr.msk.f32.mxu1 %vm3236_vm7, %v14156_v59 }
0x1edc   : > { %11954 = vmatmul.mubr.msk.f32.gmra.mrb[106].mxu1 %vm3236_vm7, %v14163_v47 }
0x1edd   : > { %11958 = vmatprep.mubr.msk.f32.mxu1 %vm3236_vm7, %v14166_v63 }
0x1ee0   : > { %11959 = vmatmul.mubr.msk.f32.vlgmr.msra.gmra.mrb[104].mxu1 %vm3236_vm7, %v14173_v1 }
0x1ee1   : > { %11961 = vmatprep.mubr.msk.f32.mxu1 %vm3236_vm7, %v14176_v2 }
0x1ee4   : > { %11962 = vmatmul.mubr.msk.f32.gmra.mrb[106].mxu1 %vm3236_vm7, %v14183_v3 }
0x1ee5   : > { %11986 = vmatprep.mubr.msk.f32.mxu1 %vm3236_vm7, %v14186_v4 }
0x1ef5   : > { %v8170_v5 = vpop.f32.mrb[108].mxu0 }
0x1ef6   : > { %v11982_v10 = vpop.f32.mrb[109].mxu0  ;;  %11984 = vmatprep.subr.mxu1 %v8170_v5 }
0x1ef7   : > { %v8173_v6 = vpop.f32.mrb[110].mxu0  ;;  %11985 = vmatpush3.msra.mxu1 %v8170_v5 }
0x1ef8   : > { %v11983_v13 = vpop.f32.mrb[111].mxu0  ;;  %11992 = vmatprep.subr.bf16.mxu1 %v12873_v46  ;;  %11987 = vmatmul.mubr.msk.f32.vlgmr.msra.gmra.mrb[104].mxu1 %vm3236_vm7, %v14193_v8 }
0x1ef9   : > { %11993 = vmatpush3.bf16.msra.mxu1 %v12730_v9  ;;  %11989 = vmatprep.mubr.msk.f32.mxu1 %vm3236_vm7, %v14197_v12 }
0x1efa   : > { %11994 = vmatprep.subr.bf16.mxu1 %v12873_v46 }
0x1efc   : > { %11990 = vmatmul.mubr.msk.f32.gmra.mrb[106].mxu1 %vm3236_vm7, %v14206_v15 }
0x1efd   : > { %11995 = vmatpush3.bf16.msra.mxu1 %v12731_v14  ;;  %12008 = vmatprep.mubr.msk.bf16.mxu1 %vm12874_vm3, %v12873_v46 }
0x1efe   : > { %11996 = vmatprep.subr.bf16.mxu1 %v12873_v46 }
0x1f01   : > { %11997 = vmatpush3.bf16.msra.mxu1 %v12732_v16 }
0x1f02   : > { %11998 = vmatprep.subr.bf16.mxu1 %v12873_v46 }
0x1f05   : > { %11999 = vmatpush3.bf16.msra.mxu1 %v12733_v11 }
0x1f06   : > { %12000 = vmatprep.subr.bf16.mxu1 %v12873_v46 }
0x1f09   : > { %12001 = vmatpush3.bf16.msra.mxu1 %v12734_v17 }
0x1f0a   : > { %12002 = vmatprep.subr.bf16.mxu1 %v12873_v46 }
0x1f0d   : > { %12003 = vmatpush3.bf16.msra.mxu1 %v12735_v18 }
0x1f0e   : > { %12004 = vmatprep.subr.bf16.mxu1 %v12873_v46 }
0x1f11   : > { %12005 = vmatpush3.bf16.msra.mxu1 %v12736_v19 }
0x1f12   : > { %12006 = vmatprep.subr.bf16.mxu1 %v12873_v46 }
0x1f15   : > { %12007 = vmatpush3.bf16.msra.mxu1 %v12737_v20  ;;  %v14225_v21 = vpop.f32.mrb[112].mxu0 }
0x1f16   : > { %v12038_v0 = vpop.f32.mrb[113].mxu0 }
0x1f17   : > { %v8616_v22 = vpop.f32.mrb[114].mxu0  ;;  %v12754_v0 = vld [vmem:[%s13085_s27 + $0x140] sm:$0xff]  }
0x1f18   : > { %12009 = vmatmul.mubr.bf16.vlgmr.msra.gmra.mrb[108].mxu1 %v14109_v34  ;;  %v12039_v23 = vpop.f32.mrb[115].mxu0 }
0x1f19   : > { %12014 = vmatprep.mubr.msk.f32.mxu1 %vm3236_vm7, %v14229_v24 }
0x1feb   : > { %v8381_v26 = vpop.f32.mrb[108].mxu1 }
0x1fec   : > { %v12010_v29 = vpop.f32.mrb[109].mxu1  ;;  %12012 = vmatprep.subr.mxu1 %v8381_v26 }
0x1fed   : > { %v8384_v31 = vpop.f32.mrb[110].mxu1  ;;  %12013 = vmatpush3.msra.mxu1 %v8381_v26  ;;  %v12761_v26 = vld [vmem:[%s13085_s27 + $0x178] sm:$0xff]  }
0x1fee   : > { %v12011_v32 = vpop.f32.mrb[111].mxu1  ;;  %12015 = vmatmul.mubr.msk.f32.vlgmr.msra.gmra.mrb[104].mxu1 %vm3236_vm7, %v14234_v27  ;;  %12040 = vmatprep.subr.bf16.mxu1 %v12873_v46 }
0x1fef   : > { %12041 = vmatpush3.bf16.msra.mxu1 %v12738_v28  ;;  %12017 = vmatprep.mubr.msk.f32.mxu1 %vm3236_vm7, %v14238_v30 }
0x1ff0   : > { %12042 = vmatprep.subr.bf16.mxu1 %v12873_v46 }
0x1ff2   : > { %12018 = vmatmul.mubr.msk.f32.gmra.mrb[106].mxu1 %vm3236_vm7, %v14246_v33 }
0x1ff3   : > { %12043 = vmatpush3.bf16.msra.mxu1 %v12739_v42  ;;  %12056 = vmatprep.mubr.msk.bf16.mxu1 %vm12874_vm3, %v12873_v46 }
0x1ff4   : > { %12044 = vmatprep.subr.bf16.mxu1 %v12873_v46 }
0x1ff7   : > { %12045 = vmatpush3.bf16.msra.mxu1 %v12740_v35 }
0x1ff8   : > { %12046 = vmatprep.subr.bf16.mxu1 %v12873_v46 }
0x1ffb   : > { %12047 = vmatpush3.bf16.msra.mxu1 %v12741_v36 }
0x1ffc   : > { %12048 = vmatprep.subr.bf16.mxu1 %v12873_v46 }
0x1fff   : > { %12049 = vmatpush3.bf16.msra.mxu1 %v12742_v38 }
0x2000   : > { %12050 = vmatprep.subr.bf16.mxu1 %v12873_v46 }
0x2003   : > { %12051 = vmatpush3.bf16.msra.mxu1 %v12743_v40 }
0x2004   : > { %12052 = vmatprep.subr.bf16.mxu1 %v12873_v46 }
0x2007   : > { %12053 = vmatpush3.bf16.msra.mxu1 %v12744_v41 }
0x2008   : > { %12054 = vmatprep.subr.bf16.mxu1 %v12873_v46 }
0x200b   : > { %12055 = vmatpush3.bf16.msra.mxu1 %v12745_v43 }
0x200c   : > { %12104 = vmatprep.subr.bf16.mxu1 %v12873_v46 }
0x200e   : > { %12057 = vmatmul.mubr.bf16.vlgmr.msra.gmra.mrb[112].mxu1 %v14109_v34 }
0x200f   : > { %12105 = vmatpush3.bf16.msra.mxu1 %v12746_v44  ;;  %12120 = vmatprep.mubr.msk.bf16.mxu1 %vm12874_vm3, %v12873_v46 }
0x2010   : > { %12106 = vmatprep.subr.bf16.mxu1 %v12873_v46 }
0x2013   : > { %12107 = vmatpush3.bf16.msra.mxu1 %v12747_v45 }
0x2014   : > { %12108 = vmatprep.subr.bf16.mxu1 %v12873_v46 }
0x2017   : > { %12109 = vmatpush3.bf16.msra.mxu1 %v12748_v48 }
0x2018   : > { %12110 = vmatprep.subr.bf16.mxu1 %v12873_v46 }
0x201b   : > { %12111 = vmatpush3.bf16.msra.mxu1 %v12749_v50 }
0x201c   : > { %12112 = vmatprep.subr.bf16.mxu1 %v12873_v46 }
0x201f   : > { %12113 = vmatpush3.bf16.msra.mxu1 %v12750_v51 }
0x2020   : > { %12114 = vmatprep.subr.bf16.mxu1 %v12873_v46 }
0x2023   : > { %12115 = vmatpush3.bf16.msra.mxu1 %v12751_v52 }
0x2024   : > { %12116 = vmatprep.subr.bf16.mxu1 %v12873_v46 }
0x2027   : > { %12117 = vmatpush3.bf16.msra.mxu1 %v12752_v53 }
0x2028   : > { %12118 = vmatprep.subr.bf16.mxu1 %v12873_v46 }
0x202b   : > { %12119 = vmatpush3.bf16.msra.mxu1 %v12753_v7 }
0x202e   : > { %12121 = vmatmul.mubr.bf16.vlgmr.msra.gmra.mrb[116].mxu1 %v14109_v34 }
0x20c1   : > { %v12016_v55 = vpop.f32.mrb[104].mxu1 }
0x20c2   : > { %v8499_v25 = vadd.f32 %v12016_v55, %v10171_v54  ;;  %v8470_v57 = vpop.f32.mrb[105].mxu1 }
0x20c3   : > { %v8498_v58 = vadd.f32 %v10171_v54, %v8470_v57 }
0x20c4   : > { %v8503_v60 = vmul.f32 %v8499_v25, %v13232_v39 }
0x20c5   : > { %v8502_v61 = vmul.f32 %v8498_v58, %v13232_v39  ;;  %v12019_v62 = vpop.f32.mrb[106].mxu1 }
0x20c6   : > { %v8507_v49 = vadd.f32 %v8503_v60, %v13160_v37  ;;  %v8501_v5 = vadd.f32 %v12019_v62, %v10171_v54  ;;  %v8480_v9 = vpop.f32.mrb[107].mxu1 }
0x20c7   : > { %v8506_v10 = vadd.f32 %v8502_v61, %v13160_v37  ;;  %v8500_v6 = vadd.f32 %v10171_v54, %v8480_v9 }
0x20c8   : > { %8511 = vst.msk [vmem:[%s14291_s1 + $0x8] sm:$0xff] %vm1289_vm0, %v8507_v49  ;;  %v8505_v13 = vmul.f32 %v8501_v5, %v13232_v39 }
0x20c9   : > { %8510 = vst.msk [vmem:[%s14291_s1] sm:$0xff] %vm1289_vm0, %v8506_v10  ;;  %v8504_v14 = vmul.f32 %v8500_v6, %v13232_v39 }
0x20ca   : > { %v8509_v16 = vadd.f32 %v8505_v13, %v13160_v37 }
0x20cb   : > { %v8508_v11 = vadd.f32 %v8504_v14, %v13160_v37 }
0x20cc   : > { %8513 = vst.msk [vmem:[%s14291_s1 + $0x18] sm:$0xff] %vm1289_vm0, %v8509_v16 }
0x20cd   : > { %8512 = vst.msk [vmem:[%s14291_s1 + $0x10] sm:$0xff] %vm1289_vm0, %v8508_v11 }
0x20e1   : > { %v8722_v17 = vpop.f32.mrb[112].mxu1 }
0x20e2   : > { %v12058_v18 = vpop.f32.mrb[113].mxu1  ;;  %12060 = vmatprep.subr.mxu0 %v8722_v17 }
0x20e3   : > { %v8725_v19 = vpop.f32.mrb[114].mxu1  ;;  %12061 = vmatpush3.msra.mxu0 %v8722_v17 }
0x20e4   : > { %v12059_v20 = vpop.f32.mrb[115].mxu1  ;;  %12063 = vmatmul.mubr.msk.f32.vlgmr.msra.gmra.mrb[102].mxu0 %vm3236_vm7, %v14153_v56  ;;  %12068 = vmatprep.subr.mxu0 %v14225_v21  ;;  %v12755_v56 = vld [vmem:[%s13085_s27 + $0x148] sm:$0xff]  }
0x20e5   : > { %12069 = vmatpush3.msra.mxu0 %v14225_v21  ;;  %12065 = vmatprep.mubr.msk.f32.mxu0 %vm3236_vm7, %v14156_v59  ;;  %v12756_v59 = vld [vmem:[%s13085_s27 + $0x150] sm:$0xff]  }
0x20e6   : > { %12076 = vmatprep.subr.bf16.mxu0 %v12873_v46 }
0x20e8   : > { %12066 = vmatmul.mubr.msk.f32.gmra.mrb[116].mxu0 %vm3236_vm7, %v14163_v47  ;;  %v12757_v47 = vld [vmem:[%s13085_s27 + $0x158] sm:$0xff]  }
0x20e9   : > { %12070 = vmatprep.mubr.msk.f32.mxu0 %vm3236_vm7, %v14166_v63  ;;  %v12758_v63 = vld [vmem:[%s13085_s27 + $0x160] sm:$0xff]  }
0x20ec   : > { %12071 = vmatmul.mubr.msk.f32.vlgmr.msra.gmra.mrb[102].mxu0 %vm3236_vm7, %v14173_v1  ;;  %v12759_v1 = vld [vmem:[%s13085_s27 + $0x168] sm:$0xff]  }
0x20ed   : > { %12077 = vmatpush3.bf16.msra.mxu0 %v12754_v0  ;;  %12073 = vmatprep.mubr.msk.f32.mxu0 %vm3236_vm7, %v14176_v2 }
0x20ee   : > { %12078 = vmatprep.subr.bf16.mxu0 %v12873_v46 }
0x20f0   : > { %12074 = vmatmul.mubr.msk.f32.gmra.mrb[116].mxu0 %vm3236_vm7, %v14183_v3  ;;  %v12760_v3 = vld [vmem:[%s13085_s27 + $0x170] sm:$0xff]  }
0x20f1   : > { %12079 = vmatpush3.bf16.msra.mxu0 %v12755_v56  ;;  %12092 = vmatprep.mubr.msk.bf16.mxu0 %vm12874_vm3, %v12873_v46 }
0x20f2   : > { %12080 = vmatprep.subr.bf16.mxu0 %v12873_v46 }
0x20f5   : > { %12081 = vmatpush3.bf16.msra.mxu0 %v12756_v59 }
0x20f6   : > { %12082 = vmatprep.subr.bf16.mxu0 %v12873_v46 }
0x20f9   : > { %12083 = vmatpush3.bf16.msra.mxu0 %v12757_v47 }
0x20fa   : > { %12084 = vmatprep.subr.bf16.mxu0 %v12873_v46 }
0x20fd   : > { %12085 = vmatpush3.bf16.msra.mxu0 %v12758_v63 }
0x20fe   : > { %12086 = vmatprep.subr.bf16.mxu0 %v12873_v46 }
0x2101   : > { %12087 = vmatpush3.bf16.msra.mxu0 %v12759_v1  ;;  %v9235_v2 = vpop.f32.mrb[116].mxu1 }
0x2102   : > { %v12122_v21 = vpop.f32.mrb[117].mxu1  ;;  %12088 = vmatprep.subr.bf16.mxu0 %v12873_v46 }
0x2103   : > { %v9238_v22 = vpop.f32.mrb[118].mxu1 }
0x2104   : > { %v12123_v23 = vpop.f32.mrb[119].mxu1 }
0x2105   : > { %12089 = vmatpush3.bf16.msra.mxu0 %v12760_v3 }
0x2106   : > { %12090 = vmatprep.subr.bf16.mxu0 %v12873_v46  ;;  %v10296_v46 = vld [vmem:[%s13090_s4 + $0x1] ss:$0 sm:$0xff] }
0x2109   : > { %12091 = vmatpush3.bf16.msra.mxu0 %v12761_v26 }
0x210c   : > { %12093 = vmatmul.mubr.bf16.vlgmr.msra.gmra.mrb[120].mxu0 %v14109_v34 }
0x210d   : > { %12098 = vmatprep.mubr.msk.f32.mxu0 %vm3236_vm7, %v14186_v4 }
0x21df   : > { %v9025_v28 = vpop.f32.mrb[120].mxu0 }
0x21e0   : > { %v12094_v29 = vpop.f32.mrb[121].mxu0  ;;  %12096 = vmatprep.subr.mxu0 %v9025_v28 }
0x21e1   : > { %v9028_v31 = vpop.f32.mrb[122].mxu0  ;;  %12097 = vmatpush3.msra.mxu0 %v9025_v28 }
0x21e2   : > { %v12095_v32 = vpop.f32.mrb[123].mxu0  ;;  %12099 = vmatmul.mubr.msk.f32.vlgmr.msra.gmra.mrb[102].mxu0 %vm3236_vm7, %v14193_v8  ;;  %12124 = vmatprep.subr.mxu0 %v9235_v2 }
0x21e3   : > { %12125 = vmatpush3.msra.mxu0 %v9235_v2  ;;  %12101 = vmatprep.mubr.msk.f32.mxu0 %vm3236_vm7, %v14197_v12 }
0x21e6   : > { %12102 = vmatmul.mubr.msk.f32.gmra.mrb[116].mxu0 %vm3236_vm7, %v14206_v15 }
0x21e7   : > { %12126 = vmatprep.mubr.msk.f32.mxu0 %vm3236_vm7, %v14229_v24 }
0x21ea   : > { %12127 = vmatmul.mubr.msk.f32.vlgmr.msra.gmra.mrb[102].mxu0 %vm3236_vm7, %v14234_v27 }
0x21eb   : > { %12129 = vmatprep.mubr.msk.f32.mxu0 %vm3236_vm7, %v14238_v30 }
0x21ee   : > { %12130 = vmatmul.mubr.msk.f32.gmra.mrb[116].mxu0 %vm3236_vm7, %v14246_v33 }
0x22bd   : > { %v12128_v34 = vpop.f32.mrb[102].mxu0 }
0x22be   : > { %v9352_v4 = vadd.f32 %v12128_v34, %v10296_v46  ;;  %v9323_v8 = vpop.f32.mrb[103].mxu0 }
0x22bf   : > { %v9351_v12 = vadd.f32 %v10296_v46, %v9323_v8 }
0x22c0   : > { %v9356_v15 = vmul.f32 %v9352_v4, %v13232_v39 }
0x22c1   : > { %v9355_v24 = vmul.f32 %v9351_v12, %v13232_v39  ;;  %v12131_v27 = vpop.f32.mrb[116].mxu0 }
0x22c2   : > { %v9360_v42 = vadd.f32 %v9356_v15, %v13160_v37  ;;  %v9354_v35 = vadd.f32 %v12131_v27, %v10296_v46  ;;  %v9333_v30 = vpop.f32.mrb[117].mxu0 }
0x22c3   : > { %v9359_v36 = vadd.f32 %v9355_v24, %v13160_v37  ;;  %v9353_v33 = vadd.f32 %v10296_v46, %v9333_v30 }
0x22c4   : > { %9364 = vst.msk [vmem:[%s14291_s1 + $0x28] sm:$0xff] %vm1289_vm0, %v9360_v42  ;;  %v9358_v38 = vmul.f32 %v9354_v35, %v13232_v39 }
0x22c5   : > { %9363 = vst.msk [vmem:[%s14291_s1 + $0x20] sm:$0xff] %vm1289_vm0, %v9359_v36  ;;  %v9357_v40 = vmul.f32 %v9353_v33, %v13232_v39 }
0x22c6   : > { %v9362_v41 = vadd.f32 %v9358_v38, %v13160_v37 }
0x22c7   : > { %v9361_v43 = vadd.f32 %v9357_v40, %v13160_v37 }
0x22c8   : > { %9366 = vst.msk [vmem:[%s14291_s1 + $0x38] sm:$0xff] %vm1289_vm0, %v9362_v41 }
0x22c9   : > { %9365 = vst.msk [vmem:[%s14291_s1 + $0x30] sm:$0xff] %vm1289_vm0, %v9361_v43 }
0x22ca PF: > { %s96_s15 = sadd.s32 1, %s12828_s15  }
0x22cb   : > { %p93_p2 = scmp.ge.s32.totalorder %s96_s15, 4  }
0x22cd   :  { %95 = sbr.rel (!%p93_p2) target bundleno = 74 (0x4a), region = 310 }
0x22d4   :  { %9388 = vsyncpa [#allocation3], 1 }
0x22d5   :  { %9390 = vsyncpa [#allocation3 + $0x1], 1 }

</bundles_post_ra>
